<compile_context>
chip_gen: v5e
topology: v5e:2x2
jax: 0.10.0
libtpu: 0.0.40
codegen_flags: <defaults>
</compile_context>

<pallas_src>
import math

import jax
import jax.numpy as jnp
from jax import lax
from jax.experimental import pallas as pl
from jax.experimental.pallas import tpu as pltpu

# ---------------- model hyper-parameters --------------------------------------
NUM_LAYERS = 2
D_MODEL = 128          # lane-dense last dim (multiple of 128)
HEADS = 4
D_HEAD = D_MODEL // HEADS
D_FF = 256
EPS = 1e-6
NEG_BIAS = -1e9        # finite additive mask bias used in-kernel
NEG_INF = -1e18        # PyTorch masked_fill value (reference only)

# ---------------- packed weight-slab layout (static 128-aligned lane offsets) --
_W_ORDER = ["wqkv_s", "wo_s", "wq_c", "wkv_c", "wo_c", "w1"]
_W_WIDTHS = {"wqkv_s": 3 * D_MODEL, "wo_s": D_MODEL, "wq_c": D_MODEL,
             "wkv_c": 2 * D_MODEL, "wo_c": D_MODEL, "w1": D_FF}
_B_ORDER = ["ln1_g", "ln1_b", "bqkv_s", "bo_s", "ln2_g", "ln2_b", "bq_c", "bkv_c",
            "bo_c", "fln_g", "fln_b", "b1", "b2"]
_B_WIDTHS = {"ln1_g": D_MODEL, "ln1_b": D_MODEL, "bqkv_s": 3 * D_MODEL, "bo_s": D_MODEL,
             "ln2_g": D_MODEL, "ln2_b": D_MODEL, "bq_c": D_MODEL, "bkv_c": 2 * D_MODEL,
             "bo_c": D_MODEL, "fln_g": D_MODEL, "fln_b": D_MODEL, "b1": D_FF,
             "b2": D_MODEL}


def _make_slices(order, widths):
    out, off = {}, 0
    for name in order:
        out[name] = slice(off, off + widths[name])
        off += widths[name]
    return out, off


_W, W_SLAB = _make_slices(_W_ORDER, _W_WIDTHS)     # W_SLAB = 1280
_B, B_SLAB = _make_slices(_B_ORDER, _B_WIDTHS)     # B_SLAB = 2176


# ======================= fused decoder kernel ==================================

def _ln(x, g, b):
    """LayerNorm in f32. g/b are (1, D) and broadcast over rows."""
    mu = jnp.mean(x, axis=-1, keepdims=True)
    var = jnp.mean(jnp.square(x - mu), axis=-1, keepdims=True)
    return (x - mu) * lax.rsqrt(var + EPS) * g + b


def _attention(q, k, v, bias, wo_bf16):
    """q is pre-scaled by 1/sqrt(d_head).  bias is a full (rows, cols) additive f32
    bias (block-diagonal across batch + padding/causal mask).  Returns
    sum_h softmax(q_h k_h^T + bias) v_h @ wo_h in f32."""
    qb = q.astype(jnp.bfloat16)
    kb = k.astype(jnp.bfloat16)
    vb = v.astype(jnp.bfloat16)
    out = None
    # TODO(synk): per-head 32-lane slices (K=32 MXU contractions) are fine at toy
    # sizes; restructure to head-batched dots if seq/model sizes grow.
    for h in range(HEADS):                      # static unroll over heads
        sl = slice(h * D_HEAD, (h + 1) * D_HEAD)
        s = lax.dot_general(qb[:, sl], kb[:, sl], (((1,), (1,)), ((), ())),
                            preferred_element_type=jnp.float32)
        s = s + bias                            # same-shape add, no broadcast
        s = s - jnp.max(s, axis=-1, keepdims=True)
        e = jnp.exp(s)
        p = e * pl.reciprocal(jnp.sum(e, axis=-1, keepdims=True), approx=True)
        ctx = jnp.dot(p.astype(jnp.bfloat16), vb[:, sl],
                      preferred_element_type=jnp.float32)
        part = jnp.dot(ctx.astype(jnp.bfloat16), wo_bf16[sl, :],
                       preferred_element_type=jnp.float32)
        out = part if out is None else out + part
    return out


def _decoder_kernel(tgt_ref, mem_ref, tbias_ref, sbias_ref,
                    w_ref, w2_ref, b_ref, fln_ref, o_ref):
    D = D_MODEL
    BB, Tt, _ = tgt_ref.shape
    Ts = mem_ref.shape[1]
    M = BB * Tt                                  # flattened query rows
    Kv = BB * Ts                                 # flattened memory rows

    # Flatten the batch block into rows: all LN / projection / FFN ops are row-wise,
    # and the block-diagonal mask bias keeps attention per-batch.
    x = tgt_ref[...].astype(jnp.float32).reshape(M, D)
    mem_bf = mem_ref[...].reshape(Kv, D).astype(jnp.bfloat16)
    tgt_bias = tbias_ref[0]                      # (M, M)  f32 additive bias
    src_bias = sbias_ref[0]                      # (M, Kv) f32 additive bias

    # TODO(synk): all layers' weights stay VMEM-resident (~0.8 MB bf16); if sizes grow
    # beyond toy scale, move the layer loop onto an 'arbitrary' grid axis instead.
    for l in range(NUM_LAYERS):                  # static unroll over layers
        # ---- self-attention block (pre-LN fused) ----------------------------
        xn = _ln(x, b_ref[l, :, _B["ln1_g"]], b_ref[l, :, _B["ln1_b"]])
        qkv = (jnp.dot(xn.astype(jnp.bfloat16), w_ref[l, :, _W["wqkv_s"]],
                       preferred_element_type=jnp.float32)
               + b_ref[l, :, _B["bqkv_s"]])
        q, k, v = qkv[:, :D], qkv[:, D:2 * D], qkv[:, 2 * D:]
        attn = (_attention(q, k, v, tgt_bias, w_ref[l, :, _W["wo_s"]])
                + b_ref[l, :, _B["bo_s"]])
        x = attn + x                             # dropout == identity

        # ---- context attention block (pre-LN fused) --------------------------
        qn = _ln(x, b_ref[l, :, _B["ln2_g"]], b_ref[l, :, _B["ln2_b"]])
        qc = (jnp.dot(qn.astype(jnp.bfloat16), w_ref[l, :, _W["wq_c"]],
                      preferred_element_type=jnp.float32) + b_ref[l, :, _B["bq_c"]])
        kvc = (jnp.dot(mem_bf, w_ref[l, :, _W["wkv_c"]],
                       preferred_element_type=jnp.float32) + b_ref[l, :, _B["bkv_c"]])
        kc, vc = kvc[:, :D], kvc[:, D:]
        ctx = (_attention(qc, kc, vc, src_bias, w_ref[l, :, _W["wo_c"]])
               + b_ref[l, :, _B["bo_c"]])
        mid = ctx + x

        # ---- position-wise feed-forward (LN + residual fused) ----------------
        h = _ln(mid, b_ref[l, :, _B["fln_g"]], b_ref[l, :, _B["fln_b"]])
        inter = jnp.maximum(
            jnp.dot(h.astype(jnp.bfloat16), w_ref[l, :, _W["w1"]],
                    preferred_element_type=jnp.float32) + b_ref[l, :, _B["b1"]], 0.0)
        x = (jnp.dot(inter.astype(jnp.bfloat16), w2_ref[l],
                     preferred_element_type=jnp.float32)
             + b_ref[l, :, _B["b2"]]) + mid

    # final LayerNorm of the decoder stack
    y = _ln(x, fln_ref[:, 0:D], fln_ref[:, D:2 * D])
    o_ref[...] = y.reshape(BB, Tt, D).astype(o_ref.dtype)


# ======================= pallas_call wrapper ===================================

def _default_num_blocks(batch):
    """1 grid step on single-TensorCore chips (v5e/v6e); 2 parallel blocks on
    dual-TensorCore chips (v7x) so both cores get work."""
    try:
        kind = jax.devices()[0].device_kind.lower()
    except Exception:
        kind = ""
    if batch % 2 == 0 and ("v7" in kind or "tpu7" in kind or "7x" in kind):
        return 2
    return 1


def _build_block_biases(tgt_pad_mask, src_pad_mask, num_blocks):
    """Binary masks -> block-diagonal additive f32 biases over flattened batch rows."""
    B, Tt, _ = tgt_pad_mask.shape
    Ts = src_pad_mask.shape[-1]
    BB = B // num_blocks

    tb = jnp.where(tgt_pad_mask == 0, NEG_BIAS, 0.0).astype(jnp.float32)   # (B,Tt,Tt)
    sb = jnp.where(src_pad_mask == 0, NEG_BIAS, 0.0).astype(jnp.float32)   # (B,1,Ts)
    sb = jnp.broadcast_to(sb, (B, Tt, Ts))

    def blockdiag(bias, Tq, Tkv):
        b4 = bias.reshape(num_blocks, BB, Tq, Tkv)
        full = jnp.broadcast_to(b4[:, :, :, None, :], (num_blocks, BB, Tq, BB, Tkv))
        full = full.reshape(num_blocks, BB * Tq, BB * Tkv)
        rb = jnp.arange(BB * Tq)[:, None] // Tq
        cb = jnp.arange(BB * Tkv)[None, :] // Tkv
        cross = jnp.where(rb == cb, 0.0, NEG_BIAS).astype(jnp.float32)
        return full + cross[None]

    return blockdiag(tb, Tt, Tt), blockdiag(sb, Tt, Ts)


def transformer_decoder_forward(packed, tgt, memory_bank, src_pad_mask, tgt_pad_mask,
                                num_blocks=None):
    B, Tt, D = tgt.shape
    Ts = memory_bank.shape[1]
    if num_blocks is None:
        num_blocks = _default_num_blocks(B)
    if B % num_blocks != 0:
        num_blocks = 1
    BB = B // num_blocks

    tgt_bias, src_bias = _build_block_biases(tgt_pad_mask, src_pad_mask, num_blocks)
    weights = (packed["w"], packed["w2"], packed["b"], packed["fln"])

    def full_spec(a):
        return pl.BlockSpec(a.shape, lambda g, n=a.ndim: (0,) * n)

    in_specs = [
        pl.BlockSpec((BB, Tt, D), lambda g: (g, 0, 0)),             # tgt
        pl.BlockSpec((BB, Ts, D), lambda g: (g, 0, 0)),             # memory bank
        pl.BlockSpec((1, BB * Tt, BB * Tt), lambda g: (g, 0, 0)),   # tgt bias (block-diag)
        pl.BlockSpec((1, BB * Tt, BB * Ts), lambda g: (g, 0, 0)),   # src bias (block-diag)
    ] + [full_spec(a) for a in weights]

    return pl.pallas_call(
        _decoder_kernel,
        out_shape=jax.ShapeDtypeStruct((B, Tt, D), tgt.dtype),
        grid=(num_blocks,),
        in_specs=in_specs,
        out_specs=pl.BlockSpec((BB, Tt, D), lambda g: (g, 0, 0)),
        compiler_params=pltpu.CompilerParams(
            dimension_semantics=("parallel",),
            vmem_limit_bytes=32 * 1024 * 1024),
    )(tgt, memory_bank, tgt_bias, src_bias, *weights)


# ======================= parameter init & packing ==============================

def _init_linear(key, d_in, d_out):
    # PyTorch nn.Linear default: U(-1/sqrt(fan_in), 1/sqrt(fan_in)); stored (in, out).
    kw, kb = jax.random.split(key)
    bound = 1.0 / math.sqrt(d_in)
    w = jax.random.uniform(kw, (d_in, d_out), jnp.float32, -bound, bound)
    b = jax.random.uniform(kb, (1, d_out), jnp.float32, -bound, bound)
    return w, b


def init_params(key):
    params = {"layers": []}
    for l in range(NUM_LAYERS):
        lkey = jax.random.fold_in(key, l)
        ks = jax.random.split(lkey, 10)

        def attn(k0, k1, k2, k3):
            wq, bq = _init_linear(k0, D_MODEL, D_MODEL)
            wk, bk = _init_linear(k1, D_MODEL, D_MODEL)
            wv, bv = _init_linear(k2, D_MODEL, D_MODEL)
            wo, bo = _init_linear(k3, D_MODEL, D_MODEL)
            return dict(wq=wq, bq=bq, wk=wk, bk=bk, wv=wv, bv=bv, wo=wo, bo=bo)

        w1, b1 = _init_linear(ks[8], D_MODEL, D_FF)
        w2, b2 = _init_linear(ks[9], D_FF, D_MODEL)
        params["layers"].append(dict(
            self_attn=attn(ks[0], ks[1], ks[2], ks[3]),
            ctx_attn=attn(ks[4], ks[5], ks[6], ks[7]),
            ffn=dict(w1=w1, b1=b1, w2=w2, b2=b2,
                     ln_g=jnp.ones((1, D_MODEL), jnp.float32),
                     ln_b=jnp.zeros((1, D_MODEL), jnp.float32)),
            ln1_g=jnp.ones((1, D_MODEL), jnp.float32),
            ln1_b=jnp.zeros((1, D_MODEL), jnp.float32),
            ln2_g=jnp.ones((1, D_MODEL), jnp.float32),
            ln2_b=jnp.zeros((1, D_MODEL), jnp.float32),
        ))
    params["ln_g"] = jnp.ones((1, D_MODEL), jnp.float32)
    params["ln_b"] = jnp.zeros((1, D_MODEL), jnp.float32)
    return params


def pack_params(params):
    """Pack per-layer weights into a few lane-concatenated slabs (layer-stacked).
    Big matmul slabs stored in bf16 (MXU-native); biases/LN params stay f32.
    1/sqrt(d_head) is folded into the query projection weights/bias."""
    scale = 1.0 / math.sqrt(D_HEAD)
    w_slabs, w2_slabs, b_slabs = [], [], []
    for lp in params["layers"]:
        sa, ca, ff = lp["self_attn"], lp["ctx_attn"], lp["ffn"]
        wparts = {
            "wqkv_s": jnp.concatenate([sa["wq"] * scale, sa["wk"], sa["wv"]], axis=1),
            "wo_s": sa["wo"],
            "wq_c": ca["wq"] * scale,
            "wkv_c": jnp.concatenate([ca["wk"], ca["wv"]], axis=1),
            "wo_c": ca["wo"],
            "w1": ff["w1"],
        }
        bparts = {
            "ln1_g": lp["ln1_g"], "ln1_b": lp["ln1_b"],
            "bqkv_s": jnp.concatenate([sa["bq"] * scale, sa["bk"], sa["bv"]], axis=1),
            "bo_s": sa["bo"],
            "ln2_g": lp["ln2_g"], "ln2_b": lp["ln2_b"],
            "bq_c": ca["bq"] * scale,
            "bkv_c": jnp.concatenate([ca["bk"], ca["bv"]], axis=1),
            "bo_c": ca["bo"],
            "fln_g": ff["ln_g"], "fln_b": ff["ln_b"],
            "b1": ff["b1"], "b2": ff["b2"],
        }
        w_slabs.append(jnp.concatenate([wparts[n] for n in _W_ORDER], axis=1))
        b_slabs.append(jnp.concatenate([bparts[n] for n in _B_ORDER], axis=1))
        w2_slabs.append(ff["w2"])
    return dict(
        w=jnp.stack(w_slabs).astype(jnp.bfloat16),        # (L, D, 1280) bf16
        w2=jnp.stack(w2_slabs).astype(jnp.bfloat16),      # (L, D_FF, D) bf16
        b=jnp.stack(b_slabs),                             # (L, 1, 2176) f32
        fln=jnp.concatenate([params["ln_g"], params["ln_b"]], axis=1),  # (1, 256) f32
    )


# ======================= pure-JAX reference (correctness check) ================

def _layernorm_ref(x, g, b):
    mu = jnp.mean(x, -1, keepdims=True)
    var = jnp.mean(jnp.square(x - mu), -1, keepdims=True)
    return (x - mu) / jnp.sqrt(var + EPS) * g + b


def _mha_ref(query, key, value, mask, p):
    B, Tq, D = query.shape
    Tk = key.shape[1]
    q = query @ p["wq"] + p["bq"]
    k = key @ p["wk"] + p["bk"]
    v = value @ p["wv"] + p["bv"]
    shp = lambda x, T: x.reshape(B, T, HEADS, D_HEAD).transpose(0, 2, 1, 3)
    q = shp(q, Tq) / math.sqrt(D_HEAD)
    k = shp(k, Tk)
    v = shp(v, Tk)
    s = jnp.einsum("bhqd,bhkd->bhqk", q, k)
    s = jnp.where(mask[:, None] == 0, NEG_INF, s)
    a = jax.nn.softmax(s, axis=-1)
    ctx = jnp.einsum("bhqk,bhkd->bhqd", a, v)
    ctx = ctx.transpose(0, 2, 1, 3).reshape(B, Tq, D)
    return ctx @ p["wo"] + p["bo"]


def _decoder_ref(params, tgt, memory_bank, src_pad_mask, tgt_pad_mask):
    x = tgt
    for lp in params["layers"]:
        xn = _layernorm_ref(x, lp["ln1_g"], lp["ln1_b"])
        x = _mha_ref(xn, xn, xn, tgt_pad_mask, lp["self_attn"]) + x
        qn = _layernorm_ref(x, lp["ln2_g"], lp["ln2_b"])
        mid = _mha_ref(qn, memory_bank, memory_bank, src_pad_mask, lp["ctx_attn"]) + x
        fp = lp["ffn"]
        h = _layernorm_ref(mid, fp["ln_g"], fp["ln_b"])
        x = jnp.maximum(h @ fp["w1"] + fp["b1"], 0.0) @ fp["w2"] + fp["b2"] + mid
    return _layernorm_ref(x, params["ln_g"], params["ln_b"])


# ======================= driver ================================================

if __name__ == "__main__":
    key = jax.random.PRNGKey(0)
    k_param, k_tgt, k_mem = jax.random.split(key, 3)

    B, TGT_LEN, SRC_LEN = 2, 8, 8
    params = init_params(k_param)
    packed = pack_params(params)

    tgt = jax.random.normal(k_tgt, (B, TGT_LEN, D_MODEL), jnp.float32)
    memory_bank = jax.random.normal(k_mem, (B, SRC_LEN, D_MODEL), jnp.float32)

    # causal (future) mask for the target side: (B, tgt_len, tgt_len)
    tgt_pad_mask = jnp.broadcast_to(
        jnp.tril(jnp.ones((TGT_LEN, TGT_LEN), jnp.int32)), (B, TGT_LEN, TGT_LEN))
    # source padding mask: (B, 1, src_len); second batch element has 2 padded keys
    src_valid = jnp.array([SRC_LEN, SRC_LEN - 2], jnp.int32)
    src_pad_mask = (jnp.arange(SRC_LEN)[None, None, :] < src_valid[:, None, None]).astype(jnp.int32)

    out = transformer_decoder_forward(packed, tgt, memory_bank, src_pad_mask, tgt_pad_mask)
    out = jax.block_until_ready(out)

    ref = _decoder_ref(params, tgt, memory_bank, src_pad_mask, tgt_pad_mask)
    # bf16 MXU operands (f32 accumulation) introduce ~1e-3..1e-2 deviations vs the
    # f32 reference; tolerance relaxed accordingly.
    if not jnp.allclose(out, ref, atol=2e-2, rtol=2e-2):
        err = jnp.max(jnp.abs(out - ref))
        raise AssertionError(f"Pallas output mismatch vs JAX reference (max abs err {err})")

    # TODO(synk): dropout layers are identity (inference semantics); no in-kernel RNG dropout.
    print("KERNEL_OK")
</pallas_src>

<mosaic_0001>
module attributes {stable_mosaic.version = 11 : i64} {
  func.func @_decoder_kernel(%arg0: i32, %arg1: memref<2x8x128xf32, #tpu.memory_space<vmem>>, %arg2: memref<2x8x128xf32, #tpu.memory_space<vmem>>, %arg3: memref<1x16x16xf32, #tpu.memory_space<vmem>>, %arg4: memref<1x16x16xf32, #tpu.memory_space<vmem>>, %arg5: memref<2x128x1280xbf16, #tpu.memory_space<vmem>>, %arg6: memref<2x256x128xbf16, #tpu.memory_space<vmem>>, %arg7: memref<2x1x2176xf32, #tpu.memory_space<vmem>>, %arg8: memref<1x256xf32, #tpu.memory_space<vmem>>, %arg9: memref<2x8x128xf32, #tpu.memory_space<vmem>>) attributes {dimension_semantics = [#tpu.dimension_semantics<parallel>], iteration_bounds = array<i64: 1>, scalar_prefetch = 0 : i64, scratch_operands = 0 : i64, tpu.core_type = #tpu.core_type<tc>, window_params = [{transform_indices = @transform_0, window_bounds = array<i64: 2, 8, 128>}, {transform_indices = @transform_1, window_bounds = array<i64: 2, 8, 128>}, {transform_indices = @transform_2, window_bounds = array<i64: 1, 16, 16>}, {transform_indices = @transform_3, window_bounds = array<i64: 1, 16, 16>}, {pipeline_mode = #tpu.pipeline_mode<synchronous>, transform_indices = @transform_4, window_bounds = array<i64: 2, 128, 1280>}, {pipeline_mode = #tpu.pipeline_mode<synchronous>, transform_indices = @transform_5, window_bounds = array<i64: 2, 256, 128>}, {pipeline_mode = #tpu.pipeline_mode<synchronous>, transform_indices = @transform_6, window_bounds = array<i64: 2, 1, 2176>}, {pipeline_mode = #tpu.pipeline_mode<synchronous>, transform_indices = @transform_7, window_bounds = array<i64: 1, 256>}, {transform_indices = @transform_8, window_bounds = array<i64: 2, 8, 128>}]} {
    %c0 = arith.constant 0 : index
    %c0_0 = arith.constant 0 : index
    %c0_1 = arith.constant 0 : index
    %0 = vector.load %arg1[%c0, %c0_0, %c0_1] : memref<2x8x128xf32, #tpu.memory_space<vmem>>, vector<2x8x128xf32>
    %1 = vector.shape_cast %0 : vector<2x8x128xf32> to vector<16x128xf32>
    %c0_2 = arith.constant 0 : index
    %c0_3 = arith.constant 0 : index
    %c0_4 = arith.constant 0 : index
    %2 = vector.load %arg2[%c0_2, %c0_3, %c0_4] : memref<2x8x128xf32, #tpu.memory_space<vmem>>, vector<2x8x128xf32>
    %3 = vector.shape_cast %2 : vector<2x8x128xf32> to vector<16x128xf32>
    %4 = arith.truncf %3 : vector<16x128xf32> to vector<16x128xbf16>
    %c0_5 = arith.constant 0 : index
    %c0_6 = arith.constant 0 : index
    %c0_7 = arith.constant 0 : index
    %5 = vector.load %arg3[%c0_5, %c0_6, %c0_7] : memref<1x16x16xf32, #tpu.memory_space<vmem>>, vector<1x16x16xf32>
    %6 = vector.shape_cast %5 : vector<1x16x16xf32> to vector<16x16xf32>
    %c0_8 = arith.constant 0 : index
    %c0_9 = arith.constant 0 : index
    %c0_10 = arith.constant 0 : index
    %7 = vector.load %arg4[%c0_8, %c0_9, %c0_10] : memref<1x16x16xf32, #tpu.memory_space<vmem>>, vector<1x16x16xf32>
    %8 = vector.shape_cast %7 : vector<1x16x16xf32> to vector<16x16xf32>
    %c0_11 = arith.constant 0 : index
    %c0_12 = arith.constant 0 : index
    %c0_13 = arith.constant 0 : index
    %9 = vector.load %arg7[%c0_11, %c0_12, %c0_13] : memref<2x1x2176xf32, #tpu.memory_space<vmem>>, vector<1x1x128xf32>
    %10 = vector.shape_cast %9 : vector<1x1x128xf32> to vector<1x128xf32>
    %c0_14 = arith.constant 0 : index
    %c0_15 = arith.constant 0 : index
    %c128 = arith.constant 128 : index
    %11 = vector.load %arg7[%c0_14, %c0_15, %c128] : memref<2x1x2176xf32, #tpu.memory_space<vmem>>, vector<1x1x128xf32>
    %12 = vector.shape_cast %11 : vector<1x1x128xf32> to vector<1x128xf32>
    %cst = arith.constant dense<0.000000e+00> : vector<16xf32>
    %13 = vector.multi_reduction <add>, %1, %cst [1] : vector<16x128xf32> to vector<16xf32>
    %14 = vector.shape_cast %13 : vector<16xf32> to vector<16x1xf32>
    %cst_16 = arith.constant 1.280000e+02 : f32
    %15 = vector.broadcast %cst_16 : f32 to vector<16x1xf32>
    %16 = arith.divf %14, %15 : vector<16x1xf32>
    %17 = vector.broadcast %16 : vector<16x1xf32> to vector<16x128xf32>
    %18 = arith.subf %1, %17 : vector<16x128xf32>
    %19 = arith.mulf %18, %18 : vector<16x128xf32>
    %cst_17 = arith.constant dense<0.000000e+00> : vector<16xf32>
    %20 = vector.multi_reduction <add>, %19, %cst_17 [1] : vector<16x128xf32> to vector<16xf32>
    %21 = vector.shape_cast %20 : vector<16xf32> to vector<16x1xf32>
    %cst_18 = arith.constant 1.280000e+02 : f32
    %22 = vector.broadcast %cst_18 : f32 to vector<16x1xf32>
    %23 = arith.divf %21, %22 : vector<16x1xf32>
    %24 = vector.broadcast %16 : vector<16x1xf32> to vector<16x128xf32>
    %25 = arith.subf %1, %24 : vector<16x128xf32>
    %cst_19 = arith.constant 9.99999997E-7 : f32
    %26 = vector.broadcast %cst_19 : f32 to vector<16x1xf32>
    %27 = arith.addf %23, %26 : vector<16x1xf32>
    %28 = math.rsqrt %27 : vector<16x1xf32>
    %29 = vector.broadcast %28 : vector<16x1xf32> to vector<16x128xf32>
    %30 = arith.mulf %25, %29 : vector<16x128xf32>
    %31 = vector.broadcast %10 : vector<1x128xf32> to vector<16x128xf32>
    %32 = arith.mulf %30, %31 : vector<16x128xf32>
    %33 = vector.broadcast %12 : vector<1x128xf32> to vector<16x128xf32>
    %34 = arith.addf %32, %33 : vector<16x128xf32>
    %35 = arith.truncf %34 : vector<16x128xf32> to vector<16x128xbf16>
    %c0_20 = arith.constant 0 : index
    %c0_21 = arith.constant 0 : index
    %c0_22 = arith.constant 0 : index
    %36 = vector.load %arg5[%c0_20, %c0_21, %c0_22] : memref<2x128x1280xbf16, #tpu.memory_space<vmem>>, vector<1x128x384xbf16>
    %37 = vector.shape_cast %36 : vector<1x128x384xbf16> to vector<128x384xbf16>
    %cst_23 = arith.constant dense<0.000000e+00> : vector<16x384xf32>
    %38 = tpu.matmul %35, %37, %cst_23 {dimension_numbers = #tpu.dot_dimension_numbers<[1], [0], [0], [1], [0, 0, 1, 1], [], []>} : vector<16x128xbf16>, vector<128x384xbf16>, vector<16x384xf32> -> vector<16x384xf32>
    %c0_24 = arith.constant 0 : index
    %c0_25 = arith.constant 0 : index
    %c256 = arith.constant 256 : index
    %39 = vector.load %arg7[%c0_24, %c0_25, %c256] : memref<2x1x2176xf32, #tpu.memory_space<vmem>>, vector<1x1x384xf32>
    %40 = vector.shape_cast %39 : vector<1x1x384xf32> to vector<1x384xf32>
    %41 = vector.broadcast %40 : vector<1x384xf32> to vector<16x384xf32>
    %42 = arith.addf %38, %41 : vector<16x384xf32>
    %43 = vector.extract_strided_slice %42 {offsets = [0, 0], sizes = [16, 128], strides = [1, 1]} : vector<16x384xf32> to vector<16x128xf32>
    %44 = vector.extract_strided_slice %42 {offsets = [0, 128], sizes = [16, 128], strides = [1, 1]} : vector<16x384xf32> to vector<16x128xf32>
    %45 = vector.extract_strided_slice %42 {offsets = [0, 256], sizes = [16, 128], strides = [1, 1]} : vector<16x384xf32> to vector<16x128xf32>
    %c0_26 = arith.constant 0 : index
    %c0_27 = arith.constant 0 : index
    %c384 = arith.constant 384 : index
    %46 = vector.load %arg5[%c0_26, %c0_27, %c384] : memref<2x128x1280xbf16, #tpu.memory_space<vmem>>, vector<1x128x128xbf16>
    %47 = vector.shape_cast %46 : vector<1x128x128xbf16> to vector<128x128xbf16>
    %48 = arith.truncf %43 : vector<16x128xf32> to vector<16x128xbf16>
    %49 = arith.truncf %44 : vector<16x128xf32> to vector<16x128xbf16>
    %50 = arith.truncf %45 : vector<16x128xf32> to vector<16x128xbf16>
    %51 = vector.extract_strided_slice %48 {offsets = [0, 0], sizes = [16, 32], strides = [1, 1]} : vector<16x128xbf16> to vector<16x32xbf16>
    %52 = vector.extract_strided_slice %49 {offsets = [0, 0], sizes = [16, 32], strides = [1, 1]} : vector<16x128xbf16> to vector<16x32xbf16>
    %cst_28 = arith.constant dense<0.000000e+00> : vector<16x16xf32>
    %53 = tpu.matmul %51, %52, %cst_28 {dimension_numbers = #tpu.dot_dimension_numbers<[1], [1], [0], [0], [0, 0, 1, 0], [], []>} : vector<16x32xbf16>, vector<16x32xbf16>, vector<16x16xf32> -> vector<16x16xf32>
    %54 = arith.addf %53, %6 : vector<16x16xf32>
    %cst_29 = arith.constant dense<0xFF800000> : vector<16xf32>
    %55 = vector.multi_reduction <maximumf>, %54, %cst_29 [1] : vector<16x16xf32> to vector<16xf32>
    %56 = vector.shape_cast %55 : vector<16xf32> to vector<16x1xf32>
    %57 = vector.broadcast %56 : vector<16x1xf32> to vector<16x16xf32>
    %58 = arith.subf %54, %57 : vector<16x16xf32>
    %59 = math.exp %58 : vector<16x16xf32>
    %cst_30 = arith.constant dense<0.000000e+00> : vector<16xf32>
    %60 = vector.multi_reduction <add>, %59, %cst_30 [1] : vector<16x16xf32> to vector<16xf32>
    %61 = vector.shape_cast %60 : vector<16xf32> to vector<16x1xf32>
    %62 = tpu.reciprocal %61 {approx = true} : vector<16x1xf32> -> vector<16x1xf32>
    %63 = vector.broadcast %62 : vector<16x1xf32> to vector<16x16xf32>
    %64 = arith.mulf %59, %63 : vector<16x16xf32>
    %65 = arith.truncf %64 : vector<16x16xf32> to vector<16x16xbf16>
    %66 = vector.extract_strided_slice %50 {offsets = [0, 0], sizes = [16, 32], strides = [1, 1]} : vector<16x128xbf16> to vector<16x32xbf16>
    %cst_31 = arith.constant dense<0.000000e+00> : vector<16x32xf32>
    %67 = tpu.matmul %65, %66, %cst_31 {dimension_numbers = #tpu.dot_dimension_numbers<[1], [0], [0], [1], [0, 0, 1, 1], [], []>} : vector<16x16xbf16>, vector<16x32xbf16>, vector<16x32xf32> -> vector<16x32xf32>
    %68 = arith.truncf %67 : vector<16x32xf32> to vector<16x32xbf16>
    %69 = vector.extract_strided_slice %47 {offsets = [0, 0], sizes = [32, 128], strides = [1, 1]} : vector<128x128xbf16> to vector<32x128xbf16>
    %cst_32 = arith.constant dense<0.000000e+00> : vector<16x128xf32>
    %70 = tpu.matmul %68, %69, %cst_32 {dimension_numbers = #tpu.dot_dimension_numbers<[1], [0], [0], [1], [0, 0, 1, 1], [], []>} : vector<16x32xbf16>, vector<32x128xbf16>, vector<16x128xf32> -> vector<16x128xf32>
    %71 = vector.extract_strided_slice %48 {offsets = [0, 32], sizes = [16, 32], strides = [1, 1]} : vector<16x128xbf16> to vector<16x32xbf16>
    %72 = vector.extract_strided_slice %49 {offsets = [0, 32], sizes = [16, 32], strides = [1, 1]} : vector<16x128xbf16> to vector<16x32xbf16>
    %cst_33 = arith.constant dense<0.000000e+00> : vector<16x16xf32>
    %73 = tpu.matmul %71, %72, %cst_33 {dimension_numbers = #tpu.dot_dimension_numbers<[1], [1], [0], [0], [0, 0, 1, 0], [], []>} : vector<16x32xbf16>, vector<16x32xbf16>, vector<16x16xf32> -> vector<16x16xf32>
    %74 = arith.addf %73, %6 : vector<16x16xf32>
    %cst_34 = arith.constant dense<0xFF800000> : vector<16xf32>
    %75 = vector.multi_reduction <maximumf>, %74, %cst_34 [1] : vector<16x16xf32> to vector<16xf32>
    %76 = vector.shape_cast %75 : vector<16xf32> to vector<16x1xf32>
    %77 = vector.broadcast %76 : vector<16x1xf32> to vector<16x16xf32>
    %78 = arith.subf %74, %77 : vector<16x16xf32>
    %79 = math.exp %78 : vector<16x16xf32>
    %cst_35 = arith.constant dense<0.000000e+00> : vector<16xf32>
    %80 = vector.multi_reduction <add>, %79, %cst_35 [1] : vector<16x16xf32> to vector<16xf32>
    %81 = vector.shape_cast %80 : vector<16xf32> to vector<16x1xf32>
    %82 = tpu.reciprocal %81 {approx = true} : vector<16x1xf32> -> vector<16x1xf32>
    %83 = vector.broadcast %82 : vector<16x1xf32> to vector<16x16xf32>
    %84 = arith.mulf %79, %83 : vector<16x16xf32>
    %85 = arith.truncf %84 : vector<16x16xf32> to vector<16x16xbf16>
    %86 = vector.extract_strided_slice %50 {offsets = [0, 32], sizes = [16, 32], strides = [1, 1]} : vector<16x128xbf16> to vector<16x32xbf16>
    %cst_36 = arith.constant dense<0.000000e+00> : vector<16x32xf32>
    %87 = tpu.matmul %85, %86, %cst_36 {dimension_numbers = #tpu.dot_dimension_numbers<[1], [0], [0], [1], [0, 0, 1, 1], [], []>} : vector<16x16xbf16>, vector<16x32xbf16>, vector<16x32xf32> -> vector<16x32xf32>
    %88 = arith.truncf %87 : vector<16x32xf32> to vector<16x32xbf16>
    %89 = vector.extract_strided_slice %47 {offsets = [32, 0], sizes = [32, 128], strides = [1, 1]} : vector<128x128xbf16> to vector<32x128xbf16>
    %cst_37 = arith.constant dense<0.000000e+00> : vector<16x128xf32>
    %90 = tpu.matmul %88, %89, %cst_37 {dimension_numbers = #tpu.dot_dimension_numbers<[1], [0], [0], [1], [0, 0, 1, 1], [], []>} : vector<16x32xbf16>, vector<32x128xbf16>, vector<16x128xf32> -> vector<16x128xf32>
    %91 = arith.addf %70, %90 : vector<16x128xf32>
    %92 = vector.extract_strided_slice %48 {offsets = [0, 64], sizes = [16, 32], strides = [1, 1]} : vector<16x128xbf16> to vector<16x32xbf16>
    %93 = vector.extract_strided_slice %49 {offsets = [0, 64], sizes = [16, 32], strides = [1, 1]} : vector<16x128xbf16> to vector<16x32xbf16>
    %cst_38 = arith.constant dense<0.000000e+00> : vector<16x16xf32>
    %94 = tpu.matmul %92, %93, %cst_38 {dimension_numbers = #tpu.dot_dimension_numbers<[1], [1], [0], [0], [0, 0, 1, 0], [], []>} : vector<16x32xbf16>, vector<16x32xbf16>, vector<16x16xf32> -> vector<16x16xf32>
    %95 = arith.addf %94, %6 : vector<16x16xf32>
    %cst_39 = arith.constant dense<0xFF800000> : vector<16xf32>
    %96 = vector.multi_reduction <maximumf>, %95, %cst_39 [1] : vector<16x16xf32> to vector<16xf32>
    %97 = vector.shape_cast %96 : vector<16xf32> to vector<16x1xf32>
    %98 = vector.broadcast %97 : vector<16x1xf32> to vector<16x16xf32>
    %99 = arith.subf %95, %98 : vector<16x16xf32>
    %100 = math.exp %99 : vector<16x16xf32>
    %cst_40 = arith.constant dense<0.000000e+00> : vector<16xf32>
    %101 = vector.multi_reduction <add>, %100, %cst_40 [1] : vector<16x16xf32> to vector<16xf32>
    %102 = vector.shape_cast %101 : vector<16xf32> to vector<16x1xf32>
    %103 = tpu.reciprocal %102 {approx = true} : vector<16x1xf32> -> vector<16x1xf32>
    %104 = vector.broadcast %103 : vector<16x1xf32> to vector<16x16xf32>
    %105 = arith.mulf %100, %104 : vector<16x16xf32>
    %106 = arith.truncf %105 : vector<16x16xf32> to vector<16x16xbf16>
    %107 = vector.extract_strided_slice %50 {offsets = [0, 64], sizes = [16, 32], strides = [1, 1]} : vector<16x128xbf16> to vector<16x32xbf16>
    %cst_41 = arith.constant dense<0.000000e+00> : vector<16x32xf32>
    %108 = tpu.matmul %106, %107, %cst_41 {dimension_numbers = #tpu.dot_dimension_numbers<[1], [0], [0], [1], [0, 0, 1, 1], [], []>} : vector<16x16xbf16>, vector<16x32xbf16>, vector<16x32xf32> -> vector<16x32xf32>
    %109 = arith.truncf %108 : vector<16x32xf32> to vector<16x32xbf16>
    %110 = vector.extract_strided_slice %47 {offsets = [64, 0], sizes = [32, 128], strides = [1, 1]} : vector<128x128xbf16> to vector<32x128xbf16>
    %cst_42 = arith.constant dense<0.000000e+00> : vector<16x128xf32>
    %111 = tpu.matmul %109, %110, %cst_42 {dimension_numbers = #tpu.dot_dimension_numbers<[1], [0], [0], [1], [0, 0, 1, 1], [], []>} : vector<16x32xbf16>, vector<32x128xbf16>, vector<16x128xf32> -> vector<16x128xf32>
    %112 = arith.addf %91, %111 : vector<16x128xf32>
    %113 = vector.extract_strided_slice %48 {offsets = [0, 96], sizes = [16, 32], strides = [1, 1]} : vector<16x128xbf16> to vector<16x32xbf16>
    %114 = vector.extract_strided_slice %49 {offsets = [0, 96], sizes = [16, 32], strides = [1, 1]} : vector<16x128xbf16> to vector<16x32xbf16>
    %cst_43 = arith.constant dense<0.000000e+00> : vector<16x16xf32>
    %115 = tpu.matmul %113, %114, %cst_43 {dimension_numbers = #tpu.dot_dimension_numbers<[1], [1], [0], [0], [0, 0, 1, 0], [], []>} : vector<16x32xbf16>, vector<16x32xbf16>, vector<16x16xf32> -> vector<16x16xf32>
    %116 = arith.addf %115, %6 : vector<16x16xf32>
    %cst_44 = arith.constant dense<0xFF800000> : vector<16xf32>
    %117 = vector.multi_reduction <maximumf>, %116, %cst_44 [1] : vector<16x16xf32> to vector<16xf32>
    %118 = vector.shape_cast %117 : vector<16xf32> to vector<16x1xf32>
    %119 = vector.broadcast %118 : vector<16x1xf32> to vector<16x16xf32>
    %120 = arith.subf %116, %119 : vector<16x16xf32>
    %121 = math.exp %120 : vector<16x16xf32>
    %cst_45 = arith.constant dense<0.000000e+00> : vector<16xf32>
    %122 = vector.multi_reduction <add>, %121, %cst_45 [1] : vector<16x16xf32> to vector<16xf32>
    %123 = vector.shape_cast %122 : vector<16xf32> to vector<16x1xf32>
    %124 = tpu.reciprocal %123 {approx = true} : vector<16x1xf32> -> vector<16x1xf32>
    %125 = vector.broadcast %124 : vector<16x1xf32> to vector<16x16xf32>
    %126 = arith.mulf %121, %125 : vector<16x16xf32>
    %127 = arith.truncf %126 : vector<16x16xf32> to vector<16x16xbf16>
    %128 = vector.extract_strided_slice %50 {offsets = [0, 96], sizes = [16, 32], strides = [1, 1]} : vector<16x128xbf16> to vector<16x32xbf16>
    %cst_46 = arith.constant dense<0.000000e+00> : vector<16x32xf32>
    %129 = tpu.matmul %127, %128, %cst_46 {dimension_numbers = #tpu.dot_dimension_numbers<[1], [0], [0], [1], [0, 0, 1, 1], [], []>} : vector<16x16xbf16>, vector<16x32xbf16>, vector<16x32xf32> -> vector<16x32xf32>
    %130 = arith.truncf %129 : vector<16x32xf32> to vector<16x32xbf16>
    %131 = vector.extract_strided_slice %47 {offsets = [96, 0], sizes = [32, 128], strides = [1, 1]} : vector<128x128xbf16> to vector<32x128xbf16>
    %cst_47 = arith.constant dense<0.000000e+00> : vector<16x128xf32>
    %132 = tpu.matmul %130, %131, %cst_47 {dimension_numbers = #tpu.dot_dimension_numbers<[1], [0], [0], [1], [0, 0, 1, 1], [], []>} : vector<16x32xbf16>, vector<32x128xbf16>, vector<16x128xf32> -> vector<16x128xf32>
    %133 = arith.addf %112, %132 : vector<16x128xf32>
    %c0_48 = arith.constant 0 : index
    %c0_49 = arith.constant 0 : index
    %c640 = arith.constant 640 : index
    %134 = vector.load %arg7[%c0_48, %c0_49, %c640] : memref<2x1x2176xf32, #tpu.memory_space<vmem>>, vector<1x1x128xf32>
    %135 = vector.shape_cast %134 : vector<1x1x128xf32> to vector<1x128xf32>
    %136 = vector.broadcast %135 : vector<1x128xf32> to vector<16x128xf32>
    %137 = arith.addf %133, %136 : vector<16x128xf32>
    %138 = arith.addf %137, %1 : vector<16x128xf32>
    %c0_50 = arith.constant 0 : index
    %c0_51 = arith.constant 0 : index
    %c768 = arith.constant 768 : index
    %139 = vector.load %arg7[%c0_50, %c0_51, %c768] : memref<2x1x2176xf32, #tpu.memory_space<vmem>>, vector<1x1x128xf32>
    %140 = vector.shape_cast %139 : vector<1x1x128xf32> to vector<1x128xf32>
    %c0_52 = arith.constant 0 : index
    %c0_53 = arith.constant 0 : index
    %c896 = arith.constant 896 : index
    %141 = vector.load %arg7[%c0_52, %c0_53, %c896] : memref<2x1x2176xf32, #tpu.memory_space<vmem>>, vector<1x1x128xf32>
    %142 = vector.shape_cast %141 : vector<1x1x128xf32> to vector<1x128xf32>
    %cst_54 = arith.constant dense<0.000000e+00> : vector<16xf32>
    %143 = vector.multi_reduction <add>, %138, %cst_54 [1] : vector<16x128xf32> to vector<16xf32>
    %144 = vector.shape_cast %143 : vector<16xf32> to vector<16x1xf32>
    %cst_55 = arith.constant 1.280000e+02 : f32
    %145 = vector.broadcast %cst_55 : f32 to vector<16x1xf32>
    %146 = arith.divf %144, %145 : vector<16x1xf32>
    %147 = vector.broadcast %146 : vector<16x1xf32> to vector<16x128xf32>
    %148 = arith.subf %138, %147 : vector<16x128xf32>
    %149 = arith.mulf %148, %148 : vector<16x128xf32>
    %cst_56 = arith.constant dense<0.000000e+00> : vector<16xf32>
    %150 = vector.multi_reduction <add>, %149, %cst_56 [1] : vector<16x128xf32> to vector<16xf32>
    %151 = vector.shape_cast %150 : vector<16xf32> to vector<16x1xf32>
    %cst_57 = arith.constant 1.280000e+02 : f32
    %152 = vector.broadcast %cst_57 : f32 to vector<16x1xf32>
    %153 = arith.divf %151, %152 : vector<16x1xf32>
    %154 = vector.broadcast %146 : vector<16x1xf32> to vector<16x128xf32>
    %155 = arith.subf %138, %154 : vector<16x128xf32>
    %cst_58 = arith.constant 9.99999997E-7 : f32
    %156 = vector.broadcast %cst_58 : f32 to vector<16x1xf32>
    %157 = arith.addf %153, %156 : vector<16x1xf32>
    %158 = math.rsqrt %157 : vector<16x1xf32>
    %159 = vector.broadcast %158 : vector<16x1xf32> to vector<16x128xf32>
    %160 = arith.mulf %155, %159 : vector<16x128xf32>
    %161 = vector.broadcast %140 : vector<1x128xf32> to vector<16x128xf32>
    %162 = arith.mulf %160, %161 : vector<16x128xf32>
    %163 = vector.broadcast %142 : vector<1x128xf32> to vector<16x128xf32>
    %164 = arith.addf %162, %163 : vector<16x128xf32>
    %165 = arith.truncf %164 : vector<16x128xf32> to vector<16x128xbf16>
    %c0_59 = arith.constant 0 : index
    %c0_60 = arith.constant 0 : index
    %c512 = arith.constant 512 : index
    %166 = vector.load %arg5[%c0_59, %c0_60, %c512] : memref<2x128x1280xbf16, #tpu.memory_space<vmem>>, vector<1x128x128xbf16>
    %167 = vector.shape_cast %166 : vector<1x128x128xbf16> to vector<128x128xbf16>
    %cst_61 = arith.constant dense<0.000000e+00> : vector<16x128xf32>
    %168 = tpu.matmul %165, %167, %cst_61 {dimension_numbers = #tpu.dot_dimension_numbers<[1], [0], [0], [1], [0, 0, 1, 1], [], []>} : vector<16x128xbf16>, vector<128x128xbf16>, vector<16x128xf32> -> vector<16x128xf32>
    %c0_62 = arith.constant 0 : index
    %c0_63 = arith.constant 0 : index
    %c1024 = arith.constant 1024 : index
    %169 = vector.load %arg7[%c0_62, %c0_63, %c1024] : memref<2x1x2176xf32, #tpu.memory_space<vmem>>, vector<1x1x128xf32>
    %170 = vector.shape_cast %169 : vector<1x1x128xf32> to vector<1x128xf32>
    %171 = vector.broadcast %170 : vector<1x128xf32> to vector<16x128xf32>
    %172 = arith.addf %168, %171 : vector<16x128xf32>
    %c0_64 = arith.constant 0 : index
    %c0_65 = arith.constant 0 : index
    %c640_66 = arith.constant 640 : index
    %173 = vector.load %arg5[%c0_64, %c0_65, %c640_66] : memref<2x128x1280xbf16, #tpu.memory_space<vmem>>, vector<1x128x256xbf16>
    %174 = vector.shape_cast %173 : vector<1x128x256xbf16> to vector<128x256xbf16>
    %cst_67 = arith.constant dense<0.000000e+00> : vector<16x256xf32>
    %175 = tpu.matmul %4, %174, %cst_67 {dimension_numbers = #tpu.dot_dimension_numbers<[1], [0], [0], [1], [0, 0, 1, 1], [], []>} : vector<16x128xbf16>, vector<128x256xbf16>, vector<16x256xf32> -> vector<16x256xf32>
    %c0_68 = arith.constant 0 : index
    %c0_69 = arith.constant 0 : index
    %c1152 = arith.constant 1152 : index
    %176 = vector.load %arg7[%c0_68, %c0_69, %c1152] : memref<2x1x2176xf32, #tpu.memory_space<vmem>>, vector<1x1x256xf32>
    %177 = vector.shape_cast %176 : vector<1x1x256xf32> to vector<1x256xf32>
    %178 = vector.broadcast %177 : vector<1x256xf32> to vector<16x256xf32>
    %179 = arith.addf %175, %178 : vector<16x256xf32>
    %180 = vector.extract_strided_slice %179 {offsets = [0, 0], sizes = [16, 128], strides = [1, 1]} : vector<16x256xf32> to vector<16x128xf32>
    %181 = vector.extract_strided_slice %179 {offsets = [0, 128], sizes = [16, 128], strides = [1, 1]} : vector<16x256xf32> to vector<16x128xf32>
    %c0_70 = arith.constant 0 : index
    %c0_71 = arith.constant 0 : index
    %c896_72 = arith.constant 896 : index
    %182 = vector.load %arg5[%c0_70, %c0_71, %c896_72] : memref<2x128x1280xbf16, #tpu.memory_space<vmem>>, vector<1x128x128xbf16>
    %183 = vector.shape_cast %182 : vector<1x128x128xbf16> to vector<128x128xbf16>
    %184 = arith.truncf %172 : vector<16x128xf32> to vector<16x128xbf16>
    %185 = arith.truncf %180 : vector<16x128xf32> to vector<16x128xbf16>
    %186 = arith.truncf %181 : vector<16x128xf32> to vector<16x128xbf16>
    %187 = vector.extract_strided_slice %184 {offsets = [0, 0], sizes = [16, 32], strides = [1, 1]} : vector<16x128xbf16> to vector<16x32xbf16>
    %188 = vector.extract_strided_slice %185 {offsets = [0, 0], sizes = [16, 32], strides = [1, 1]} : vector<16x128xbf16> to vector<16x32xbf16>
    %cst_73 = arith.constant dense<0.000000e+00> : vector<16x16xf32>
    %189 = tpu.matmul %187, %188, %cst_73 {dimension_numbers = #tpu.dot_dimension_numbers<[1], [1], [0], [0], [0, 0, 1, 0], [], []>} : vector<16x32xbf16>, vector<16x32xbf16>, vector<16x16xf32> -> vector<16x16xf32>
    %190 = arith.addf %189, %8 : vector<16x16xf32>
    %cst_74 = arith.constant dense<0xFF800000> : vector<16xf32>
    %191 = vector.multi_reduction <maximumf>, %190, %cst_74 [1] : vector<16x16xf32> to vector<16xf32>
    %192 = vector.shape_cast %191 : vector<16xf32> to vector<16x1xf32>
    %193 = vector.broadcast %192 : vector<16x1xf32> to vector<16x16xf32>
    %194 = arith.subf %190, %193 : vector<16x16xf32>
    %195 = math.exp %194 : vector<16x16xf32>
    %cst_75 = arith.constant dense<0.000000e+00> : vector<16xf32>
    %196 = vector.multi_reduction <add>, %195, %cst_75 [1] : vector<16x16xf32> to vector<16xf32>
    %197 = vector.shape_cast %196 : vector<16xf32> to vector<16x1xf32>
    %198 = tpu.reciprocal %197 {approx = true} : vector<16x1xf32> -> vector<16x1xf32>
    %199 = vector.broadcast %198 : vector<16x1xf32> to vector<16x16xf32>
    %200 = arith.mulf %195, %199 : vector<16x16xf32>
    %201 = arith.truncf %200 : vector<16x16xf32> to vector<16x16xbf16>
    %202 = vector.extract_strided_slice %186 {offsets = [0, 0], sizes = [16, 32], strides = [1, 1]} : vector<16x128xbf16> to vector<16x32xbf16>
    %cst_76 = arith.constant dense<0.000000e+00> : vector<16x32xf32>
    %203 = tpu.matmul %201, %202, %cst_76 {dimension_numbers = #tpu.dot_dimension_numbers<[1], [0], [0], [1], [0, 0, 1, 1], [], []>} : vector<16x16xbf16>, vector<16x32xbf16>, vector<16x32xf32> -> vector<16x32xf32>
    %204 = arith.truncf %203 : vector<16x32xf32> to vector<16x32xbf16>
    %205 = vector.extract_strided_slice %183 {offsets = [0, 0], sizes = [32, 128], strides = [1, 1]} : vector<128x128xbf16> to vector<32x128xbf16>
    %cst_77 = arith.constant dense<0.000000e+00> : vector<16x128xf32>
    %206 = tpu.matmul %204, %205, %cst_77 {dimension_numbers = #tpu.dot_dimension_numbers<[1], [0], [0], [1], [0, 0, 1, 1], [], []>} : vector<16x32xbf16>, vector<32x128xbf16>, vector<16x128xf32> -> vector<16x128xf32>
    %207 = vector.extract_strided_slice %184 {offsets = [0, 32], sizes = [16, 32], strides = [1, 1]} : vector<16x128xbf16> to vector<16x32xbf16>
    %208 = vector.extract_strided_slice %185 {offsets = [0, 32], sizes = [16, 32], strides = [1, 1]} : vector<16x128xbf16> to vector<16x32xbf16>
    %cst_78 = arith.constant dense<0.000000e+00> : vector<16x16xf32>
    %209 = tpu.matmul %207, %208, %cst_78 {dimension_numbers = #tpu.dot_dimension_numbers<[1], [1], [0], [0], [0, 0, 1, 0], [], []>} : vector<16x32xbf16>, vector<16x32xbf16>, vector<16x16xf32> -> vector<16x16xf32>
    %210 = arith.addf %209, %8 : vector<16x16xf32>
    %cst_79 = arith.constant dense<0xFF800000> : vector<16xf32>
    %211 = vector.multi_reduction <maximumf>, %210, %cst_79 [1] : vector<16x16xf32> to vector<16xf32>
    %212 = vector.shape_cast %211 : vector<16xf32> to vector<16x1xf32>
    %213 = vector.broadcast %212 : vector<16x1xf32> to vector<16x16xf32>
    %214 = arith.subf %210, %213 : vector<16x16xf32>
    %215 = math.exp %214 : vector<16x16xf32>
    %cst_80 = arith.constant dense<0.000000e+00> : vector<16xf32>
    %216 = vector.multi_reduction <add>, %215, %cst_80 [1] : vector<16x16xf32> to vector<16xf32>
    %217 = vector.shape_cast %216 : vector<16xf32> to vector<16x1xf32>
    %218 = tpu.reciprocal %217 {approx = true} : vector<16x1xf32> -> vector<16x1xf32>
    %219 = vector.broadcast %218 : vector<16x1xf32> to vector<16x16xf32>
    %220 = arith.mulf %215, %219 : vector<16x16xf32>
    %221 = arith.truncf %220 : vector<16x16xf32> to vector<16x16xbf16>
    %222 = vector.extract_strided_slice %186 {offsets = [0, 32], sizes = [16, 32], strides = [1, 1]} : vector<16x128xbf16> to vector<16x32xbf16>
    %cst_81 = arith.constant dense<0.000000e+00> : vector<16x32xf32>
    %223 = tpu.matmul %221, %222, %cst_81 {dimension_numbers = #tpu.dot_dimension_numbers<[1], [0], [0], [1], [0, 0, 1, 1], [], []>} : vector<16x16xbf16>, vector<16x32xbf16>, vector<16x32xf32> -> vector<16x32xf32>
    %224 = arith.truncf %223 : vector<16x32xf32> to vector<16x32xbf16>
    %225 = vector.extract_strided_slice %183 {offsets = [32, 0], sizes = [32, 128], strides = [1, 1]} : vector<128x128xbf16> to vector<32x128xbf16>
    %cst_82 = arith.constant dense<0.000000e+00> : vector<16x128xf32>
    %226 = tpu.matmul %224, %225, %cst_82 {dimension_numbers = #tpu.dot_dimension_numbers<[1], [0], [0], [1], [0, 0, 1, 1], [], []>} : vector<16x32xbf16>, vector<32x128xbf16>, vector<16x128xf32> -> vector<16x128xf32>
    %227 = arith.addf %206, %226 : vector<16x128xf32>
    %228 = vector.extract_strided_slice %184 {offsets = [0, 64], sizes = [16, 32], strides = [1, 1]} : vector<16x128xbf16> to vector<16x32xbf16>
    %229 = vector.extract_strided_slice %185 {offsets = [0, 64], sizes = [16, 32], strides = [1, 1]} : vector<16x128xbf16> to vector<16x32xbf16>
    %cst_83 = arith.constant dense<0.000000e+00> : vector<16x16xf32>
    %230 = tpu.matmul %228, %229, %cst_83 {dimension_numbers = #tpu.dot_dimension_numbers<[1], [1], [0], [0], [0, 0, 1, 0], [], []>} : vector<16x32xbf16>, vector<16x32xbf16>, vector<16x16xf32> -> vector<16x16xf32>
    %231 = arith.addf %230, %8 : vector<16x16xf32>
    %cst_84 = arith.constant dense<0xFF800000> : vector<16xf32>
    %232 = vector.multi_reduction <maximumf>, %231, %cst_84 [1] : vector<16x16xf32> to vector<16xf32>
    %233 = vector.shape_cast %232 : vector<16xf32> to vector<16x1xf32>
    %234 = vector.broadcast %233 : vector<16x1xf32> to vector<16x16xf32>
    %235 = arith.subf %231, %234 : vector<16x16xf32>
    %236 = math.exp %235 : vector<16x16xf32>
    %cst_85 = arith.constant dense<0.000000e+00> : vector<16xf32>
    %237 = vector.multi_reduction <add>, %236, %cst_85 [1] : vector<16x16xf32> to vector<16xf32>
    %238 = vector.shape_cast %237 : vector<16xf32> to vector<16x1xf32>
    %239 = tpu.reciprocal %238 {approx = true} : vector<16x1xf32> -> vector<16x1xf32>
    %240 = vector.broadcast %239 : vector<16x1xf32> to vector<16x16xf32>
    %241 = arith.mulf %236, %240 : vector<16x16xf32>
    %242 = arith.truncf %241 : vector<16x16xf32> to vector<16x16xbf16>
    %243 = vector.extract_strided_slice %186 {offsets = [0, 64], sizes = [16, 32], strides = [1, 1]} : vector<16x128xbf16> to vector<16x32xbf16>
    %cst_86 = arith.constant dense<0.000000e+00> : vector<16x32xf32>
    %244 = tpu.matmul %242, %243, %cst_86 {dimension_numbers = #tpu.dot_dimension_numbers<[1], [0], [0], [1], [0, 0, 1, 1], [], []>} : vector<16x16xbf16>, vector<16x32xbf16>, vector<16x32xf32> -> vector<16x32xf32>
    %245 = arith.truncf %244 : vector<16x32xf32> to vector<16x32xbf16>
    %246 = vector.extract_strided_slice %183 {offsets = [64, 0], sizes = [32, 128], strides = [1, 1]} : vector<128x128xbf16> to vector<32x128xbf16>
    %cst_87 = arith.constant dense<0.000000e+00> : vector<16x128xf32>
    %247 = tpu.matmul %245, %246, %cst_87 {dimension_numbers = #tpu.dot_dimension_numbers<[1], [0], [0], [1], [0, 0, 1, 1], [], []>} : vector<16x32xbf16>, vector<32x128xbf16>, vector<16x128xf32> -> vector<16x128xf32>
    %248 = arith.addf %227, %247 : vector<16x128xf32>
    %249 = vector.extract_strided_slice %184 {offsets = [0, 96], sizes = [16, 32], strides = [1, 1]} : vector<16x128xbf16> to vector<16x32xbf16>
    %250 = vector.extract_strided_slice %185 {offsets = [0, 96], sizes = [16, 32], strides = [1, 1]} : vector<16x128xbf16> to vector<16x32xbf16>
    %cst_88 = arith.constant dense<0.000000e+00> : vector<16x16xf32>
    %251 = tpu.matmul %249, %250, %cst_88 {dimension_numbers = #tpu.dot_dimension_numbers<[1], [1], [0], [0], [0, 0, 1, 0], [], []>} : vector<16x32xbf16>, vector<16x32xbf16>, vector<16x16xf32> -> vector<16x16xf32>
    %252 = arith.addf %251, %8 : vector<16x16xf32>
    %cst_89 = arith.constant dense<0xFF800000> : vector<16xf32>
    %253 = vector.multi_reduction <maximumf>, %252, %cst_89 [1] : vector<16x16xf32> to vector<16xf32>
    %254 = vector.shape_cast %253 : vector<16xf32> to vector<16x1xf32>
    %255 = vector.broadcast %254 : vector<16x1xf32> to vector<16x16xf32>
    %256 = arith.subf %252, %255 : vector<16x16xf32>
    %257 = math.exp %256 : vector<16x16xf32>
    %cst_90 = arith.constant dense<0.000000e+00> : vector<16xf32>
    %258 = vector.multi_reduction <add>, %257, %cst_90 [1] : vector<16x16xf32> to vector<16xf32>
    %259 = vector.shape_cast %258 : vector<16xf32> to vector<16x1xf32>
    %260 = tpu.reciprocal %259 {approx = true} : vector<16x1xf32> -> vector<16x1xf32>
    %261 = vector.broadcast %260 : vector<16x1xf32> to vector<16x16xf32>
    %262 = arith.mulf %257, %261 : vector<16x16xf32>
    %263 = arith.truncf %262 : vector<16x16xf32> to vector<16x16xbf16>
    %264 = vector.extract_strided_slice %186 {offsets = [0, 96], sizes = [16, 32], strides = [1, 1]} : vector<16x128xbf16> to vector<16x32xbf16>
    %cst_91 = arith.constant dense<0.000000e+00> : vector<16x32xf32>
    %265 = tpu.matmul %263, %264, %cst_91 {dimension_numbers = #tpu.dot_dimension_numbers<[1], [0], [0], [1], [0, 0, 1, 1], [], []>} : vector<16x16xbf16>, vector<16x32xbf16>, vector<16x32xf32> -> vector<16x32xf32>
    %266 = arith.truncf %265 : vector<16x32xf32> to vector<16x32xbf16>
    %267 = vector.extract_strided_slice %183 {offsets = [96, 0], sizes = [32, 128], strides = [1, 1]} : vector<128x128xbf16> to vector<32x128xbf16>
    %cst_92 = arith.constant dense<0.000000e+00> : vector<16x128xf32>
    %268 = tpu.matmul %266, %267, %cst_92 {dimension_numbers = #tpu.dot_dimension_numbers<[1], [0], [0], [1], [0, 0, 1, 1], [], []>} : vector<16x32xbf16>, vector<32x128xbf16>, vector<16x128xf32> -> vector<16x128xf32>
    %269 = arith.addf %248, %268 : vector<16x128xf32>
    %c0_93 = arith.constant 0 : index
    %c0_94 = arith.constant 0 : index
    %c1408 = arith.constant 1408 : index
    %270 = vector.load %arg7[%c0_93, %c0_94, %c1408] : memref<2x1x2176xf32, #tpu.memory_space<vmem>>, vector<1x1x128xf32>
    %271 = vector.shape_cast %270 : vector<1x1x128xf32> to vector<1x128xf32>
    %272 = vector.broadcast %271 : vector<1x128xf32> to vector<16x128xf32>
    %273 = arith.addf %269, %272 : vector<16x128xf32>
    %274 = arith.addf %273, %138 : vector<16x128xf32>
    %c0_95 = arith.constant 0 : index
    %c0_96 = arith.constant 0 : index
    %c1536 = arith.constant 1536 : index
    %275 = vector.load %arg7[%c0_95, %c0_96, %c1536] : memref<2x1x2176xf32, #tpu.memory_space<vmem>>, vector<1x1x128xf32>
    %276 = vector.shape_cast %275 : vector<1x1x128xf32> to vector<1x128xf32>
    %c0_97 = arith.constant 0 : index
    %c0_98 = arith.constant 0 : index
    %c1664 = arith.constant 1664 : index
    %277 = vector.load %arg7[%c0_97, %c0_98, %c1664] : memref<2x1x2176xf32, #tpu.memory_space<vmem>>, vector<1x1x128xf32>
    %278 = vector.shape_cast %277 : vector<1x1x128xf32> to vector<1x128xf32>
    %cst_99 = arith.constant dense<0.000000e+00> : vector<16xf32>
    %279 = vector.multi_reduction <add>, %274, %cst_99 [1] : vector<16x128xf32> to vector<16xf32>
    %280 = vector.shape_cast %279 : vector<16xf32> to vector<16x1xf32>
    %cst_100 = arith.constant 1.280000e+02 : f32
    %281 = vector.broadcast %cst_100 : f32 to vector<16x1xf32>
    %282 = arith.divf %280, %281 : vector<16x1xf32>
    %283 = vector.broadcast %282 : vector<16x1xf32> to vector<16x128xf32>
    %284 = arith.subf %274, %283 : vector<16x128xf32>
    %285 = arith.mulf %284, %284 : vector<16x128xf32>
    %cst_101 = arith.constant dense<0.000000e+00> : vector<16xf32>
    %286 = vector.multi_reduction <add>, %285, %cst_101 [1] : vector<16x128xf32> to vector<16xf32>
    %287 = vector.shape_cast %286 : vector<16xf32> to vector<16x1xf32>
    %cst_102 = arith.constant 1.280000e+02 : f32
    %288 = vector.broadcast %cst_102 : f32 to vector<16x1xf32>
    %289 = arith.divf %287, %288 : vector<16x1xf32>
    %290 = vector.broadcast %282 : vector<16x1xf32> to vector<16x128xf32>
    %291 = arith.subf %274, %290 : vector<16x128xf32>
    %cst_103 = arith.constant 9.99999997E-7 : f32
    %292 = vector.broadcast %cst_103 : f32 to vector<16x1xf32>
    %293 = arith.addf %289, %292 : vector<16x1xf32>
    %294 = math.rsqrt %293 : vector<16x1xf32>
    %295 = vector.broadcast %294 : vector<16x1xf32> to vector<16x128xf32>
    %296 = arith.mulf %291, %295 : vector<16x128xf32>
    %297 = vector.broadcast %276 : vector<1x128xf32> to vector<16x128xf32>
    %298 = arith.mulf %296, %297 : vector<16x128xf32>
    %299 = vector.broadcast %278 : vector<1x128xf32> to vector<16x128xf32>
    %300 = arith.addf %298, %299 : vector<16x128xf32>
    %301 = arith.truncf %300 : vector<16x128xf32> to vector<16x128xbf16>
    %c0_104 = arith.constant 0 : index
    %c0_105 = arith.constant 0 : index
    %c1024_106 = arith.constant 1024 : index
    %302 = vector.load %arg5[%c0_104, %c0_105, %c1024_106] : memref<2x128x1280xbf16, #tpu.memory_space<vmem>>, vector<1x128x256xbf16>
    %303 = vector.shape_cast %302 : vector<1x128x256xbf16> to vector<128x256xbf16>
    %cst_107 = arith.constant dense<0.000000e+00> : vector<16x256xf32>
    %304 = tpu.matmul %301, %303, %cst_107 {dimension_numbers = #tpu.dot_dimension_numbers<[1], [0], [0], [1], [0, 0, 1, 1], [], []>} : vector<16x128xbf16>, vector<128x256xbf16>, vector<16x256xf32> -> vector<16x256xf32>
    %c0_108 = arith.constant 0 : index
    %c0_109 = arith.constant 0 : index
    %c1792 = arith.constant 1792 : index
    %305 = vector.load %arg7[%c0_108, %c0_109, %c1792] : memref<2x1x2176xf32, #tpu.memory_space<vmem>>, vector<1x1x256xf32>
    %306 = vector.shape_cast %305 : vector<1x1x256xf32> to vector<1x256xf32>
    %307 = vector.broadcast %306 : vector<1x256xf32> to vector<16x256xf32>
    %308 = arith.addf %304, %307 : vector<16x256xf32>
    %cst_110 = arith.constant 0.000000e+00 : f32
    %309 = vector.broadcast %cst_110 : f32 to vector<16x256xf32>
    %310 = arith.maximumf %308, %309 : vector<16x256xf32>
    %311 = arith.truncf %310 : vector<16x256xf32> to vector<16x256xbf16>
    %c0_111 = arith.constant 0 : index
    %c0_112 = arith.constant 0 : index
    %c0_113 = arith.constant 0 : index
    %312 = vector.load %arg6[%c0_111, %c0_112, %c0_113] : memref<2x256x128xbf16, #tpu.memory_space<vmem>>, vector<1x256x128xbf16>
    %313 = vector.shape_cast %312 : vector<1x256x128xbf16> to vector<256x128xbf16>
    %cst_114 = arith.constant dense<0.000000e+00> : vector<16x128xf32>
    %314 = tpu.matmul %311, %313, %cst_114 {dimension_numbers = #tpu.dot_dimension_numbers<[1], [0], [0], [1], [0, 0, 1, 1], [], []>} : vector<16x256xbf16>, vector<256x128xbf16>, vector<16x128xf32> -> vector<16x128xf32>
    %c0_115 = arith.constant 0 : index
    %c0_116 = arith.constant 0 : index
    %c2048 = arith.constant 2048 : index
    %315 = vector.load %arg7[%c0_115, %c0_116, %c2048] : memref<2x1x2176xf32, #tpu.memory_space<vmem>>, vector<1x1x128xf32>
    %316 = vector.shape_cast %315 : vector<1x1x128xf32> to vector<1x128xf32>
    %317 = vector.broadcast %316 : vector<1x128xf32> to vector<16x128xf32>
    %318 = arith.addf %314, %317 : vector<16x128xf32>
    %319 = arith.addf %318, %274 : vector<16x128xf32>
    %c1 = arith.constant 1 : index
    %c0_117 = arith.constant 0 : index
    %c0_118 = arith.constant 0 : index
    %320 = vector.load %arg7[%c1, %c0_117, %c0_118] : memref<2x1x2176xf32, #tpu.memory_space<vmem>>, vector<1x1x128xf32>
    %321 = vector.shape_cast %320 : vector<1x1x128xf32> to vector<1x128xf32>
    %c1_119 = arith.constant 1 : index
    %c0_120 = arith.constant 0 : index
    %c128_121 = arith.constant 128 : index
    %322 = vector.load %arg7[%c1_119, %c0_120, %c128_121] : memref<2x1x2176xf32, #tpu.memory_space<vmem>>, vector<1x1x128xf32>
    %323 = vector.shape_cast %322 : vector<1x1x128xf32> to vector<1x128xf32>
    %cst_122 = arith.constant dense<0.000000e+00> : vector<16xf32>
    %324 = vector.multi_reduction <add>, %319, %cst_122 [1] : vector<16x128xf32> to vector<16xf32>
    %325 = vector.shape_cast %324 : vector<16xf32> to vector<16x1xf32>
    %cst_123 = arith.constant 1.280000e+02 : f32
    %326 = vector.broadcast %cst_123 : f32 to vector<16x1xf32>
    %327 = arith.divf %325, %326 : vector<16x1xf32>
    %328 = vector.broadcast %327 : vector<16x1xf32> to vector<16x128xf32>
    %329 = arith.subf %319, %328 : vector<16x128xf32>
    %330 = arith.mulf %329, %329 : vector<16x128xf32>
    %cst_124 = arith.constant dense<0.000000e+00> : vector<16xf32>
    %331 = vector.multi_reduction <add>, %330, %cst_124 [1] : vector<16x128xf32> to vector<16xf32>
    %332 = vector.shape_cast %331 : vector<16xf32> to vector<16x1xf32>
    %cst_125 = arith.constant 1.280000e+02 : f32
    %333 = vector.broadcast %cst_125 : f32 to vector<16x1xf32>
    %334 = arith.divf %332, %333 : vector<16x1xf32>
    %335 = vector.broadcast %327 : vector<16x1xf32> to vector<16x128xf32>
    %336 = arith.subf %319, %335 : vector<16x128xf32>
    %cst_126 = arith.constant 9.99999997E-7 : f32
    %337 = vector.broadcast %cst_126 : f32 to vector<16x1xf32>
    %338 = arith.addf %334, %337 : vector<16x1xf32>
    %339 = math.rsqrt %338 : vector<16x1xf32>
    %340 = vector.broadcast %339 : vector<16x1xf32> to vector<16x128xf32>
    %341 = arith.mulf %336, %340 : vector<16x128xf32>
    %342 = vector.broadcast %321 : vector<1x128xf32> to vector<16x128xf32>
    %343 = arith.mulf %341, %342 : vector<16x128xf32>
    %344 = vector.broadcast %323 : vector<1x128xf32> to vector<16x128xf32>
    %345 = arith.addf %343, %344 : vector<16x128xf32>
    %346 = arith.truncf %345 : vector<16x128xf32> to vector<16x128xbf16>
    %c1_127 = arith.constant 1 : index
    %c0_128 = arith.constant 0 : index
    %c0_129 = arith.constant 0 : index
    %347 = vector.load %arg5[%c1_127, %c0_128, %c0_129] : memref<2x128x1280xbf16, #tpu.memory_space<vmem>>, vector<1x128x384xbf16>
    %348 = vector.shape_cast %347 : vector<1x128x384xbf16> to vector<128x384xbf16>
    %cst_130 = arith.constant dense<0.000000e+00> : vector<16x384xf32>
    %349 = tpu.matmul %346, %348, %cst_130 {dimension_numbers = #tpu.dot_dimension_numbers<[1], [0], [0], [1], [0, 0, 1, 1], [], []>} : vector<16x128xbf16>, vector<128x384xbf16>, vector<16x384xf32> -> vector<16x384xf32>
    %c1_131 = arith.constant 1 : index
    %c0_132 = arith.constant 0 : index
    %c256_133 = arith.constant 256 : index
    %350 = vector.load %arg7[%c1_131, %c0_132, %c256_133] : memref<2x1x2176xf32, #tpu.memory_space<vmem>>, vector<1x1x384xf32>
    %351 = vector.shape_cast %350 : vector<1x1x384xf32> to vector<1x384xf32>
    %352 = vector.broadcast %351 : vector<1x384xf32> to vector<16x384xf32>
    %353 = arith.addf %349, %352 : vector<16x384xf32>
    %354 = vector.extract_strided_slice %353 {offsets = [0, 0], sizes = [16, 128], strides = [1, 1]} : vector<16x384xf32> to vector<16x128xf32>
    %355 = vector.extract_strided_slice %353 {offsets = [0, 128], sizes = [16, 128], strides = [1, 1]} : vector<16x384xf32> to vector<16x128xf32>
    %356 = vector.extract_strided_slice %353 {offsets = [0, 256], sizes = [16, 128], strides = [1, 1]} : vector<16x384xf32> to vector<16x128xf32>
    %c1_134 = arith.constant 1 : index
    %c0_135 = arith.constant 0 : index
    %c384_136 = arith.constant 384 : index
    %357 = vector.load %arg5[%c1_134, %c0_135, %c384_136] : memref<2x128x1280xbf16, #tpu.memory_space<vmem>>, vector<1x128x128xbf16>
    %358 = vector.shape_cast %357 : vector<1x128x128xbf16> to vector<128x128xbf16>
    %359 = arith.truncf %354 : vector<16x128xf32> to vector<16x128xbf16>
    %360 = arith.truncf %355 : vector<16x128xf32> to vector<16x128xbf16>
    %361 = arith.truncf %356 : vector<16x128xf32> to vector<16x128xbf16>
    %362 = vector.extract_strided_slice %359 {offsets = [0, 0], sizes = [16, 32], strides = [1, 1]} : vector<16x128xbf16> to vector<16x32xbf16>
    %363 = vector.extract_strided_slice %360 {offsets = [0, 0], sizes = [16, 32], strides = [1, 1]} : vector<16x128xbf16> to vector<16x32xbf16>
    %cst_137 = arith.constant dense<0.000000e+00> : vector<16x16xf32>
    %364 = tpu.matmul %362, %363, %cst_137 {dimension_numbers = #tpu.dot_dimension_numbers<[1], [1], [0], [0], [0, 0, 1, 0], [], []>} : vector<16x32xbf16>, vector<16x32xbf16>, vector<16x16xf32> -> vector<16x16xf32>
    %365 = arith.addf %364, %6 : vector<16x16xf32>
    %cst_138 = arith.constant dense<0xFF800000> : vector<16xf32>
    %366 = vector.multi_reduction <maximumf>, %365, %cst_138 [1] : vector<16x16xf32> to vector<16xf32>
    %367 = vector.shape_cast %366 : vector<16xf32> to vector<16x1xf32>
    %368 = vector.broadcast %367 : vector<16x1xf32> to vector<16x16xf32>
    %369 = arith.subf %365, %368 : vector<16x16xf32>
    %370 = math.exp %369 : vector<16x16xf32>
    %cst_139 = arith.constant dense<0.000000e+00> : vector<16xf32>
    %371 = vector.multi_reduction <add>, %370, %cst_139 [1] : vector<16x16xf32> to vector<16xf32>
    %372 = vector.shape_cast %371 : vector<16xf32> to vector<16x1xf32>
    %373 = tpu.reciprocal %372 {approx = true} : vector<16x1xf32> -> vector<16x1xf32>
    %374 = vector.broadcast %373 : vector<16x1xf32> to vector<16x16xf32>
    %375 = arith.mulf %370, %374 : vector<16x16xf32>
    %376 = arith.truncf %375 : vector<16x16xf32> to vector<16x16xbf16>
    %377 = vector.extract_strided_slice %361 {offsets = [0, 0], sizes = [16, 32], strides = [1, 1]} : vector<16x128xbf16> to vector<16x32xbf16>
    %cst_140 = arith.constant dense<0.000000e+00> : vector<16x32xf32>
    %378 = tpu.matmul %376, %377, %cst_140 {dimension_numbers = #tpu.dot_dimension_numbers<[1], [0], [0], [1], [0, 0, 1, 1], [], []>} : vector<16x16xbf16>, vector<16x32xbf16>, vector<16x32xf32> -> vector<16x32xf32>
    %379 = arith.truncf %378 : vector<16x32xf32> to vector<16x32xbf16>
    %380 = vector.extract_strided_slice %358 {offsets = [0, 0], sizes = [32, 128], strides = [1, 1]} : vector<128x128xbf16> to vector<32x128xbf16>
    %cst_141 = arith.constant dense<0.000000e+00> : vector<16x128xf32>
    %381 = tpu.matmul %379, %380, %cst_141 {dimension_numbers = #tpu.dot_dimension_numbers<[1], [0], [0], [1], [0, 0, 1, 1], [], []>} : vector<16x32xbf16>, vector<32x128xbf16>, vector<16x128xf32> -> vector<16x128xf32>
    %382 = vector.extract_strided_slice %359 {offsets = [0, 32], sizes = [16, 32], strides = [1, 1]} : vector<16x128xbf16> to vector<16x32xbf16>
    %383 = vector.extract_strided_slice %360 {offsets = [0, 32], sizes = [16, 32], strides = [1, 1]} : vector<16x128xbf16> to vector<16x32xbf16>
    %cst_142 = arith.constant dense<0.000000e+00> : vector<16x16xf32>
    %384 = tpu.matmul %382, %383, %cst_142 {dimension_numbers = #tpu.dot_dimension_numbers<[1], [1], [0], [0], [0, 0, 1, 0], [], []>} : vector<16x32xbf16>, vector<16x32xbf16>, vector<16x16xf32> -> vector<16x16xf32>
    %385 = arith.addf %384, %6 : vector<16x16xf32>
    %cst_143 = arith.constant dense<0xFF800000> : vector<16xf32>
    %386 = vector.multi_reduction <maximumf>, %385, %cst_143 [1] : vector<16x16xf32> to vector<16xf32>
    %387 = vector.shape_cast %386 : vector<16xf32> to vector<16x1xf32>
    %388 = vector.broadcast %387 : vector<16x1xf32> to vector<16x16xf32>
    %389 = arith.subf %385, %388 : vector<16x16xf32>
    %390 = math.exp %389 : vector<16x16xf32>
    %cst_144 = arith.constant dense<0.000000e+00> : vector<16xf32>
    %391 = vector.multi_reduction <add>, %390, %cst_144 [1] : vector<16x16xf32> to vector<16xf32>
    %392 = vector.shape_cast %391 : vector<16xf32> to vector<16x1xf32>
    %393 = tpu.reciprocal %392 {approx = true} : vector<16x1xf32> -> vector<16x1xf32>
    %394 = vector.broadcast %393 : vector<16x1xf32> to vector<16x16xf32>
    %395 = arith.mulf %390, %394 : vector<16x16xf32>
    %396 = arith.truncf %395 : vector<16x16xf32> to vector<16x16xbf16>
    %397 = vector.extract_strided_slice %361 {offsets = [0, 32], sizes = [16, 32], strides = [1, 1]} : vector<16x128xbf16> to vector<16x32xbf16>
    %cst_145 = arith.constant dense<0.000000e+00> : vector<16x32xf32>
    %398 = tpu.matmul %396, %397, %cst_145 {dimension_numbers = #tpu.dot_dimension_numbers<[1], [0], [0], [1], [0, 0, 1, 1], [], []>} : vector<16x16xbf16>, vector<16x32xbf16>, vector<16x32xf32> -> vector<16x32xf32>
    %399 = arith.truncf %398 : vector<16x32xf32> to vector<16x32xbf16>
    %400 = vector.extract_strided_slice %358 {offsets = [32, 0], sizes = [32, 128], strides = [1, 1]} : vector<128x128xbf16> to vector<32x128xbf16>
    %cst_146 = arith.constant dense<0.000000e+00> : vector<16x128xf32>
    %401 = tpu.matmul %399, %400, %cst_146 {dimension_numbers = #tpu.dot_dimension_numbers<[1], [0], [0], [1], [0, 0, 1, 1], [], []>} : vector<16x32xbf16>, vector<32x128xbf16>, vector<16x128xf32> -> vector<16x128xf32>
    %402 = arith.addf %381, %401 : vector<16x128xf32>
    %403 = vector.extract_strided_slice %359 {offsets = [0, 64], sizes = [16, 32], strides = [1, 1]} : vector<16x128xbf16> to vector<16x32xbf16>
    %404 = vector.extract_strided_slice %360 {offsets = [0, 64], sizes = [16, 32], strides = [1, 1]} : vector<16x128xbf16> to vector<16x32xbf16>
    %cst_147 = arith.constant dense<0.000000e+00> : vector<16x16xf32>
    %405 = tpu.matmul %403, %404, %cst_147 {dimension_numbers = #tpu.dot_dimension_numbers<[1], [1], [0], [0], [0, 0, 1, 0], [], []>} : vector<16x32xbf16>, vector<16x32xbf16>, vector<16x16xf32> -> vector<16x16xf32>
    %406 = arith.addf %405, %6 : vector<16x16xf32>
    %cst_148 = arith.constant dense<0xFF800000> : vector<16xf32>
    %407 = vector.multi_reduction <maximumf>, %406, %cst_148 [1] : vector<16x16xf32> to vector<16xf32>
    %408 = vector.shape_cast %407 : vector<16xf32> to vector<16x1xf32>
    %409 = vector.broadcast %408 : vector<16x1xf32> to vector<16x16xf32>
    %410 = arith.subf %406, %409 : vector<16x16xf32>
    %411 = math.exp %410 : vector<16x16xf32>
    %cst_149 = arith.constant dense<0.000000e+00> : vector<16xf32>
    %412 = vector.multi_reduction <add>, %411, %cst_149 [1] : vector<16x16xf32> to vector<16xf32>
    %413 = vector.shape_cast %412 : vector<16xf32> to vector<16x1xf32>
    %414 = tpu.reciprocal %413 {approx = true} : vector<16x1xf32> -> vector<16x1xf32>
    %415 = vector.broadcast %414 : vector<16x1xf32> to vector<16x16xf32>
    %416 = arith.mulf %411, %415 : vector<16x16xf32>
    %417 = arith.truncf %416 : vector<16x16xf32> to vector<16x16xbf16>
    %418 = vector.extract_strided_slice %361 {offsets = [0, 64], sizes = [16, 32], strides = [1, 1]} : vector<16x128xbf16> to vector<16x32xbf16>
    %cst_150 = arith.constant dense<0.000000e+00> : vector<16x32xf32>
    %419 = tpu.matmul %417, %418, %cst_150 {dimension_numbers = #tpu.dot_dimension_numbers<[1], [0], [0], [1], [0, 0, 1, 1], [], []>} : vector<16x16xbf16>, vector<16x32xbf16>, vector<16x32xf32> -> vector<16x32xf32>
    %420 = arith.truncf %419 : vector<16x32xf32> to vector<16x32xbf16>
    %421 = vector.extract_strided_slice %358 {offsets = [64, 0], sizes = [32, 128], strides = [1, 1]} : vector<128x128xbf16> to vector<32x128xbf16>
    %cst_151 = arith.constant dense<0.000000e+00> : vector<16x128xf32>
    %422 = tpu.matmul %420, %421, %cst_151 {dimension_numbers = #tpu.dot_dimension_numbers<[1], [0], [0], [1], [0, 0, 1, 1], [], []>} : vector<16x32xbf16>, vector<32x128xbf16>, vector<16x128xf32> -> vector<16x128xf32>
    %423 = arith.addf %402, %422 : vector<16x128xf32>
    %424 = vector.extract_strided_slice %359 {offsets = [0, 96], sizes = [16, 32], strides = [1, 1]} : vector<16x128xbf16> to vector<16x32xbf16>
    %425 = vector.extract_strided_slice %360 {offsets = [0, 96], sizes = [16, 32], strides = [1, 1]} : vector<16x128xbf16> to vector<16x32xbf16>
    %cst_152 = arith.constant dense<0.000000e+00> : vector<16x16xf32>
    %426 = tpu.matmul %424, %425, %cst_152 {dimension_numbers = #tpu.dot_dimension_numbers<[1], [1], [0], [0], [0, 0, 1, 0], [], []>} : vector<16x32xbf16>, vector<16x32xbf16>, vector<16x16xf32> -> vector<16x16xf32>
    %427 = arith.addf %426, %6 : vector<16x16xf32>
    %cst_153 = arith.constant dense<0xFF800000> : vector<16xf32>
    %428 = vector.multi_reduction <maximumf>, %427, %cst_153 [1] : vector<16x16xf32> to vector<16xf32>
    %429 = vector.shape_cast %428 : vector<16xf32> to vector<16x1xf32>
    %430 = vector.broadcast %429 : vector<16x1xf32> to vector<16x16xf32>
    %431 = arith.subf %427, %430 : vector<16x16xf32>
    %432 = math.exp %431 : vector<16x16xf32>
    %cst_154 = arith.constant dense<0.000000e+00> : vector<16xf32>
    %433 = vector.multi_reduction <add>, %432, %cst_154 [1] : vector<16x16xf32> to vector<16xf32>
    %434 = vector.shape_cast %433 : vector<16xf32> to vector<16x1xf32>
    %435 = tpu.reciprocal %434 {approx = true} : vector<16x1xf32> -> vector<16x1xf32>
    %436 = vector.broadcast %435 : vector<16x1xf32> to vector<16x16xf32>
    %437 = arith.mulf %432, %436 : vector<16x16xf32>
    %438 = arith.truncf %437 : vector<16x16xf32> to vector<16x16xbf16>
    %439 = vector.extract_strided_slice %361 {offsets = [0, 96], sizes = [16, 32], strides = [1, 1]} : vector<16x128xbf16> to vector<16x32xbf16>
    %cst_155 = arith.constant dense<0.000000e+00> : vector<16x32xf32>
    %440 = tpu.matmul %438, %439, %cst_155 {dimension_numbers = #tpu.dot_dimension_numbers<[1], [0], [0], [1], [0, 0, 1, 1], [], []>} : vector<16x16xbf16>, vector<16x32xbf16>, vector<16x32xf32> -> vector<16x32xf32>
    %441 = arith.truncf %440 : vector<16x32xf32> to vector<16x32xbf16>
    %442 = vector.extract_strided_slice %358 {offsets = [96, 0], sizes = [32, 128], strides = [1, 1]} : vector<128x128xbf16> to vector<32x128xbf16>
    %cst_156 = arith.constant dense<0.000000e+00> : vector<16x128xf32>
    %443 = tpu.matmul %441, %442, %cst_156 {dimension_numbers = #tpu.dot_dimension_numbers<[1], [0], [0], [1], [0, 0, 1, 1], [], []>} : vector<16x32xbf16>, vector<32x128xbf16>, vector<16x128xf32> -> vector<16x128xf32>
    %444 = arith.addf %423, %443 : vector<16x128xf32>
    %c1_157 = arith.constant 1 : index
    %c0_158 = arith.constant 0 : index
    %c640_159 = arith.constant 640 : index
    %445 = vector.load %arg7[%c1_157, %c0_158, %c640_159] : memref<2x1x2176xf32, #tpu.memory_space<vmem>>, vector<1x1x128xf32>
    %446 = vector.shape_cast %445 : vector<1x1x128xf32> to vector<1x128xf32>
    %447 = vector.broadcast %446 : vector<1x128xf32> to vector<16x128xf32>
    %448 = arith.addf %444, %447 : vector<16x128xf32>
    %449 = arith.addf %448, %319 : vector<16x128xf32>
    %c1_160 = arith.constant 1 : index
    %c0_161 = arith.constant 0 : index
    %c768_162 = arith.constant 768 : index
    %450 = vector.load %arg7[%c1_160, %c0_161, %c768_162] : memref<2x1x2176xf32, #tpu.memory_space<vmem>>, vector<1x1x128xf32>
    %451 = vector.shape_cast %450 : vector<1x1x128xf32> to vector<1x128xf32>
    %c1_163 = arith.constant 1 : index
    %c0_164 = arith.constant 0 : index
    %c896_165 = arith.constant 896 : index
    %452 = vector.load %arg7[%c1_163, %c0_164, %c896_165] : memref<2x1x2176xf32, #tpu.memory_space<vmem>>, vector<1x1x128xf32>
    %453 = vector.shape_cast %452 : vector<1x1x128xf32> to vector<1x128xf32>
    %cst_166 = arith.constant dense<0.000000e+00> : vector<16xf32>
    %454 = vector.multi_reduction <add>, %449, %cst_166 [1] : vector<16x128xf32> to vector<16xf32>
    %455 = vector.shape_cast %454 : vector<16xf32> to vector<16x1xf32>
    %cst_167 = arith.constant 1.280000e+02 : f32
    %456 = vector.broadcast %cst_167 : f32 to vector<16x1xf32>
    %457 = arith.divf %455, %456 : vector<16x1xf32>
    %458 = vector.broadcast %457 : vector<16x1xf32> to vector<16x128xf32>
    %459 = arith.subf %449, %458 : vector<16x128xf32>
    %460 = arith.mulf %459, %459 : vector<16x128xf32>
    %cst_168 = arith.constant dense<0.000000e+00> : vector<16xf32>
    %461 = vector.multi_reduction <add>, %460, %cst_168 [1] : vector<16x128xf32> to vector<16xf32>
    %462 = vector.shape_cast %461 : vector<16xf32> to vector<16x1xf32>
    %cst_169 = arith.constant 1.280000e+02 : f32
    %463 = vector.broadcast %cst_169 : f32 to vector<16x1xf32>
    %464 = arith.divf %462, %463 : vector<16x1xf32>
    %465 = vector.broadcast %457 : vector<16x1xf32> to vector<16x128xf32>
    %466 = arith.subf %449, %465 : vector<16x128xf32>
    %cst_170 = arith.constant 9.99999997E-7 : f32
    %467 = vector.broadcast %cst_170 : f32 to vector<16x1xf32>
    %468 = arith.addf %464, %467 : vector<16x1xf32>
    %469 = math.rsqrt %468 : vector<16x1xf32>
    %470 = vector.broadcast %469 : vector<16x1xf32> to vector<16x128xf32>
    %471 = arith.mulf %466, %470 : vector<16x128xf32>
    %472 = vector.broadcast %451 : vector<1x128xf32> to vector<16x128xf32>
    %473 = arith.mulf %471, %472 : vector<16x128xf32>
    %474 = vector.broadcast %453 : vector<1x128xf32> to vector<16x128xf32>
    %475 = arith.addf %473, %474 : vector<16x128xf32>
    %476 = arith.truncf %475 : vector<16x128xf32> to vector<16x128xbf16>
    %c1_171 = arith.constant 1 : index
    %c0_172 = arith.constant 0 : index
    %c512_173 = arith.constant 512 : index
    %477 = vector.load %arg5[%c1_171, %c0_172, %c512_173] : memref<2x128x1280xbf16, #tpu.memory_space<vmem>>, vector<1x128x128xbf16>
    %478 = vector.shape_cast %477 : vector<1x128x128xbf16> to vector<128x128xbf16>
    %cst_174 = arith.constant dense<0.000000e+00> : vector<16x128xf32>
    %479 = tpu.matmul %476, %478, %cst_174 {dimension_numbers = #tpu.dot_dimension_numbers<[1], [0], [0], [1], [0, 0, 1, 1], [], []>} : vector<16x128xbf16>, vector<128x128xbf16>, vector<16x128xf32> -> vector<16x128xf32>
    %c1_175 = arith.constant 1 : index
    %c0_176 = arith.constant 0 : index
    %c1024_177 = arith.constant 1024 : index
    %480 = vector.load %arg7[%c1_175, %c0_176, %c1024_177] : memref<2x1x2176xf32, #tpu.memory_space<vmem>>, vector<1x1x128xf32>
    %481 = vector.shape_cast %480 : vector<1x1x128xf32> to vector<1x128xf32>
    %482 = vector.broadcast %481 : vector<1x128xf32> to vector<16x128xf32>
    %483 = arith.addf %479, %482 : vector<16x128xf32>
    %c1_178 = arith.constant 1 : index
    %c0_179 = arith.constant 0 : index
    %c640_180 = arith.constant 640 : index
    %484 = vector.load %arg5[%c1_178, %c0_179, %c640_180] : memref<2x128x1280xbf16, #tpu.memory_space<vmem>>, vector<1x128x256xbf16>
    %485 = vector.shape_cast %484 : vector<1x128x256xbf16> to vector<128x256xbf16>
    %cst_181 = arith.constant dense<0.000000e+00> : vector<16x256xf32>
    %486 = tpu.matmul %4, %485, %cst_181 {dimension_numbers = #tpu.dot_dimension_numbers<[1], [0], [0], [1], [0, 0, 1, 1], [], []>} : vector<16x128xbf16>, vector<128x256xbf16>, vector<16x256xf32> -> vector<16x256xf32>
    %c1_182 = arith.constant 1 : index
    %c0_183 = arith.constant 0 : index
    %c1152_184 = arith.constant 1152 : index
    %487 = vector.load %arg7[%c1_182, %c0_183, %c1152_184] : memref<2x1x2176xf32, #tpu.memory_space<vmem>>, vector<1x1x256xf32>
    %488 = vector.shape_cast %487 : vector<1x1x256xf32> to vector<1x256xf32>
    %489 = vector.broadcast %488 : vector<1x256xf32> to vector<16x256xf32>
    %490 = arith.addf %486, %489 : vector<16x256xf32>
    %491 = vector.extract_strided_slice %490 {offsets = [0, 0], sizes = [16, 128], strides = [1, 1]} : vector<16x256xf32> to vector<16x128xf32>
    %492 = vector.extract_strided_slice %490 {offsets = [0, 128], sizes = [16, 128], strides = [1, 1]} : vector<16x256xf32> to vector<16x128xf32>
    %c1_185 = arith.constant 1 : index
    %c0_186 = arith.constant 0 : index
    %c896_187 = arith.constant 896 : index
    %493 = vector.load %arg5[%c1_185, %c0_186, %c896_187] : memref<2x128x1280xbf16, #tpu.memory_space<vmem>>, vector<1x128x128xbf16>
    %494 = vector.shape_cast %493 : vector<1x128x128xbf16> to vector<128x128xbf16>
    %495 = arith.truncf %483 : vector<16x128xf32> to vector<16x128xbf16>
    %496 = arith.truncf %491 : vector<16x128xf32> to vector<16x128xbf16>
    %497 = arith.truncf %492 : vector<16x128xf32> to vector<16x128xbf16>
    %498 = vector.extract_strided_slice %495 {offsets = [0, 0], sizes = [16, 32], strides = [1, 1]} : vector<16x128xbf16> to vector<16x32xbf16>
    %499 = vector.extract_strided_slice %496 {offsets = [0, 0], sizes = [16, 32], strides = [1, 1]} : vector<16x128xbf16> to vector<16x32xbf16>
    %cst_188 = arith.constant dense<0.000000e+00> : vector<16x16xf32>
    %500 = tpu.matmul %498, %499, %cst_188 {dimension_numbers = #tpu.dot_dimension_numbers<[1], [1], [0], [0], [0, 0, 1, 0], [], []>} : vector<16x32xbf16>, vector<16x32xbf16>, vector<16x16xf32> -> vector<16x16xf32>
    %501 = arith.addf %500, %8 : vector<16x16xf32>
    %cst_189 = arith.constant dense<0xFF800000> : vector<16xf32>
    %502 = vector.multi_reduction <maximumf>, %501, %cst_189 [1] : vector<16x16xf32> to vector<16xf32>
    %503 = vector.shape_cast %502 : vector<16xf32> to vector<16x1xf32>
    %504 = vector.broadcast %503 : vector<16x1xf32> to vector<16x16xf32>
    %505 = arith.subf %501, %504 : vector<16x16xf32>
    %506 = math.exp %505 : vector<16x16xf32>
    %cst_190 = arith.constant dense<0.000000e+00> : vector<16xf32>
    %507 = vector.multi_reduction <add>, %506, %cst_190 [1] : vector<16x16xf32> to vector<16xf32>
    %508 = vector.shape_cast %507 : vector<16xf32> to vector<16x1xf32>
    %509 = tpu.reciprocal %508 {approx = true} : vector<16x1xf32> -> vector<16x1xf32>
    %510 = vector.broadcast %509 : vector<16x1xf32> to vector<16x16xf32>
    %511 = arith.mulf %506, %510 : vector<16x16xf32>
    %512 = arith.truncf %511 : vector<16x16xf32> to vector<16x16xbf16>
    %513 = vector.extract_strided_slice %497 {offsets = [0, 0], sizes = [16, 32], strides = [1, 1]} : vector<16x128xbf16> to vector<16x32xbf16>
    %cst_191 = arith.constant dense<0.000000e+00> : vector<16x32xf32>
    %514 = tpu.matmul %512, %513, %cst_191 {dimension_numbers = #tpu.dot_dimension_numbers<[1], [0], [0], [1], [0, 0, 1, 1], [], []>} : vector<16x16xbf16>, vector<16x32xbf16>, vector<16x32xf32> -> vector<16x32xf32>
    %515 = arith.truncf %514 : vector<16x32xf32> to vector<16x32xbf16>
    %516 = vector.extract_strided_slice %494 {offsets = [0, 0], sizes = [32, 128], strides = [1, 1]} : vector<128x128xbf16> to vector<32x128xbf16>
    %cst_192 = arith.constant dense<0.000000e+00> : vector<16x128xf32>
    %517 = tpu.matmul %515, %516, %cst_192 {dimension_numbers = #tpu.dot_dimension_numbers<[1], [0], [0], [1], [0, 0, 1, 1], [], []>} : vector<16x32xbf16>, vector<32x128xbf16>, vector<16x128xf32> -> vector<16x128xf32>
    %518 = vector.extract_strided_slice %495 {offsets = [0, 32], sizes = [16, 32], strides = [1, 1]} : vector<16x128xbf16> to vector<16x32xbf16>
    %519 = vector.extract_strided_slice %496 {offsets = [0, 32], sizes = [16, 32], strides = [1, 1]} : vector<16x128xbf16> to vector<16x32xbf16>
    %cst_193 = arith.constant dense<0.000000e+00> : vector<16x16xf32>
    %520 = tpu.matmul %518, %519, %cst_193 {dimension_numbers = #tpu.dot_dimension_numbers<[1], [1], [0], [0], [0, 0, 1, 0], [], []>} : vector<16x32xbf16>, vector<16x32xbf16>, vector<16x16xf32> -> vector<16x16xf32>
    %521 = arith.addf %520, %8 : vector<16x16xf32>
    %cst_194 = arith.constant dense<0xFF800000> : vector<16xf32>
    %522 = vector.multi_reduction <maximumf>, %521, %cst_194 [1] : vector<16x16xf32> to vector<16xf32>
    %523 = vector.shape_cast %522 : vector<16xf32> to vector<16x1xf32>
    %524 = vector.broadcast %523 : vector<16x1xf32> to vector<16x16xf32>
    %525 = arith.subf %521, %524 : vector<16x16xf32>
    %526 = math.exp %525 : vector<16x16xf32>
    %cst_195 = arith.constant dense<0.000000e+00> : vector<16xf32>
    %527 = vector.multi_reduction <add>, %526, %cst_195 [1] : vector<16x16xf32> to vector<16xf32>
    %528 = vector.shape_cast %527 : vector<16xf32> to vector<16x1xf32>
    %529 = tpu.reciprocal %528 {approx = true} : vector<16x1xf32> -> vector<16x1xf32>
    %530 = vector.broadcast %529 : vector<16x1xf32> to vector<16x16xf32>
    %531 = arith.mulf %526, %530 : vector<16x16xf32>
    %532 = arith.truncf %531 : vector<16x16xf32> to vector<16x16xbf16>
    %533 = vector.extract_strided_slice %497 {offsets = [0, 32], sizes = [16, 32], strides = [1, 1]} : vector<16x128xbf16> to vector<16x32xbf16>
    %cst_196 = arith.constant dense<0.000000e+00> : vector<16x32xf32>
    %534 = tpu.matmul %532, %533, %cst_196 {dimension_numbers = #tpu.dot_dimension_numbers<[1], [0], [0], [1], [0, 0, 1, 1], [], []>} : vector<16x16xbf16>, vector<16x32xbf16>, vector<16x32xf32> -> vector<16x32xf32>
    %535 = arith.truncf %534 : vector<16x32xf32> to vector<16x32xbf16>
    %536 = vector.extract_strided_slice %494 {offsets = [32, 0], sizes = [32, 128], strides = [1, 1]} : vector<128x128xbf16> to vector<32x128xbf16>
    %cst_197 = arith.constant dense<0.000000e+00> : vector<16x128xf32>
    %537 = tpu.matmul %535, %536, %cst_197 {dimension_numbers = #tpu.dot_dimension_numbers<[1], [0], [0], [1], [0, 0, 1, 1], [], []>} : vector<16x32xbf16>, vector<32x128xbf16>, vector<16x128xf32> -> vector<16x128xf32>
    %538 = arith.addf %517, %537 : vector<16x128xf32>
    %539 = vector.extract_strided_slice %495 {offsets = [0, 64], sizes = [16, 32], strides = [1, 1]} : vector<16x128xbf16> to vector<16x32xbf16>
    %540 = vector.extract_strided_slice %496 {offsets = [0, 64], sizes = [16, 32], strides = [1, 1]} : vector<16x128xbf16> to vector<16x32xbf16>
    %cst_198 = arith.constant dense<0.000000e+00> : vector<16x16xf32>
    %541 = tpu.matmul %539, %540, %cst_198 {dimension_numbers = #tpu.dot_dimension_numbers<[1], [1], [0], [0], [0, 0, 1, 0], [], []>} : vector<16x32xbf16>, vector<16x32xbf16>, vector<16x16xf32> -> vector<16x16xf32>
    %542 = arith.addf %541, %8 : vector<16x16xf32>
    %cst_199 = arith.constant dense<0xFF800000> : vector<16xf32>
    %543 = vector.multi_reduction <maximumf>, %542, %cst_199 [1] : vector<16x16xf32> to vector<16xf32>
    %544 = vector.shape_cast %543 : vector<16xf32> to vector<16x1xf32>
    %545 = vector.broadcast %544 : vector<16x1xf32> to vector<16x16xf32>
    %546 = arith.subf %542, %545 : vector<16x16xf32>
    %547 = math.exp %546 : vector<16x16xf32>
    %cst_200 = arith.constant dense<0.000000e+00> : vector<16xf32>
    %548 = vector.multi_reduction <add>, %547, %cst_200 [1] : vector<16x16xf32> to vector<16xf32>
    %549 = vector.shape_cast %548 : vector<16xf32> to vector<16x1xf32>
    %550 = tpu.reciprocal %549 {approx = true} : vector<16x1xf32> -> vector<16x1xf32>
    %551 = vector.broadcast %550 : vector<16x1xf32> to vector<16x16xf32>
    %552 = arith.mulf %547, %551 : vector<16x16xf32>
    %553 = arith.truncf %552 : vector<16x16xf32> to vector<16x16xbf16>
    %554 = vector.extract_strided_slice %497 {offsets = [0, 64], sizes = [16, 32], strides = [1, 1]} : vector<16x128xbf16> to vector<16x32xbf16>
    %cst_201 = arith.constant dense<0.000000e+00> : vector<16x32xf32>
    %555 = tpu.matmul %553, %554, %cst_201 {dimension_numbers = #tpu.dot_dimension_numbers<[1], [0], [0], [1], [0, 0, 1, 1], [], []>} : vector<16x16xbf16>, vector<16x32xbf16>, vector<16x32xf32> -> vector<16x32xf32>
    %556 = arith.truncf %555 : vector<16x32xf32> to vector<16x32xbf16>
    %557 = vector.extract_strided_slice %494 {offsets = [64, 0], sizes = [32, 128], strides = [1, 1]} : vector<128x128xbf16> to vector<32x128xbf16>
    %cst_202 = arith.constant dense<0.000000e+00> : vector<16x128xf32>
    %558 = tpu.matmul %556, %557, %cst_202 {dimension_numbers = #tpu.dot_dimension_numbers<[1], [0], [0], [1], [0, 0, 1, 1], [], []>} : vector<16x32xbf16>, vector<32x128xbf16>, vector<16x128xf32> -> vector<16x128xf32>
    %559 = arith.addf %538, %558 : vector<16x128xf32>
    %560 = vector.extract_strided_slice %495 {offsets = [0, 96], sizes = [16, 32], strides = [1, 1]} : vector<16x128xbf16> to vector<16x32xbf16>
    %561 = vector.extract_strided_slice %496 {offsets = [0, 96], sizes = [16, 32], strides = [1, 1]} : vector<16x128xbf16> to vector<16x32xbf16>
    %cst_203 = arith.constant dense<0.000000e+00> : vector<16x16xf32>
    %562 = tpu.matmul %560, %561, %cst_203 {dimension_numbers = #tpu.dot_dimension_numbers<[1], [1], [0], [0], [0, 0, 1, 0], [], []>} : vector<16x32xbf16>, vector<16x32xbf16>, vector<16x16xf32> -> vector<16x16xf32>
    %563 = arith.addf %562, %8 : vector<16x16xf32>
    %cst_204 = arith.constant dense<0xFF800000> : vector<16xf32>
    %564 = vector.multi_reduction <maximumf>, %563, %cst_204 [1] : vector<16x16xf32> to vector<16xf32>
    %565 = vector.shape_cast %564 : vector<16xf32> to vector<16x1xf32>
    %566 = vector.broadcast %565 : vector<16x1xf32> to vector<16x16xf32>
    %567 = arith.subf %563, %566 : vector<16x16xf32>
    %568 = math.exp %567 : vector<16x16xf32>
    %cst_205 = arith.constant dense<0.000000e+00> : vector<16xf32>
    %569 = vector.multi_reduction <add>, %568, %cst_205 [1] : vector<16x16xf32> to vector<16xf32>
    %570 = vector.shape_cast %569 : vector<16xf32> to vector<16x1xf32>
    %571 = tpu.reciprocal %570 {approx = true} : vector<16x1xf32> -> vector<16x1xf32>
    %572 = vector.broadcast %571 : vector<16x1xf32> to vector<16x16xf32>
    %573 = arith.mulf %568, %572 : vector<16x16xf32>
    %574 = arith.truncf %573 : vector<16x16xf32> to vector<16x16xbf16>
    %575 = vector.extract_strided_slice %497 {offsets = [0, 96], sizes = [16, 32], strides = [1, 1]} : vector<16x128xbf16> to vector<16x32xbf16>
    %cst_206 = arith.constant dense<0.000000e+00> : vector<16x32xf32>
    %576 = tpu.matmul %574, %575, %cst_206 {dimension_numbers = #tpu.dot_dimension_numbers<[1], [0], [0], [1], [0, 0, 1, 1], [], []>} : vector<16x16xbf16>, vector<16x32xbf16>, vector<16x32xf32> -> vector<16x32xf32>
    %577 = arith.truncf %576 : vector<16x32xf32> to vector<16x32xbf16>
    %578 = vector.extract_strided_slice %494 {offsets = [96, 0], sizes = [32, 128], strides = [1, 1]} : vector<128x128xbf16> to vector<32x128xbf16>
    %cst_207 = arith.constant dense<0.000000e+00> : vector<16x128xf32>
    %579 = tpu.matmul %577, %578, %cst_207 {dimension_numbers = #tpu.dot_dimension_numbers<[1], [0], [0], [1], [0, 0, 1, 1], [], []>} : vector<16x32xbf16>, vector<32x128xbf16>, vector<16x128xf32> -> vector<16x128xf32>
    %580 = arith.addf %559, %579 : vector<16x128xf32>
    %c1_208 = arith.constant 1 : index
    %c0_209 = arith.constant 0 : index
    %c1408_210 = arith.constant 1408 : index
    %581 = vector.load %arg7[%c1_208, %c0_209, %c1408_210] : memref<2x1x2176xf32, #tpu.memory_space<vmem>>, vector<1x1x128xf32>
    %582 = vector.shape_cast %581 : vector<1x1x128xf32> to vector<1x128xf32>
    %583 = vector.broadcast %582 : vector<1x128xf32> to vector<16x128xf32>
    %584 = arith.addf %580, %583 : vector<16x128xf32>
    %585 = arith.addf %584, %449 : vector<16x128xf32>
    %c1_211 = arith.constant 1 : index
    %c0_212 = arith.constant 0 : index
    %c1536_213 = arith.constant 1536 : index
    %586 = vector.load %arg7[%c1_211, %c0_212, %c1536_213] : memref<2x1x2176xf32, #tpu.memory_space<vmem>>, vector<1x1x128xf32>
    %587 = vector.shape_cast %586 : vector<1x1x128xf32> to vector<1x128xf32>
    %c1_214 = arith.constant 1 : index
    %c0_215 = arith.constant 0 : index
    %c1664_216 = arith.constant 1664 : index
    %588 = vector.load %arg7[%c1_214, %c0_215, %c1664_216] : memref<2x1x2176xf32, #tpu.memory_space<vmem>>, vector<1x1x128xf32>
    %589 = vector.shape_cast %588 : vector<1x1x128xf32> to vector<1x128xf32>
    %cst_217 = arith.constant dense<0.000000e+00> : vector<16xf32>
    %590 = vector.multi_reduction <add>, %585, %cst_217 [1] : vector<16x128xf32> to vector<16xf32>
    %591 = vector.shape_cast %590 : vector<16xf32> to vector<16x1xf32>
    %cst_218 = arith.constant 1.280000e+02 : f32
    %592 = vector.broadcast %cst_218 : f32 to vector<16x1xf32>
    %593 = arith.divf %591, %592 : vector<16x1xf32>
    %594 = vector.broadcast %593 : vector<16x1xf32> to vector<16x128xf32>
    %595 = arith.subf %585, %594 : vector<16x128xf32>
    %596 = arith.mulf %595, %595 : vector<16x128xf32>
    %cst_219 = arith.constant dense<0.000000e+00> : vector<16xf32>
    %597 = vector.multi_reduction <add>, %596, %cst_219 [1] : vector<16x128xf32> to vector<16xf32>
    %598 = vector.shape_cast %597 : vector<16xf32> to vector<16x1xf32>
    %cst_220 = arith.constant 1.280000e+02 : f32
    %599 = vector.broadcast %cst_220 : f32 to vector<16x1xf32>
    %600 = arith.divf %598, %599 : vector<16x1xf32>
    %601 = vector.broadcast %593 : vector<16x1xf32> to vector<16x128xf32>
    %602 = arith.subf %585, %601 : vector<16x128xf32>
    %cst_221 = arith.constant 9.99999997E-7 : f32
    %603 = vector.broadcast %cst_221 : f32 to vector<16x1xf32>
    %604 = arith.addf %600, %603 : vector<16x1xf32>
    %605 = math.rsqrt %604 : vector<16x1xf32>
    %606 = vector.broadcast %605 : vector<16x1xf32> to vector<16x128xf32>
    %607 = arith.mulf %602, %606 : vector<16x128xf32>
    %608 = vector.broadcast %587 : vector<1x128xf32> to vector<16x128xf32>
    %609 = arith.mulf %607, %608 : vector<16x128xf32>
    %610 = vector.broadcast %589 : vector<1x128xf32> to vector<16x128xf32>
    %611 = arith.addf %609, %610 : vector<16x128xf32>
    %612 = arith.truncf %611 : vector<16x128xf32> to vector<16x128xbf16>
    %c1_222 = arith.constant 1 : index
    %c0_223 = arith.constant 0 : index
    %c1024_224 = arith.constant 1024 : index
    %613 = vector.load %arg5[%c1_222, %c0_223, %c1024_224] : memref<2x128x1280xbf16, #tpu.memory_space<vmem>>, vector<1x128x256xbf16>
    %614 = vector.shape_cast %613 : vector<1x128x256xbf16> to vector<128x256xbf16>
    %cst_225 = arith.constant dense<0.000000e+00> : vector<16x256xf32>
    %615 = tpu.matmul %612, %614, %cst_225 {dimension_numbers = #tpu.dot_dimension_numbers<[1], [0], [0], [1], [0, 0, 1, 1], [], []>} : vector<16x128xbf16>, vector<128x256xbf16>, vector<16x256xf32> -> vector<16x256xf32>
    %c1_226 = arith.constant 1 : index
    %c0_227 = arith.constant 0 : index
    %c1792_228 = arith.constant 1792 : index
    %616 = vector.load %arg7[%c1_226, %c0_227, %c1792_228] : memref<2x1x2176xf32, #tpu.memory_space<vmem>>, vector<1x1x256xf32>
    %617 = vector.shape_cast %616 : vector<1x1x256xf32> to vector<1x256xf32>
    %618 = vector.broadcast %617 : vector<1x256xf32> to vector<16x256xf32>
    %619 = arith.addf %615, %618 : vector<16x256xf32>
    %cst_229 = arith.constant 0.000000e+00 : f32
    %620 = vector.broadcast %cst_229 : f32 to vector<16x256xf32>
    %621 = arith.maximumf %619, %620 : vector<16x256xf32>
    %622 = arith.truncf %621 : vector<16x256xf32> to vector<16x256xbf16>
    %c1_230 = arith.constant 1 : index
    %c0_231 = arith.constant 0 : index
    %c0_232 = arith.constant 0 : index
    %623 = vector.load %arg6[%c1_230, %c0_231, %c0_232] : memref<2x256x128xbf16, #tpu.memory_space<vmem>>, vector<1x256x128xbf16>
    %624 = vector.shape_cast %623 : vector<1x256x128xbf16> to vector<256x128xbf16>
    %cst_233 = arith.constant dense<0.000000e+00> : vector<16x128xf32>
    %625 = tpu.matmul %622, %624, %cst_233 {dimension_numbers = #tpu.dot_dimension_numbers<[1], [0], [0], [1], [0, 0, 1, 1], [], []>} : vector<16x256xbf16>, vector<256x128xbf16>, vector<16x128xf32> -> vector<16x128xf32>
    %c1_234 = arith.constant 1 : index
    %c0_235 = arith.constant 0 : index
    %c2048_236 = arith.constant 2048 : index
    %626 = vector.load %arg7[%c1_234, %c0_235, %c2048_236] : memref<2x1x2176xf32, #tpu.memory_space<vmem>>, vector<1x1x128xf32>
    %627 = vector.shape_cast %626 : vector<1x1x128xf32> to vector<1x128xf32>
    %628 = vector.broadcast %627 : vector<1x128xf32> to vector<16x128xf32>
    %629 = arith.addf %625, %628 : vector<16x128xf32>
    %630 = arith.addf %629, %585 : vector<16x128xf32>
    %c0_237 = arith.constant 0 : index
    %c0_238 = arith.constant 0 : index
    %631 = vector.load %arg8[%c0_237, %c0_238] : memref<1x256xf32, #tpu.memory_space<vmem>>, vector<1x128xf32>
    %c0_239 = arith.constant 0 : index
    %c128_240 = arith.constant 128 : index
    %632 = vector.load %arg8[%c0_239, %c128_240] : memref<1x256xf32, #tpu.memory_space<vmem>>, vector<1x128xf32>
    %cst_241 = arith.constant dense<0.000000e+00> : vector<16xf32>
    %633 = vector.multi_reduction <add>, %630, %cst_241 [1] : vector<16x128xf32> to vector<16xf32>
    %634 = vector.shape_cast %633 : vector<16xf32> to vector<16x1xf32>
    %cst_242 = arith.constant 1.280000e+02 : f32
    %635 = vector.broadcast %cst_242 : f32 to vector<16x1xf32>
    %636 = arith.divf %634, %635 : vector<16x1xf32>
    %637 = vector.broadcast %636 : vector<16x1xf32> to vector<16x128xf32>
    %638 = arith.subf %630, %637 : vector<16x128xf32>
    %639 = arith.mulf %638, %638 : vector<16x128xf32>
    %cst_243 = arith.constant dense<0.000000e+00> : vector<16xf32>
    %640 = vector.multi_reduction <add>, %639, %cst_243 [1] : vector<16x128xf32> to vector<16xf32>
    %641 = vector.shape_cast %640 : vector<16xf32> to vector<16x1xf32>
    %cst_244 = arith.constant 1.280000e+02 : f32
    %642 = vector.broadcast %cst_244 : f32 to vector<16x1xf32>
    %643 = arith.divf %641, %642 : vector<16x1xf32>
    %644 = vector.broadcast %636 : vector<16x1xf32> to vector<16x128xf32>
    %645 = arith.subf %630, %644 : vector<16x128xf32>
    %cst_245 = arith.constant 9.99999997E-7 : f32
    %646 = vector.broadcast %cst_245 : f32 to vector<16x1xf32>
    %647 = arith.addf %643, %646 : vector<16x1xf32>
    %648 = math.rsqrt %647 : vector<16x1xf32>
    %649 = vector.broadcast %648 : vector<16x1xf32> to vector<16x128xf32>
    %650 = arith.mulf %645, %649 : vector<16x128xf32>
    %651 = vector.broadcast %631 : vector<1x128xf32> to vector<16x128xf32>
    %652 = arith.mulf %650, %651 : vector<16x128xf32>
    %653 = vector.broadcast %632 : vector<1x128xf32> to vector<16x128xf32>
    %654 = arith.addf %652, %653 : vector<16x128xf32>
    %655 = vector.shape_cast %654 : vector<16x128xf32> to vector<2x8x128xf32>
    %c0_246 = arith.constant 0 : index
    %c0_247 = arith.constant 0 : index
    %c0_248 = arith.constant 0 : index
    %656 = vector.load %arg9[%c0_246, %c0_247, %c0_248] : memref<2x8x128xf32, #tpu.memory_space<vmem>>, vector<2x8x128xf32>
    tpu.vector_store %arg9[%c0_246, %c0_247, %c0_248], %655 {strides = array<i32>} : memref<2x8x128xf32, #tpu.memory_space<vmem>>, vector<2x8x128xf32>,
    return
  }
  func.func @transform_0(%arg0: i32) -> (i32, i32, i32) {
    %c0_i32 = arith.constant 0 : i32
    %c0_i32_0 = arith.constant 0 : i32
    %c0_i32_1 = arith.constant 0 : i32
    return %arg0, %c0_i32, %c0_i32_0 : i32, i32, i32
  }
  func.func @transform_1(%arg0: i32) -> (i32, i32, i32) {
    %c0_i32 = arith.constant 0 : i32
    %c0_i32_0 = arith.constant 0 : i32
    %c0_i32_1 = arith.constant 0 : i32
    return %arg0, %c0_i32, %c0_i32_0 : i32, i32, i32
  }
  func.func @transform_2(%arg0: i32) -> (i32, i32, i32) {
    %c0_i32 = arith.constant 0 : i32
    %c0_i32_0 = arith.constant 0 : i32
    %c0_i32_1 = arith.constant 0 : i32
    return %arg0, %c0_i32, %c0_i32_0 : i32, i32, i32
  }
  func.func @transform_3(%arg0: i32) -> (i32, i32, i32) {
    %c0_i32 = arith.constant 0 : i32
    %c0_i32_0 = arith.constant 0 : i32
    %c0_i32_1 = arith.constant 0 : i32
    return %arg0, %c0_i32, %c0_i32_0 : i32, i32, i32
  }
  func.func @transform_4(%arg0: i32) -> (i32, i32, i32) {
    %c0_i32 = arith.constant 0 : i32
    %c0_i32_0 = arith.constant 0 : i32
    %c0_i32_1 = arith.constant 0 : i32
    %c0_i32_2 = arith.constant 0 : i32
    return %c0_i32, %c0_i32_0, %c0_i32_1 : i32, i32, i32
  }
  func.func @transform_5(%arg0: i32) -> (i32, i32, i32) {
    %c0_i32 = arith.constant 0 : i32
    %c0_i32_0 = arith.constant 0 : i32
    %c0_i32_1 = arith.constant 0 : i32
    %c0_i32_2 = arith.constant 0 : i32
    return %c0_i32, %c0_i32_0, %c0_i32_1 : i32, i32, i32
  }
  func.func @transform_6(%arg0: i32) -> (i32, i32, i32) {
    %c0_i32 = arith.constant 0 : i32
    %c0_i32_0 = arith.constant 0 : i32
    %c0_i32_1 = arith.constant 0 : i32
    %c0_i32_2 = arith.constant 0 : i32
    return %c0_i32, %c0_i32_0, %c0_i32_1 : i32, i32, i32
  }
  func.func @transform_7(%arg0: i32) -> (i32, i32) {
    %c0_i32 = arith.constant 0 : i32
    %c0_i32_0 = arith.constant 0 : i32
    %c0_i32_1 = arith.constant 0 : i32
    return %c0_i32, %c0_i32_0 : i32, i32
  }
  func.func @transform_8(%arg0: i32) -> (i32, i32, i32) {
    %c0_i32 = arith.constant 0 : i32
    %c0_i32_0 = arith.constant 0 : i32
    %c0_i32_1 = arith.constant 0 : i32
    return %arg0, %c0_i32, %c0_i32_0 : i32, i32, i32
  }
}

</mosaic_0001>

<bundles_post_ra>
// kernel: tpu_custom_call.1
= control target key start
LH: loop header
LB: loop body
LE: loop exit
PB: predicated region body
PF: predicated region fallthrough
CT: control target
= control target key end

     0   :  { %13 = vsyncpa [#allocation3], 0  ;;  %s5707_s0 = inlined_call_operand.hbm [shape: f32[2,8,128], index: 0, kind: input, shape index: {}]   ;;  %s5708_s1 = inlined_call_operand.hbm [shape: f32[2,8,128], index: 1, kind: input, shape index: {}]   ;;  %s5709_s2 = inlined_call_operand.hbm [shape: f32[1,16,16], index: 2, kind: input, shape index: {}]   ;;  %s5710_s3 = inlined_call_operand.hbm [shape: f32[1,16,16], index: 3, kind: input, shape index: {}]   ;;  %s5711_s4 = inlined_call_operand.hbm [shape: bf16[2,128,1280], index: 4, kind: input, shape index: {}]   ;;  %s5712_s5 = inlined_call_operand.hbm [shape: bf16[2,256,128], index: 5, kind: input, shape index: {}]   ;;  %s5713_s6 = inlined_call_operand.hbm [shape: f32[2,1,2176], index: 6, kind: input, shape index: {}]   ;;  %s5714_s7 = inlined_call_operand.vmem [shape: f32[1,256], index: 7, kind: input, shape index: {}]   ;;  %s5715_s8 = inlined_call_operand.hbm [shape: f32[2,8,128], index: 8, kind: output, shape index: {}]  }
   0x1   :  { %14 = vsyncpa [#allocation6], 0 }
   0x2   :  { %15 = vsyncpa [#allocation9], 0 }
   0x3   :  { %16 = vsyncpa [#allocation12], 0 }
   0x4   :  { %17 = vsyncpa [#allocation4], 0  ;;  %s35_s29 = sshll.u32 %s5708_s1, 4  ;;  %s5132_s30 = smov [#allocation5]   ;;  %s36_s29 = int_to_ptr.hbm [resolvable:$true] %s35_s29 }
   0x5   :  { %s37_s9 = sshll.u32 %s5132_s30, 4  ;;  %s61_s12 = sshll.u32 %s5710_s3, 4  ;;  %s38_s9 = int_to_ptr.vmem [resolvable:$true] %s37_s9  ;;  %s62_s12 = int_to_ptr.hbm [resolvable:$true] %s61_s12 }
   0x6   :  { %s5133_s13 = smov 128   ;;  %s5134_s14 = smov 8  }
   0x7   :  { %43 = dma.hbm_to_vmem [thread:$0]  %s36_s29, 256, %s38_s9, [#allocation6], %s5133_s13, %s5133_s13, %s5134_s14  }
   0x8   :  { %s5135_s15 = smov [#allocation8]   ;;  %s87_s1 = sshll.u32 %s5712_s5, 4  ;;  %s88_s1 = int_to_ptr.hbm [resolvable:$true] %s87_s1 }
   0x9   :  { %s63_s16 = sshll.u32 %s5135_s15, 4  ;;  %s5136_s3 = smov [#allocation11]   ;;  %s64_s16 = int_to_ptr.vmem [resolvable:$true] %s63_s16 }
   0xa   :  { %69 = dma.hbm_to_vmem [thread:$0]  %s62_s12, 256, %s64_s16, [#allocation9], %s5133_s13, %s5133_s13, %s5134_s14  }
   0xb   :  { %s89_s19 = sshll.u32 %s5136_s3, 4  ;;  %s22_s22 = sshll.u32 %s5707_s0, 4  ;;  %s90_s19 = int_to_ptr.vmem [resolvable:$true] %s89_s19  ;;  %s23_s22 = int_to_ptr.hbm [resolvable:$true] %s22_s22 }
   0xc   :  { %s5137_s23 = smov 64   ;;  %s5138_s24 = smov 4  }
   0xd   :  { %95 = dma.hbm_to_vmem [thread:$0]  %s88_s1, 4096, %s90_s19, [#allocation12], %s5137_s23, %s5137_s23, %s5138_s24  }
   0xe   :  { %s5139_s5 = smov [#allocation2]   ;;  %s48_s28 = sshll.u32 %s5709_s2, 4  ;;  %s49_s28 = int_to_ptr.hbm [resolvable:$true] %s48_s28 }
   0xf   :  { %s24_s25 = sshll.u32 %s5139_s5, 4  ;;  %s74_s30 = sshll.u32 %s5711_s4, 4  ;;  %s25_s25 = int_to_ptr.vmem [resolvable:$true] %s24_s25  ;;  %s75_s30 = int_to_ptr.hbm [resolvable:$true] %s74_s30 }
  0x10   :  { %30 = dma.hbm_to_vmem [thread:$0]  %s23_s22, 256, %s25_s25, [#allocation3], %s5133_s13, %s5133_s13, %s5134_s14  }
  0x11   :  { %s5140_s9 = smov [#allocation7]   ;;  %s5141_s11 = smov [#allocation10]  }
  0x12   :  { %s50_s10 = sshll.u32 %s5140_s9, 4  ;;  %s76_s2 = sshll.u32 %s5141_s11, 4  ;;  %s51_s10 = int_to_ptr.vmem [resolvable:$true] %s50_s10  ;;  %s77_s2 = int_to_ptr.vmem [resolvable:$true] %s76_s2 }
  0x13   :  { %56 = dma.hbm_to_vmem [thread:$0]  %s49_s28, 256, %s51_s10, [#allocation6], %s5133_s13, %s5133_s13, %s5134_s14  }
  0x14   :  { %s5142_s12 = smov 640   ;;  %s5143_s15 = smov 40  }
  0x15   :  { %82 = dma.hbm_to_vmem [thread:$0]  %s75_s30, 20480, %s77_s2, [#allocation9], %s5142_s12, %s5142_s12, %s5143_s15  }
  0x16   :  { %s100_s18 = sshll.u32 %s5713_s6, 4  ;;  %s5144_s4 = smov [#allocation13]   ;;  %s101_s18 = int_to_ptr.hbm [resolvable:$true] %s100_s18 }
  0x17   :  { %s102_s1 = sshll.u32 %s5144_s4, 4  ;;  %s5145_s3 = smov 272   ;;  %s103_s1 = int_to_ptr.vmem [resolvable:$true] %s102_s1 }
  0x18   :  { %s5146_s19 = smov 17  }
  0x19   :  { %108 = dma.hbm_to_vmem [thread:$0]  %s101_s18, 544, %s103_s1, [#allocation12], %s5145_s3, %s5145_s3, %s5146_s19  }
  0x1a   :  { %5122 = dma.done.wait [#allocation3], 256  }
  0x1b   :  { %5123 = vsyncadd [#allocation3], 4294967040 }
  0x1c   :  { %5124 = dma.done.wait [#allocation6], 512  }
  0x1d   :  { %5125 = vsyncadd [#allocation6], 4294966784 }
  0x1e   :  { %5126 = dma.done.wait [#allocation9], 20736  }
  0x1f   :  { %5127 = vsyncadd [#allocation9], 4294946560 }
  0x20   :  { %5128 = dma.done.wait [#allocation12], 4640  }
  0x21   :  { %5129 = vsyncadd [#allocation12], 4294962656  ;;  %v5231_v0 = vld [vmem:[#allocation2] sm:$0xff]  ;;  %v5234_v1 = vld [vmem:[#allocation2 + $0x8] sm:$0xff]  ;;  %v5147_v2 = vmov 128.0   ;;  %vm451_vm7 = vcmask 261120  }
  0x22   :  { %151 = vadd.xlane.f32.xlu0 %v5231_v0  ;;  %4768 = vrcp.f32 %v5147_v2  ;;  %v3805_v17 = vld [vmem:[#allocation10 + $0x230] sm:$0xf]  ;;  %v4557_v18 = vld [vmem:[#allocation10 + $0x254] sm:$0xf0]  ;;  %v4556_v19 = vld [vmem:[#allocation10 + $0x234] sm:$0xf] }
  0x23   :  { %v3806_v20 = vor.u32 %v4557_v18, %v3805_v17  ;;  %v3807_v21 = vld [vmem:[#allocation10 + $0x258] sm:$0xf0]  ;;  %v3813_v22 = vld [vmem:[#allocation10 + $0x238] sm:$0xf]  ;;  %v4558_v23 = vld [vmem:[#allocation10 + $0x25c] sm:$0xf0] }
  0x24   :  { %v3810_v24 = vor.u32 %v4556_v19, %v3807_v21  ;;  %v3814_v25 = vor.u32 %v4558_v23, %v3813_v22  ;;  %v3793_v26 = vld [vmem:[#allocation10 + $0x1e0] sm:$0xf]  ;;  %v4554_v27 = vld [vmem:[#allocation10 + $0x204] sm:$0xf0]  ;;  %v4553_v28 = vld [vmem:[#allocation10 + $0x1e4] sm:$0xf] }
  0x25   :  { %377 = vmatpush.bf16.msra.mxu0 %v3806_v20  ;;  %v3794_v29 = vor.u32 %v4554_v27, %v3793_v26  ;;  %v3795_v30 = vld [vmem:[#allocation10 + $0x208] sm:$0xf0]  ;;  %v3801_v31 = vld [vmem:[#allocation10 + $0x1e8] sm:$0xf]  ;;  %v4555_v32 = vld [vmem:[#allocation10 + $0x20c] sm:$0xf0] }
  0x26   :  { %391 = vmatpush.bf16.msra.mxu1 %v3810_v24  ;;  %405 = vmatpush.bf16.msra.mxu2 %v3814_v25  ;;  %v3798_v33 = vor.u32 %v4553_v28, %v3795_v30  ;;  %v3802_v34 = vor.u32 %v4555_v32, %v3801_v31  ;;  %v3781_v35 = vld [vmem:[#allocation10 + $0x190] sm:$0xf]  ;;  %v4551_v36 = vld [vmem:[#allocation10 + $0x1b4] sm:$0xf0]  ;;  %v4550_v37 = vld [vmem:[#allocation10 + $0x194] sm:$0xf] }
  0x27   :  { %v3782_v38 = vor.u32 %v4551_v36, %v3781_v35  ;;  %v3783_v39 = vld [vmem:[#allocation10 + $0x1b8] sm:$0xf0]  ;;  %v3789_v40 = vld [vmem:[#allocation10 + $0x198] sm:$0xf]  ;;  %v4552_v41 = vld [vmem:[#allocation10 + $0x1bc] sm:$0xf0] }
  0x28   :  { %v4769_v3 = vpop.eup %4768  ;;  %v3786_v42 = vor.u32 %v4550_v37, %v3783_v39  ;;  %v3790_v43 = vor.u32 %v4552_v41, %v3789_v40  ;;  %v3769_v44 = vld [vmem:[#allocation10 + $0x140] sm:$0xf]  ;;  %v4548_v45 = vld [vmem:[#allocation10 + $0x164] sm:$0xf0]  ;;  %v4547_v46 = vld [vmem:[#allocation10 + $0x144] sm:$0xf] }
  0x29   :  { %v156_v4 = vmul.f32 128.0, %v4769_v3  ;;  %vm160_vm0 = vweird.f32 %v4769_v3  ;;  %378 = vmatpush.bf16.msra.mxu0 %v3794_v29  ;;  %v3770_v47 = vor.u32 %v4548_v45, %v3769_v44  ;;  %v3771_v48 = vld [vmem:[#allocation10 + $0x168] sm:$0xf0]  ;;  %v3777_v49 = vld [vmem:[#allocation10 + $0x148] sm:$0xf]  ;;  %vm472_vm8 = vcmask 130048  }
  0x2a   :  { %153 = vadd.xlane.f32.xlu0 %v5234_v1  ;;  %392 = vmatpush.bf16.msra.mxu1 %v3798_v33  ;;  %v4549_v50 = vld [vmem:[#allocation10 + $0x16c] sm:$0xf0]  ;;  %v3774_v51 = vor.u32 %v4547_v46, %v3771_v48  ;;  %v4545_v54 = vld [vmem:[#allocation10 + $0x114] sm:$0xf0]  ;;  %v4544_v55 = vld [vmem:[#allocation10 + $0xf4] sm:$0xf] }
  0x2b   :  { %v157_v5 = vsub.f32 1.0, %v156_v4  ;;  %406 = vmatpush.bf16.msra.mxu2 %v3802_v34  ;;  %v3778_v52 = vor.u32 %v4549_v50, %v3777_v49  ;;  %v3757_v53 = vld [vmem:[#allocation10 + $0xf0] sm:$0xf]  ;;  %v3759_v57 = vld [vmem:[#allocation10 + $0x118] sm:$0xf0]  ;;  %s5148_s6 = smov 96  }
  0x2c   :  { %v3758_v56 = vor.u32 %v4545_v54, %v3757_v53  ;;  %v3765_v58 = vld [vmem:[#allocation10 + $0xf8] sm:$0xf]  ;;  %v4546_v59 = vld [vmem:[#allocation10 + $0x11c] sm:$0xf0]  ;;  %v3762_v60 = vor.u32 %v4544_v55, %v3759_v57  ;;  %v4542_v63 = vld [vmem:[#allocation10 + $0xc4] sm:$0xf0] }
  0x2d   :  { %v158_v6 = vmul.f32 %v4769_v3, %v157_v5  ;;  %379 = vmatpush.bf16.msra.mxu0 %v3782_v38  ;;  %v3766_v61 = vor.u32 %v4546_v59, %v3765_v58  ;;  %v3745_v62 = vld [vmem:[#allocation10 + $0xa0] sm:$0xf]  ;;  %v4541_v2 = vld [vmem:[#allocation10 + $0xa4] sm:$0xf]  ;;  %v3747_v4 = vld [vmem:[#allocation10 + $0xc8] sm:$0xf0] }
  0x2e   :  { %393 = vmatpush.bf16.msra.mxu1 %v3786_v42  ;;  %v3753_v5 = vld [vmem:[#allocation10 + $0xa8] sm:$0xf]  ;;  %v3741_v17 = vld [vmem:[#allocation10 + $0x58] sm:$0xf]  ;;  %v4540_v18 = vld [vmem:[#allocation10 + $0x7c] sm:$0xf0] }
  0x2f   :  { %v159_v7 = vadd.f32 %v4769_v3, %v158_v6  ;;  %407 = vmatpush.bf16.msra.mxu2 %v3790_v43  ;;  %v4543_v6 = vld [vmem:[#allocation10 + $0xcc] sm:$0xf0]  ;;  %v3742_v20 = vor.u32 %v4540_v18, %v3741_v17  ;;  %v3721_v21 = vld [vmem:[#allocation10] sm:$0xf]  ;;  %v4536_v22 = vld [vmem:[#allocation10 + $0x24] sm:$0xf0] }
  0x30   :  { %v4535_v23 = vld [vmem:[#allocation10 + $0x4] sm:$0xf]  ;;  %v3722_v25 = vor.u32 %v4536_v22, %v3721_v21  ;;  %v3723_v26 = vld [vmem:[#allocation10 + $0x28] sm:$0xf0]  ;;  %v3729_v27 = vld [vmem:[#allocation10 + $0x8] sm:$0xf] }
  0x31   :  { %v5237_v8 = vsel %vm160_vm0, %v4769_v3, %v159_v7  ;;  %380 = vmatpush.bf16.msra.mxu0 %v3770_v47  ;;  %v3746_v3 = vor.u32 %v4542_v63, %v3745_v62  ;;  %v3750_v7 = vor.u32 %v4541_v2, %v3747_v4  ;;  %v4537_v28 = vld [vmem:[#allocation10 + $0x2c] sm:$0xf0]  ;;  %v3726_v30 = vor.u32 %v4535_v23, %v3723_v26  ;;  %v4746_v49 = vld [vmem:[#allocation13] ss:$0 sm:$0xff]  ;;  %v4747_v54 = vld [vmem:[#allocation13 + $0x1] ss:$0 sm:$0xff] }
  0x32   :  { %394 = vmatpush.bf16.msra.mxu1 %v3774_v51  ;;  %v3730_v31 = vor.u32 %v4537_v28, %v3729_v27  ;;  %v241_v59 = vld [vmem:[#allocation13 + $0x2] sm:$0x7]  ;;  %s5149_s20 = smov 32   ;;  %s5150_s5 = smov [#allocation14]  }
  0x33   :  { %408 = vmatpush.bf16.msra.mxu2 %v3778_v52  ;;  %v245_v2 = vperm.slane %v241_v59, 2  ;;  %s3701_s25 = sshll.u32 %s5150_s5, 4  ;;  %s3703_s28 = sshll.u32 %s5715_s8, 4  ;;  %s3702_s25 = int_to_ptr.vmem [resolvable:$true] %s3701_s25  ;;  %s3704_s28 = int_to_ptr.hbm [resolvable:$true] %s3703_s28 }
  0x35   :  { %381 = vmatpush.bf16.msra.mxu0 %v3758_v56 }
  0x36   :  { %395 = vmatpush.bf16.msra.mxu1 %v3762_v60 }
  0x37   :  { %409 = vmatpush.bf16.msra.mxu2 %v3766_v61 }
  0x39   :  { %382 = vmatpush.bf16.msra.mxu0 %v3746_v3 }
  0x3a   :  { %396 = vmatpush.bf16.msra.mxu1 %v3750_v7 }
  0x95   :  { %v152_v9 = vpop.xlane.xlu0 %151 }
  0x96   :  { %v162_v10 = vmul.f32 %v5237_v8, %v152_v9  ;;  %v3754_v9 = vor.u32 %v4543_v6, %v3753_v5  ;;  %v243_v5 = vperm.slane %v241_v59, 0 }
  0x98   :  { %v5241_v11 = vsub.f32 %v5231_v0, %v162_v10  ;;  %410 = vmatpush.bf16.msra.mxu2 %v3754_v9  ;;  %v3733_v10 = vld [vmem:[#allocation10 + $0x50] sm:$0xf] }
  0x9a   :  { %v166_v12 = vmul.f32 %v5241_v11, %v5241_v11 }
  0x9c   :  { %168 = vadd.xlane.f32.xlu1 %v166_v12  ;;  %v4539_v12 = vld [vmem:[#allocation10 + $0x74] sm:$0xf0]  ;;  %411 = vmatpush.bf16.msra.mxu2 %v3742_v20 }
  0x9d   :  { %v154_v13 = vpop.xlane.xlu0 %153 }
  0x9e   :  { %v163_v14 = vmul.f32 %v5237_v8, %v154_v13  ;;  %v4538_v13 = vld [vmem:[#allocation10 + $0x54] sm:$0xf] }
  0xa0   :  { %v5247_v15 = vsub.f32 %v5234_v1, %v163_v14  ;;  %v3734_v14 = vor.u32 %v4539_v12, %v3733_v10  ;;  %412 = vmatpush.bf16.msra.mxu2 %v3730_v31 }
  0xa2   :  { %v167_v16 = vmul.f32 %v5247_v15, %v5247_v15  ;;  %383 = vmatpush.bf16.msra.mxu0 %v3734_v14 }
  0xa4   :  { %170 = vadd.xlane.f32.xlu1 %v167_v16  ;;  %v3735_v16 = vld [vmem:[#allocation10 + $0x78] sm:$0xf0] }
  0xa5   :  { %v3738_v19 = vor.u32 %v4538_v13, %v3735_v16 }
  0xa6   :  { %384 = vmatpush.bf16.msra.mxu0 %v3722_v25 }
  0xa7   :  { %397 = vmatpush.bf16.msra.mxu1 %v3738_v19 }
  0xab   :  { %398 = vmatpush.bf16.msra.mxu1 %v3726_v30  ;;  %v5260_v30 = vld [vmem:[#allocation7] sm:$0xff] }
 0x10f   :  { %v169_v24 = vpop.xlane.xlu1 %168 }
 0x110   :  { %v172_v29 = vmul.f32 %v169_v24, %v5237_v8 }
 0x112   :  { %v174_v32 = vadd.f32 1e-06, %v172_v29 }
 0x114   :  { %4770 = vrsqrt.f32 %v174_v32  ;;  %vm182_vm2 = vweird.f32 %v174_v32 }
 0x117   :  { %v171_v33 = vpop.xlane.xlu1 %170 }
 0x118   :  { %v173_v34 = vmul.f32 %v171_v33, %v5237_v8 }
 0x11a   :  { %v4771_v35 = vpop.eup %4770  ;;  %v175_v36 = vadd.f32 1e-06, %v173_v34  ;;  %v5264_v34 = vld [vmem:[#allocation7 + $0x8] sm:$0xff] }
 0x11b   :  { %v177_v37 = vmul.f32 %v4771_v35, %v174_v32  ;;  %vm183_vm1 = vweird.f32 %v4771_v35 }
 0x11c   :  { %4772 = vrsqrt.f32 %v175_v36  ;;  %vm184_vm3 = vmor %vm182_vm2, %vm183_vm1  ;;  %vm192_vm5 = vweird.f32 %v175_v36 }
 0x11d   :  { %v178_v38 = vmul.f32 %v4771_v35, %v177_v37 }
 0x11f   :  { %v179_v39 = vmul.f32 0.5, %v178_v38 }
 0x121   :  { %v180_v40 = vsub.f32 1.5, %v179_v39 }
 0x122   :  { %v4773_v41 = vpop.eup %4772 }
 0x123   :  { %v181_v42 = vmul.f32 %v4771_v35, %v180_v40  ;;  %v187_v43 = vmul.f32 %v4773_v41, %v175_v36  ;;  %vm193_vm4 = vweird.f32 %v4773_v41 }
 0x124   :  { %vm194_vm6 = vmor %vm192_vm5, %vm193_vm4 }
 0x125   :  { %v188_v44 = vmul.f32 %v4773_v41, %v187_v43  ;;  %v185_v45 = vsel %vm184_vm3, %v4771_v35, %v181_v42 }
 0x126   :  { %v196_v48 = vmul.f32 %v185_v45, %v5241_v11  ;;  %v244_v11 = vperm.slane %v241_v59, 1 }
 0x127   :  { %v189_v46 = vmul.f32 0.5, %v188_v44 }
 0x128   :  { %v201_v53 = vmul.f32 %v4746_v49, %v196_v48 }
 0x129   :  { %v190_v47 = vsub.f32 1.5, %v189_v46 }
 0x12a   :  { %v206_v56 = vadd.f32 %v4747_v54, %v201_v53  ;;  %v3830_v53 = vld [vmem:[#allocation10 + $0xc] sm:$0xf] }
 0x12b   :  { %v191_v50 = vmul.f32 %v4773_v41, %v190_v47 }
 0x12d   :  { %v195_v51 = vsel %vm194_vm6, %v4773_v41, %v191_v50  ;;  %v3834_v50 = vld [vmem:[#allocation10 + $0x5c] sm:$0xf] }
 0x12e   :  { %v197_v52 = vmul.f32 %v195_v51, %v5247_v15  ;;  %v4560_v51 = vld [vmem:[#allocation10 + $0x80] sm:$0xf0] }
 0x130   :  { %v202_v55 = vmul.f32 %v4746_v49, %v197_v52  ;;  %v3835_v52 = vor.u32 %v4560_v51, %v3834_v50 }
 0x132   :  { %v207_v57 = vadd.f32 %v4747_v54, %v202_v55  ;;  %638 = vmatpush.bf16.msrb.mxu2 %v3835_v52  ;;  %v4559_v54 = vld [vmem:[#allocation10 + $0x30] sm:$0xf0] }
 0x133   :  { %v3831_v55 = vor.u32 %v4559_v54, %v3830_v53 }
 0x134   :  { %v208_v58 = vpack.c.bf16 %v207_v57, %v206_v56 }
 0x136   :  { %385 = vmatmul.bf16.vlgmr.msra.gmra.mxu0 %v208_v58  ;;  %399 = vmatmul.bf16.vlgmr.msra.gmra.mxu1 %v208_v58 }
 0x137   :  { %413 = vmatmul.bf16.vlgmr.msra.gmra.mxu2 %v208_v58 }
 0x138   :  { %639 = vmatpush.bf16.msrb.mxu2 %v3831_v55 }
 0x1b3   :  { %v386_v60 = vpop.f32.mrf.mxu0  ;;  %v400_v61 = vpop.f32.mrf.mxu1 }
 0x1b4   :  { %v401_v62 = vadd.f32 %v400_v61, %v244_v11  ;;  %v387_v12 = vadd.f32 %v386_v60, %v243_v5 }
 0x1b6   :  { %v437_v15 = vpack.c.bf16 %v401_v62, %v401_v62  ;;  %v435_v21 = vpack.c.bf16 %v387_v12, %v387_v12 }
 0x1b8   :  { %v448_v13 = vunpack.c.l.b16 %v437_v15  ;;  %v443_v27 = vunpack.c.l.b16 %v435_v21 }
 0x1ba   :  { %v414_v63 = vpop.f32.mrf.mxu2 }
 0x1bb   :  { %v388_v3 = vpop.f32.mrf.mxu0  ;;  %v402_v4 = vpop.f32.mrf.mxu1  ;;  %v415_v10 = vadd.f32 %v414_v63, %v245_v2 }
 0x1bc   :  { %v403_v6 = vadd.f32 %v402_v4, %v244_v11  ;;  %v389_v7 = vadd.f32 %v388_v3, %v243_v5 }
 0x1bd   :  { %v439_v19 = vpack.c.bf16 %v415_v10, %v415_v10 }
 0x1be   :  { %v438_v9 = vpack.c.bf16 %v403_v6, %v403_v6  ;;  %v436_v16 = vpack.c.bf16 %v389_v7, %v389_v7 }
 0x1bf   :  { %v498_v25 = vunpack.c.l.b16 %v439_v19 }
 0x1c0   :  { %v449_v14 = vunpack.c.l.b16 %v438_v9  ;;  %v444_v24 = vunpack.c.l.b16 %v436_v16 }
 0x1c2   :  { %v450_v17 = vpack.c.b16 %v449_v14, %v448_v13  ;;  %v416_v18 = vpop.f32.mrf.mxu2  ;;  %v445_v29 = vpack.c.b16 %v444_v24, %v443_v27 }
 0x1c3   :  { %v417_v20 = vadd.f32 %v416_v18, %v245_v2 }
 0x1c4   :  { %v456_v22 = vsel %vm451_vm7, %v450_v17, 0 }
 0x1c5   :  { %v440_v23 = vpack.c.bf16 %v417_v20, %v417_v20  ;;  %465 = vmatpush.bf16.xpose.msra.mxu3 %v456_v22 }
 0x1c7   :  { %v499_v26 = vunpack.c.l.b16 %v440_v23 }
 0x1c9   :  { %v5256_v28 = vpack.c.b16 %v499_v26, %v498_v25 }
 0x1cc   :  { %3815 = vmatmul.msk.bf16.vlgmr.msra.gmra.mxu3 %vm451_vm7, %v445_v29 }
 0x1cd   :  { %512 = vmatpush.bf16.msrb.mxu3 %v5256_v28 }
 0x24f   :  { %v467_v31 = vpop.f32.mrf.mxu3 }
 0x250   :  { %v468_v32 = vadd.f32 %v467_v31, %v5260_v30 }
 0x252   :  { %v473_v33 = vsel %vm472_vm8, %v468_v32, -inf }
 0x253   :  { %474 = vmax.xlane.f32.xlu2 %v473_v33 }
 0x257   :  { %v469_v35 = vpop.f32.mrf.mxu3 }
 0x258   :  { %v470_v36 = vadd.f32 %v469_v35, %v5264_v34 }
 0x25a   :  { %v476_v37 = vsel %vm472_vm8, %v470_v36, -inf }
 0x25b   :  { %477 = vmax.xlane.f32.xlu2 %v476_v37 }
 0x273   :  { %522 = vrot.lane.b32.xlu2 %v450_v17, %s5148_s6 }
 0x27b   :  { %648 = vrot.lane.b32.xlu2 %v450_v17, %s5137_s23 }
 0x283   :  { %646 = vrot.lane.b32.xlu2 %v445_v29, %s5137_s23 }
 0x2c6   :  { %v475_v38 = vpop.xlane.xlu2 %474 }
 0x2c7   :  { %v479_v39 = vsub.f32 %v468_v32, %v475_v38 }
 0x2c9   :  { %v481_v40 = vmul.f32 1.442695, %v479_v39 }
 0x2cb   :  { %4774 = vpow2.f32 %v481_v40 }
 0x2ce   :  { %v478_v41 = vpop.xlane.xlu2 %477 }
 0x2cf   :  { %v480_v42 = vsub.f32 %v470_v36, %v478_v41 }
 0x2d1   :  { %v4775_v43 = vpop.eup %4774  ;;  %v483_v44 = vmul.f32 1.442695, %v480_v42 }
 0x2d2   :  { %v485_v45 = vsel %vm472_vm8, %v4775_v43, 0.0 }
 0x2d3   :  { %4776 = vpow2.f32 %v483_v44  ;;  %486 = vadd.xlane.f32.xlu0 %v485_v45 }
 0x2d6   :  { %v523_v46 = vpop.permute.xlu2 %522 }
 0x2d7   :  { %v528_v47 = vsel %vm451_vm7, %v523_v46, 0 }
 0x2d8   :  { %537 = vmatpush.bf16.xpose.msra.mxu3 %v528_v47 }
 0x2d9   :  { %v4777_v48 = vpop.eup %4776 }
 0x2da   :  { %v488_v49 = vsel %vm472_vm8, %v4777_v48, 0.0 }
 0x2db   :  { %489 = vadd.xlane.f32.xlu1 %v488_v49 }
 0x2de   :  { %v649_v11 = vpop.permute.xlu2 %648 }
 0x2df   :  { %v654_v63 = vsel %vm451_vm7, %v649_v11, 0 }
 0x2e6   :  { %v647_v5 = vpop.permute.xlu2 %646 }
 0x2e7   :  { %520 = vrot.lane.b32.xlu0 %v445_v29, %s5148_s6 }
 0x2ef   :  { %745 = vrot.lane.b32.xlu0 %v445_v29, %s5149_s20 }
 0x2f4   :  { %747 = vrot.lane.b32.xlu1 %v450_v17, %s5149_s20 }
 0x346   :  { %v487_v56 = vpop.xlane.xlu0 %486 }
 0x347   :  { %4778 = vrcp.f32 %v487_v56 }
 0x34d   :  { %v4779_v58 = vpop.eup %4778 }
 0x34e   :  { %v490_v57 = vpop.xlane.xlu1 %489  ;;  %v493_v60 = vmul.f32 %v4779_v58, %v4775_v43 }
 0x34f   :  { %4780 = vrcp.f32 %v490_v57 }
 0x355   :  { %v4781_v59 = vpop.eup %4780 }
 0x356   :  { %v494_v61 = vmul.f32 %v4781_v59, %v4777_v48 }
 0x358   :  { %v495_v62 = vpack.c.bf16 %v494_v61, %v493_v60 }
 0x359   :  { %v521_v4 = vpop.permute.xlu0 %520 }
 0x35a   :  { %3816 = vmatmul.msk.bf16.vlgmr.msrb.gmra.mxu3 %vm472_vm8, %v495_v62 }
 0x35b   :  { %663 = vmatpush.bf16.xpose.msrb.mxu3 %v654_v63 }
 0x361   :  { %v746_v16 = vpop.permute.xlu0 %745 }
 0x366   :  { %v748_v2 = vpop.permute.xlu1 %747 }
 0x367   :  { %v753_v3 = vsel %vm451_vm7, %v748_v2, 0 }
 0x368   :  { %762 = vmatpush.bf16.xpose.msra.mxu2 %v753_v3 }
 0x36a   :  { %3817 = vmatmul.msk.bf16.vlgmr.msra.gmra.mxu3 %vm451_vm7, %v521_v4 }
 0x37a   :  { %3837 = vmatmul.msk.bf16.vlgmr.msrb.gmra.mxu3 %vm451_vm7, %v647_v5 }
 0x3dd   :  { %v514_v15 = vpop.f32.mrf.mxu3 }
 0x3e5   :  { %v516_v6 = vpop.f32.mrf.mxu3 }
 0x3e6   :  { %v519_v7 = vpack.c.bf16 %v516_v6, %v514_v15 }
 0x3e8   :  { %3836 = vmatmul.msk.bf16.vlgmr.msrb.gmra.mxu2 %vm451_vm7, %v519_v7  ;;  %v3825_v7 = vld [vmem:[#allocation10 + $0xfc] sm:$0xf] }
 0x3ed   :  { %v539_v9 = vpop.f32.mrf.mxu3 }
 0x3ee   :  { %v540_v10 = vadd.f32 %v539_v9, %v5260_v30  ;;  %v4562_v9 = vld [vmem:[#allocation10 + $0x120] sm:$0xf0] }
 0x3f0   :  { %v544_v12 = vsel %vm472_vm8, %v540_v10, -inf }
 0x3f1   :  { %545 = vmax.xlane.f32.xlu1 %v544_v12  ;;  %v3821_v12 = vld [vmem:[#allocation10 + $0xac] sm:$0xf] }
 0x3f5   :  { %v541_v13 = vpop.f32.mrf.mxu3 }
 0x3f6   :  { %v542_v14 = vadd.f32 %v541_v13, %v5264_v34  ;;  %v4561_v13 = vld [vmem:[#allocation10 + $0xd0] sm:$0xf0] }
 0x3f8   :  { %3848 = vmatmul.msk.bf16.vlgmr.msra.gmra.mxu2 %vm451_vm7, %v746_v16  ;;  %v547_v17 = vsel %vm472_vm8, %v542_v14, -inf }
 0x3f9   :  { %548 = vmax.xlane.f32.xlu0 %v547_v17 }
 0x3fd   :  { %v665_v18 = vpop.f32.mrf.mxu3 }
 0x3fe   :  { %v666_v19 = vadd.f32 %v665_v18, %v5260_v30 }
 0x400   :  { %v670_v20 = vsel %vm472_vm8, %v666_v19, -inf }
 0x401   :  { %671 = vmax.xlane.f32.xlu0 %v670_v20 }
 0x405   :  { %v667_v36 = vpop.f32.mrf.mxu3 }
 0x406   :  { %v668_v38 = vadd.f32 %v667_v36, %v5264_v34 }
 0x408   :  { %v673_v44 = vsel %vm472_vm8, %v668_v38, -inf }
 0x464   :  { %v546_v29 = vpop.xlane.xlu1 %545 }
 0x465   :  { %v550_v33 = vsub.f32 %v540_v10, %v546_v29  ;;  %v3826_v10 = vor.u32 %v4562_v9, %v3825_v7  ;;  %v3949_v7 = vld [vmem:[#allocation10 + $0x244] sm:$0xf]  ;;  %v4590_v9 = vld [vmem:[#allocation10 + $0x268] sm:$0xf0] }
 0x467   :  { %v552_v37 = vmul.f32 1.442695, %v550_v33  ;;  %609 = vmatpush.bf16.msrb.mxu1 %v3826_v10  ;;  %v3941_v10 = vld [vmem:[#allocation10 + $0x1f4] sm:$0xf] }
 0x46b   :  { %v5290_v21 = vpop.f32.mrf.mxu2 }
 0x46c   :  { %v549_v22 = vpop.xlane.xlu0 %548 }
 0x46d   :  { %v551_v23 = vsub.f32 %v542_v14, %v549_v22  ;;  %v3822_v14 = vor.u32 %v4561_v13, %v3821_v12  ;;  %v3950_v12 = vor.u32 %v4590_v9, %v3949_v7  ;;  %v3933_v13 = vld [vmem:[#allocation10 + $0x1a4] sm:$0xf] }
 0x46f   :  { %v554_v24 = vmul.f32 1.442695, %v551_v23  ;;  %610 = vmatpush.bf16.msrb.mxu1 %v3822_v14  ;;  %1089 = vmatpush.bf16.msrb.mxu2 %v3950_v12  ;;  %v4586_v14 = vld [vmem:[#allocation10 + $0x1c8] sm:$0xf0] }
 0x471   :  { %4782 = vpow2.f32 %v554_v24 }
 0x472   :  { %4784 = vpow2.f32 %v552_v37 }
 0x473   :  { %v5292_v25 = vpop.f32.mrf.mxu2 }
 0x474   :  { %v672_v39 = vpop.xlane.xlu0 %671 }
 0x475   :  { %v676_v42 = vsub.f32 %v666_v19, %v672_v39  ;;  %v3856_v39 = vld [vmem:[#allocation10 + $0x23c] sm:$0xf] }
 0x477   :  { %v4783_v26 = vpop.eup %4782 }
 0x478   :  { %v559_v27 = vsel %vm472_vm8, %v4783_v26, 0.0  ;;  %v4785_v45 = vpop.eup %4784 }
 0x479   :  { %560 = vadd.xlane.f32.xlu0 %v559_v27  ;;  %v556_v46 = vsel %vm472_vm8, %v4785_v45, 0.0 }
 0x47b   :  { %v764_v31 = vpop.f32.mrf.mxu2 }
 0x47c   :  { %v765_v32 = vadd.f32 %v764_v31, %v5260_v30  ;;  %v678_v30 = vmul.f32 1.442695, %v676_v42  ;;  %v3852_v42 = vld [vmem:[#allocation10 + $0x1ec] sm:$0xf] }
 0x47e   :  { %v769_v35 = vsel %vm472_vm8, %v765_v32, -inf  ;;  %4786 = vpow2.f32 %v678_v30  ;;  %v3845_v30 = vld [vmem:[#allocation10 + $0x19c] sm:$0xf] }
 0x47f   :  { %770 = vmax.xlane.f32.xlu2 %v769_v35 }
 0x483   :  { %v766_v40 = vpop.f32.mrf.mxu2 }
 0x484   :  { %v767_v41 = vadd.f32 %v766_v40, %v5264_v34  ;;  %v5302_v47 = vpop.eup %4786  ;;  %v4566_v40 = vld [vmem:[#allocation10 + $0x260] sm:$0xf0] }
 0x485   :  { %v682_v48 = vsel %vm472_vm8, %v5302_v47, 0.0 }
 0x486   :  { %v772_v43 = vsel %vm472_vm8, %v767_v41, -inf }
 0x487   :  { %773 = vmax.xlane.f32.xlu1 %v772_v43  ;;  %674 = vmax.xlane.f32.xlu2 %v673_v44  ;;  %v4565_v43 = vld [vmem:[#allocation10 + $0x210] sm:$0xf0] }
 0x488   :  { %v3853_v44 = vor.u32 %v4565_v43, %v3852_v42  ;;  %v3885_v43 = vld [vmem:[#allocation10 + $0x1f0] sm:$0xf] }
 0x48f   :  { %557 = vadd.xlane.f32.xlu1 %v556_v46 }
 0x497   :  { %683 = vadd.xlane.f32.xlu1 %v682_v48  ;;  %v4563_v48 = vld [vmem:[#allocation10 + $0x170] sm:$0xf0] }
 0x49f   :  { %567 = vrot.lane.b32.xlu2 %v5256_v28, %s5148_s6 }
 0x4ec   :  { %v561_v56 = vpop.xlane.xlu0 %560 }
 0x4f2   :  { %v771_v34 = vpop.xlane.xlu2 %770 }
 0x4f3   :  { %v775_v49 = vsub.f32 %v765_v32, %v771_v34 }
 0x4f5   :  { %v777_v50 = vmul.f32 1.442695, %v775_v49 }
 0x4f7   :  { %4788 = vpow2.f32 %v777_v50 }
 0x4fa   :  { %v774_v51 = vpop.xlane.xlu1 %773  ;;  %v675_v52 = vpop.xlane.xlu2 %674 }
 0x4fb   :  { %v677_v53 = vsub.f32 %v668_v38, %v675_v52  ;;  %v776_v57 = vsub.f32 %v767_v41, %v774_v51  ;;  %v3857_v41 = vor.u32 %v4566_v40, %v3856_v39  ;;  %v3901_v40 = vld [vmem:[#allocation10 + $0x64] sm:$0xf] }
 0x4fd   :  { %v4789_v54 = vpop.eup %4788  ;;  %v680_v55 = vmul.f32 1.442695, %v677_v53  ;;  %v779_v59 = vmul.f32 1.442695, %v776_v57 }
 0x4fe   :  { %v781_v58 = vsel %vm472_vm8, %v4789_v54, 0.0 }
 0x4ff   :  { %782 = vadd.xlane.f32.xlu1 %v781_v58  ;;  %4790 = vpow2.f32 %v680_v55 }
 0x500   :  { %4792 = vrcp.f32 %v561_v56 }
 0x502   :  { %v558_v60 = vpop.xlane.xlu1 %557  ;;  %v568_v61 = vpop.permute.xlu2 %567 }
 0x503   :  { %4794 = vrcp.f32 %v558_v60  ;;  %580 = vmatpush.bf16.msrb.mxu0 %v568_v61  ;;  %v4748_v61 = vld [vmem:[#allocation13 + $0x5] ss:$0 sm:$0xff] }
 0x504   :  { %4796 = vpow2.f32 %v779_v59 }
 0x505   :  { %v4791_v11 = vpop.eup %4790 }
 0x506   :  { %v4793_v62 = vpop.eup %4792  ;;  %v685_v63 = vsel %vm472_vm8, %v4791_v11, 0.0 }
 0x507   :  { %686 = vadd.xlane.f32.xlu0 %v685_v63  ;;  %v565_v3 = vmul.f32 %v4793_v62, %v4783_v26 }
 0x509   :  { %v4795_v2 = vpop.eup %4794 }
 0x50a   :  { %v564_v4 = vmul.f32 %v4795_v2, %v4785_v45  ;;  %v4797_v5 = vpop.eup %4796  ;;  %v684_v16 = vpop.xlane.xlu1 %683  ;;  %v4564_v45 = vld [vmem:[#allocation10 + $0x1c0] sm:$0xf0] }
 0x50b   :  { %v784_v6 = vsel %vm472_vm8, %v4797_v5, 0.0  ;;  %v3846_v46 = vor.u32 %v4564_v45, %v3845_v30  ;;  %v3893_v45 = vld [vmem:[#allocation10 + $0x14] sm:$0xf] }
 0x50c   :  { %v566_v15 = vpack.c.bf16 %v565_v3, %v564_v4 }
 0x50d   :  { %735 = vmatpush.bf16.msra.mxu1 %v3846_v46  ;;  %v4576_v46 = vld [vmem:[#allocation10 + $0x38] sm:$0xf0] }
 0x50e   :  { %3818 = vmatmul.msk.bf16.vlgmr.msrb.gmra.mxu0 %vm472_vm8, %v566_v15 }
 0x50f   :  { %785 = vadd.xlane.f32.xlu0 %v784_v6 }
 0x518   :  { %792 = vrot.lane.b32.xlu1 %v5256_v28, %s5149_s20 }
 0x523   :  { %693 = vrot.lane.b32.xlu0 %v5256_v28, %s5137_s23 }
 0x572   :  { %v783_v18 = vpop.xlane.xlu1 %782 }
 0x573   :  { %4798 = vrcp.f32 %v783_v18  ;;  %v4584_v18 = vld [vmem:[#allocation10 + $0x178] sm:$0xf0] }
 0x579   :  { %v4799_v20 = vpop.eup %4798 }
 0x57a   :  { %v687_v17 = vpop.xlane.xlu0 %686  ;;  %v789_v24 = vmul.f32 %v4799_v20, %v4789_v54 }
 0x582   :  { %v786_v19 = vpop.xlane.xlu0 %785 }
 0x583   :  { %4800 = vrcp.f32 %v786_v19 }
 0x584   :  { %4802 = vrcp.f32 %v687_v17  ;;  %v3925_v17 = vld [vmem:[#allocation10 + $0x154] sm:$0xf] }
 0x585   :  { %4804 = vrcp.f32 %v684_v16  ;;  %v3934_v16 = vor.u32 %v4586_v14, %v3933_v13  ;;  %v3926_v19 = vor.u32 %v4584_v18, %v3925_v17 }
 0x589   :  { %v4801_v22 = vpop.eup %4800 }
 0x58a   :  { %v793_v23 = vpop.permute.xlu1 %792  ;;  %v790_v28 = vmul.f32 %v4801_v22, %v4797_v5  ;;  %v4803_v29 = vpop.eup %4802 }
 0x58b   :  { %v582_v26 = vpop.f32.mrf.mxu0  ;;  %805 = vmatpush.bf16.msra.mxu3 %v793_v23  ;;  %v4805_v31 = vpop.eup %4804  ;;  %v691_v33 = vmul.f32 %v4803_v29, %v4791_v11  ;;  %v3917_v29 = vld [vmem:[#allocation10 + $0x104] sm:$0xf] }
 0x58c   :  { %v791_v27 = vpack.c.bf16 %v790_v28, %v789_v24  ;;  %v690_v36 = vmul.f32 %v4805_v31, %v5302_v47  ;;  %v3841_v47 = vld [vmem:[#allocation10 + $0x14c] sm:$0xf] }
 0x58d   :  { %v3842_v34 = vor.u32 %v4563_v48, %v3841_v47  ;;  %v4582_v31 = vld [vmem:[#allocation10 + $0x128] sm:$0xf0]  ;;  %v3894_v47 = vor.u32 %v4576_v46, %v3893_v45  ;;  %v3881_v48 = vld [vmem:[#allocation10 + $0x1a0] sm:$0xf] }
 0x58e   :  { %3849 = vmatmul.msk.bf16.vlgmr.msra.gmra.mxu3 %vm472_vm8, %v791_v27  ;;  %v692_v38 = vpack.c.bf16 %v691_v33, %v690_v36  ;;  %v3909_v33 = vld [vmem:[#allocation10 + $0xb4] sm:$0xf] }
 0x58f   :  { %736 = vmatpush.bf16.msra.mxu1 %v3842_v34  ;;  %v4572_v34 = vld [vmem:[#allocation10 + $0x1c4] sm:$0xf0] }
 0x593   :  { %v584_v32 = vpop.f32.mrf.mxu0 }
 0x594   :  { %v587_v35 = vpack.c.bf16 %v584_v32, %v582_v26  ;;  %v3918_v32 = vor.u32 %v4582_v31, %v3917_v29 }
 0x595   :  { %v694_v37 = vpop.permute.xlu0 %693 }
 0x596   :  { %3827 = vmatmul.msk.bf16.vlgmr.msrb.gmra.mxu1 %vm451_vm7, %v587_v35  ;;  %706 = vmatpush.bf16.msra.mxu0 %v694_v37  ;;  %v4580_v35 = vld [vmem:[#allocation10 + $0xd8] sm:$0xf0]  ;;  %v3889_v37 = vld [vmem:[#allocation10 + $0x240] sm:$0xf] }
 0x597   :  { %v3910_v36 = vor.u32 %v4580_v35, %v3909_v33  ;;  %v4750_v35 = vld [vmem:[#allocation13 + $0x7] ss:$0 sm:$0xff] }
 0x599   :  { %3838 = vmatmul.msk.bf16.vlgmr.msra.gmra.mxu0 %vm472_vm8, %v692_v38  ;;  %v4574_v38 = vld [vmem:[#allocation10 + $0x264] sm:$0xf0] }
 0x59a   :  { %834 = vmatpush.bf16.msrb.mxu0 %v3857_v41  ;;  %v3890_v39 = vor.u32 %v4574_v38, %v3889_v37  ;;  %v4578_v41 = vld [vmem:[#allocation10 + $0x88] sm:$0xf0] }
 0x59b   :  { %v3902_v42 = vor.u32 %v4578_v41, %v3901_v40  ;;  %v5351_v40 = vld [vmem:[#allocation13 + $0x9] sm:$0x3] }
 0x59c   :  { %973 = vmatpush.bf16.msrb.mxu1 %v3890_v39  ;;  %v1005_v41 = vperm.slane %v5351_v40, 0 }
 0x59e   :  { %835 = vmatpush.bf16.msrb.mxu0 %v3853_v44  ;;  %v4573_v44 = vld [vmem:[#allocation10 + $0x214] sm:$0xf0] }
 0x59f   :  { %v3886_v30 = vor.u32 %v4573_v44, %v3885_v43 }
 0x5a1   :  { %974 = vmatpush.bf16.msrb.mxu1 %v3886_v30 }
 0x611   :  { %v807_v49 = vpop.f32.mrf.mxu3 }
 0x613   :  { %v612_v55 = vpop.f32.mrf.mxu1 }
 0x614   :  { %v642_v57 = vadd.f32 %v5290_v21, %v612_v55 }
 0x616   :  { %v708_v50 = vpop.f32.mrf.mxu0 }
 0x619   :  { %v809_v51 = vpop.f32.mrf.mxu3 }
 0x61a   :  { %v812_v52 = vpack.c.bf16 %v809_v51, %v807_v49  ;;  %v3882_v49 = vor.u32 %v4572_v34, %v3881_v48  ;;  %v143_v51 = vld [vmem:[#allocation5 + $0x8] sm:$0xff] }
 0x61b   :  { %v614_v56 = vpop.f32.mrf.mxu1 }
 0x61c   :  { %3858 = vmatmul.msk.bf16.vlgmr.msrb.gmra.mxu0 %vm451_vm7, %v812_v52  ;;  %v644_v63 = vadd.f32 %v5292_v25, %v614_v56  ;;  %v4588_v25 = vld [vmem:[#allocation10 + $0x218] sm:$0xf0]  ;;  %975 = vmatpush.bf16.msrb.mxu1 %v3882_v49  ;;  %v3873_v56 = vld [vmem:[#allocation10 + $0x100] sm:$0xf]  ;;  %v4751_v49 = vld [vmem:[#allocation13 + $0x8] ss:$0 sm:$0xff] }
 0x61e   :  { %v710_v53 = vpop.f32.mrf.mxu0 }
 0x61f   :  { %v713_v54 = vpack.c.bf16 %v710_v53, %v708_v50  ;;  %v142_v50 = vld [vmem:[#allocation5] sm:$0xff] }
 0x620   :  { %v5344_v52 = vpack.c.bf16 %v143_v51, %v142_v50  ;;  %v3877_v53 = vld [vmem:[#allocation10 + $0x150] sm:$0xf] }
 0x621   :  { %3847 = vmatmul.msk.bf16.vlgmr.msra.gmra.mxu1 %vm451_vm7, %v713_v54  ;;  %v4571_v54 = vld [vmem:[#allocation10 + $0x174] sm:$0xf0] }
 0x622   :  { %v3878_v55 = vor.u32 %v4571_v54, %v3877_v53 }
 0x624   :  { %976 = vmatpush.bf16.msrb.mxu1 %v3878_v55 }
 0x699   :  { %v837_v58 = vpop.f32.mrf.mxu0 }
 0x69e   :  { %v738_v59 = vpop.f32.mrf.mxu1 }
 0x69f   :  { %v743_v60 = vadd.f32 %v738_v59, %v642_v57  ;;  %v4570_v57 = vld [vmem:[#allocation10 + $0x124] sm:$0xf0]  ;;  %v3869_v59 = vld [vmem:[#allocation10 + $0xb0] sm:$0xf] }
 0x6a1   :  { %v842_v11 = vadd.f32 %v837_v58, %v743_v60  ;;  %v839_v5 = vpop.f32.mrf.mxu0  ;;  %v3874_v58 = vor.u32 %v4570_v57, %v3873_v56  ;;  %v4569_v60 = vld [vmem:[#allocation10 + $0xd4] sm:$0xf0] }
 0x6a3   :  { %v848_v62 = vadd.f32 %v4748_v61, %v842_v11  ;;  %977 = vmatpush.bf16.msrb.mxu1 %v3874_v58  ;;  %v3865_v11 = vld [vmem:[#allocation10 + $0x60] sm:$0xf] }
 0x6a5   :  { %v5325_v2 = vadd.f32 %v848_v62, %v5231_v0  ;;  %v3942_v0 = vor.u32 %v4588_v25, %v3941_v10  ;;  %v4568_v62 = vld [vmem:[#allocation10 + $0x84] sm:$0xf0] }
 0x6a6   :  { %v740_v3 = vpop.f32.mrf.mxu1 }
 0x6a7   :  { %v744_v4 = vadd.f32 %v740_v3, %v644_v63  ;;  %854 = vadd.xlane.f32.xlu2 %v5325_v2  ;;  %1090 = vmatpush.bf16.msrb.mxu2 %v3942_v0  ;;  %v3866_v63 = vor.u32 %v4568_v62, %v3865_v11  ;;  %v3861_v3 = vld [vmem:[#allocation10 + $0x10] sm:$0xf]  ;;  %v5366_v62 = vld [vmem:[#allocation8 + $0x8] sm:$0xff] }
 0x6a9   :  { %v843_v15 = vadd.f32 %v839_v5, %v744_v4  ;;  %v4567_v4 = vld [vmem:[#allocation10 + $0x34] sm:$0xf0] }
 0x6ab   :  { %v849_v6 = vadd.f32 %v4748_v61, %v843_v15  ;;  %1091 = vmatpush.bf16.msrb.mxu2 %v3934_v16  ;;  %v3870_v61 = vor.u32 %v4569_v60, %v3869_v59  ;;  %v3862_v15 = vor.u32 %v4567_v4, %v3861_v3  ;;  %v5362_v59 = vld [vmem:[#allocation8] sm:$0xff] }
 0x6ad   :  { %v5329_v21 = vadd.f32 %v849_v6, %v5234_v1  ;;  %978 = vmatpush.bf16.msrb.mxu1 %v3870_v61 }
 0x6af   :  { %856 = vadd.xlane.f32.xlu0 %v5329_v21  ;;  %1092 = vmatpush.bf16.msrb.mxu2 %v3926_v19 }
 0x6b1   :  { %979 = vmatpush.bf16.msrb.mxu1 %v3866_v63 }
 0x6b3   :  { %1093 = vmatpush.bf16.msrb.mxu2 %v3918_v32 }
 0x6b5   :  { %980 = vmatpush.bf16.msrb.mxu1 %v3862_v15  ;;  %v3951_v15 = vld [vmem:[#allocation10 + $0x26c] sm:$0xf0] }
 0x6b7   :  { %1094 = vmatpush.bf16.msrb.mxu2 %v3910_v36 }
 0x6bb   :  { %1095 = vmatpush.bf16.msrb.mxu2 %v3902_v42 }
 0x6bf   :  { %1096 = vmatpush.bf16.msrb.mxu2 %v3894_v47 }
 0x6c2   :  { %1097 = vmatmul.bf16.vlgmr.msrb.gmra.mxu2 %v5344_v52 }
 0x71a   :  { %v855_v1 = vpop.xlane.xlu2 %854 }
 0x71b   :  { %v858_v20 = vmul.f32 %v855_v1, %v5237_v8 }
 0x71d   :  { %v5334_v22 = vsub.f32 %v5325_v2, %v858_v20 }
 0x71f   :  { %v862_v23 = vmul.f32 %v5334_v22, %v5334_v22 }
 0x721   :  { %864 = vadd.xlane.f32.xlu1 %v862_v23 }
 0x722   :  { %v857_v24 = vpop.xlane.xlu0 %856 }
 0x723   :  { %v859_v28 = vmul.f32 %v857_v24, %v5237_v8 }
 0x725   :  { %v5340_v26 = vsub.f32 %v5329_v21, %v859_v28 }
 0x727   :  { %v863_v27 = vmul.f32 %v5340_v26, %v5340_v26 }
 0x729   :  { %866 = vadd.xlane.f32.xlu2 %v863_v27  ;;  %v4749_v27 = vld [vmem:[#allocation13 + $0x6] ss:$0 sm:$0xff] }
 0x745   :  { %v1098_v42 = vpop.f32.mrf.mxu2 }
 0x74d   :  { %v1100_v44 = vpop.f32.mrf.mxu2 }
 0x74e   :  { %v1101_v30 = vadd.f32 %v1100_v44, %v1005_v41 }
 0x750   :  { %v1136_v46 = vpack.c.bf16 %v1101_v30, %v1101_v30 }
 0x752   :  { %v1147_v47 = vunpack.c.l.b16 %v1136_v46 }
 0x794   :  { %v865_v5 = vpop.xlane.xlu1 %864 }
 0x795   :  { %v868_v6 = vmul.f32 %v865_v5, %v5237_v8  ;;  %v4589_v5 = vld [vmem:[#allocation10 + $0x248] sm:$0xf] }
 0x797   :  { %v870_v7 = vadd.f32 1e-06, %v868_v6  ;;  %v4587_v6 = vld [vmem:[#allocation10 + $0x1f8] sm:$0xf] }
 0x799   :  { %4806 = vrsqrt.f32 %v870_v7  ;;  %vm878_vm10 = vweird.f32 %v870_v7 }
 0x79c   :  { %v867_v9 = vpop.xlane.xlu2 %866 }
 0x79d   :  { %v869_v10 = vmul.f32 %v867_v9, %v5237_v8  ;;  %v3943_v9 = vld [vmem:[#allocation10 + $0x21c] sm:$0xf0] }
 0x79f   :  { %v4807_v12 = vpop.eup %4806  ;;  %v871_v25 = vadd.f32 1e-06, %v869_v10  ;;  %v3946_v10 = vor.u32 %v4587_v6, %v3943_v9 }
 0x7a0   :  { %v873_v0 = vmul.f32 %v4807_v12, %v870_v7  ;;  %vm879_vm9 = vweird.f32 %v4807_v12  ;;  %v3954_v7 = vor.u32 %v4589_v5, %v3951_v15 }
 0x7a1   :  { %4808 = vrsqrt.f32 %v871_v25  ;;  %vm880_vm11 = vmor %vm878_vm10, %vm879_vm9  ;;  %vm888_vm13 = vweird.f32 %v871_v25 }
 0x7a2   :  { %v874_v13 = vmul.f32 %v4807_v12, %v873_v0  ;;  %1103 = vmatpush.bf16.msrb.mxu3 %v3954_v7 }
 0x7a4   :  { %v875_v14 = vmul.f32 0.5, %v874_v13  ;;  %v4583_v13 = vld [vmem:[#allocation10 + $0x158] sm:$0xf] }
 0x7a6   :  { %v876_v16 = vsub.f32 1.5, %v875_v14  ;;  %1104 = vmatpush.bf16.msrb.mxu3 %v3946_v10  ;;  %v3927_v14 = vld [vmem:[#allocation10 + $0x17c] sm:$0xf0] }
 0x7a7   :  { %v4809_v17 = vpop.eup %4808 }
 0x7a8   :  { %v877_v18 = vmul.f32 %v4807_v12, %v876_v16  ;;  %v883_v19 = vmul.f32 %v4809_v17, %v871_v25  ;;  %vm889_vm12 = vweird.f32 %v4809_v17  ;;  %v3935_v25 = vld [vmem:[#allocation10 + $0x1cc] sm:$0xf0]  ;;  %v3930_v16 = vor.u32 %v4583_v13, %v3927_v14 }
 0x7a9   :  { %vm890_vm14 = vmor %vm888_vm13, %vm889_vm12 }
 0x7aa   :  { %v884_v1 = vmul.f32 %v4809_v17, %v883_v19  ;;  %v881_v20 = vsel %vm880_vm11, %v4807_v12, %v877_v18  ;;  %v4585_v12 = vld [vmem:[#allocation10 + $0x1a8] sm:$0xf]  ;;  %v3919_v18 = vld [vmem:[#allocation10 + $0x12c] sm:$0xf0] }
 0x7ab   :  { %v892_v28 = vmul.f32 %v881_v20, %v5334_v22  ;;  %v1099_v22 = vadd.f32 %v1098_v42, %v1005_v41  ;;  %v3938_v0 = vor.u32 %v4585_v12, %v3935_v25  ;;  %v3911_v20 = vld [vmem:[#allocation10 + $0xdc] sm:$0xf0] }
 0x7ac   :  { %v885_v23 = vmul.f32 0.5, %v884_v1  ;;  %v4579_v1 = vld [vmem:[#allocation10 + $0xb8] sm:$0xf] }
 0x7ad   :  { %v897_v33 = vmul.f32 %v4749_v27, %v892_v28  ;;  %v1135_v43 = vpack.c.bf16 %v1099_v22, %v1099_v22  ;;  %1105 = vmatpush.bf16.msrb.mxu3 %v3938_v0  ;;  %v3903_v28 = vld [vmem:[#allocation10 + $0x8c] sm:$0xf0] }
 0x7ae   :  { %v886_v24 = vsub.f32 1.5, %v885_v23  ;;  %v3914_v23 = vor.u32 %v4579_v1, %v3911_v20 }
 0x7af   :  { %v902_v37 = vadd.f32 %v4750_v35, %v897_v33  ;;  %v1146_v45 = vunpack.c.l.b16 %v1135_v43 }
 0x7b0   :  { %v887_v29 = vmul.f32 %v4809_v17, %v886_v24  ;;  %v4577_v24 = vld [vmem:[#allocation10 + $0x68] sm:$0xf] }
 0x7b1   :  { %1106 = vmatpush.bf16.msrb.mxu3 %v3930_v16 }
 0x7b2   :  { %v891_v31 = vsel %vm890_vm14, %v4809_v17, %v887_v29  ;;  %v4581_v17 = vld [vmem:[#allocation10 + $0x108] sm:$0xf]  ;;  %v4575_v29 = vld [vmem:[#allocation10 + $0x18] sm:$0xf] }
 0x7b3   :  { %v893_v32 = vmul.f32 %v891_v31, %v5340_v26  ;;  %v5354_v26 = vpack.c.b16 %v1147_v47, %v1146_v45  ;;  %v3922_v19 = vor.u32 %v4581_v17, %v3919_v18  ;;  %v3895_v31 = vld [vmem:[#allocation10 + $0x3c] sm:$0xf0]  ;;  %v1006_v45 = vperm.slane %v5351_v40, 1 }
 0x7b5   :  { %v898_v36 = vmul.f32 %v4749_v27, %v893_v32  ;;  %v1153_v48 = vsel %vm451_vm7, %v5354_v26, 0  ;;  %1107 = vmatpush.bf16.msrb.mxu3 %v3922_v19  ;;  %v3906_v27 = vor.u32 %v4577_v24, %v3903_v28  ;;  %v3898_v32 = vor.u32 %v4575_v29, %v3895_v31 }
 0x7b6   :  { %1162 = vmatpush.bf16.xpose.msra.mxu0 %v1153_v48 }
 0x7b7   :  { %v903_v38 = vadd.f32 %v4750_v35, %v898_v36 }
 0x7b9   :  { %v904_v39 = vpack.c.bf16 %v903_v38, %v902_v37  ;;  %1108 = vmatpush.bf16.msrb.mxu3 %v3914_v23 }
 0x7bb   :  { %981 = vmatmul.bf16.vlgmr.msrb.gmra.mxu1 %v904_v39 }
 0x7bd   :  { %1109 = vmatpush.bf16.msrb.mxu3 %v3906_v27 }
 0x7c1   :  { %1110 = vmatpush.bf16.msrb.mxu3 %v3898_v32 }
 0x7c4   :  { %1111 = vmatmul.bf16.vlgmr.msrb.gmra.mxu3 %v5344_v52 }
 0x838   :  { %v982_v34 = vpop.f32.mrf.mxu1 }
 0x839   :  { %v983_v50 = vadd.f32 %v4751_v49, %v982_v34 }
 0x83b   :  { %v1133_v53 = vpack.c.bf16 %v983_v50, %v983_v50 }
 0x83d   :  { %v1141_v56 = vunpack.c.l.b16 %v1133_v53 }
 0x840   :  { %v984_v51 = vpop.f32.mrf.mxu1 }
 0x841   :  { %v985_v54 = vadd.f32 %v4751_v49, %v984_v51 }
 0x843   :  { %v1134_v55 = vpack.c.bf16 %v985_v54, %v985_v54 }
 0x845   :  { %v1142_v57 = vunpack.c.l.b16 %v1134_v55  ;;  %v3974_v55 = vld [vmem:[#allocation10 + $0x6c] sm:$0xf] }
 0x847   :  { %v5358_v58 = vpack.c.b16 %v1142_v57, %v1141_v56  ;;  %v1112_v46 = vpop.f32.mrf.mxu3  ;;  %v4592_v56 = vld [vmem:[#allocation10 + $0x90] sm:$0xf0]  ;;  %v3970_v57 = vld [vmem:[#allocation10 + $0x1c] sm:$0xf] }
 0x848   :  { %v1113_v47 = vadd.f32 %v1112_v46, %v1006_v45 }
 0x849   :  { %3955 = vmatmul.msk.bf16.vlgmr.msra.gmra.mxu0 %vm451_vm7, %v5358_v58 }
 0x84a   :  { %v1137_v48 = vpack.c.bf16 %v1113_v47, %v1113_v47 }
 0x84c   :  { %v1194_v50 = vunpack.c.l.b16 %v1137_v48 }
 0x84f   :  { %v1114_v34 = vpop.f32.mrf.mxu3 }
 0x850   :  { %v1115_v49 = vadd.f32 %v1114_v34, %v1006_v45 }
 0x852   :  { %v1138_v51 = vpack.c.bf16 %v1115_v49, %v1115_v49 }
 0x854   :  { %v1195_v53 = vunpack.c.l.b16 %v1138_v51 }
 0x856   :  { %v5387_v54 = vpack.c.b16 %v1195_v53, %v1194_v50 }
 0x858   :  { %1208 = vmatpush.bf16.msrb.mxu0 %v5387_v54 }
 0x8c6   :  { %v1164_v60 = vpop.f32.mrf.mxu0 }
 0x8c7   :  { %v1165_v61 = vadd.f32 %v1164_v60, %v5362_v59 }
 0x8c9   :  { %v1169_v11 = vsel %vm472_vm8, %v1165_v61, -inf }
 0x8ca   :  { %1170 = vmax.xlane.f32.xlu2 %v1169_v11 }
 0x8ce   :  { %v1166_v63 = vpop.f32.mrf.mxu0 }
 0x8cf   :  { %v1167_v3 = vadd.f32 %v1166_v63, %v5366_v62 }
 0x8d1   :  { %v1172_v4 = vsel %vm472_vm8, %v1167_v3, -inf }
 0x8d2   :  { %1173 = vmax.xlane.f32.xlu2 %v1172_v4 }
 0x8ea   :  { %1218 = vrot.lane.b32.xlu2 %v5354_v26, %s5148_s6 }
 0x8f2   :  { %1443 = vrot.lane.b32.xlu2 %v5354_v26, %s5149_s20 }
 0x93d   :  { %v1171_v33 = vpop.xlane.xlu2 %1170 }
 0x93e   :  { %v1175_v35 = vsub.f32 %v1165_v61, %v1171_v33 }
 0x940   :  { %v1177_v36 = vmul.f32 1.442695, %v1175_v35 }
 0x942   :  { %4810 = vpow2.f32 %v1177_v36 }
 0x945   :  { %v1174_v37 = vpop.xlane.xlu2 %1173 }
 0x946   :  { %v1176_v38 = vsub.f32 %v1167_v3, %v1174_v37 }
 0x948   :  { %v4811_v39 = vpop.eup %4810  ;;  %v1179_v41 = vmul.f32 1.442695, %v1176_v38 }
 0x949   :  { %v1181_v42 = vsel %vm472_vm8, %v4811_v39, 0.0 }
 0x94a   :  { %4812 = vpow2.f32 %v1179_v41  ;;  %1182 = vadd.xlane.f32.xlu0 %v1181_v42 }
 0x94d   :  { %v1219_v22 = vpop.permute.xlu2 %1218 }
 0x94e   :  { %v1224_v43 = vsel %vm451_vm7, %v1219_v22, 0 }
 0x94f   :  { %1233 = vmatpush.bf16.xpose.msra.mxu1 %v1224_v43 }
 0x950   :  { %v4813_v44 = vpop.eup %4812 }
 0x951   :  { %v1184_v30 = vsel %vm472_vm8, %v4813_v44, 0.0 }
 0x952   :  { %1185 = vadd.xlane.f32.xlu1 %v1184_v30 }
 0x955   :  { %v1444_v5 = vpop.permute.xlu2 %1443 }
 0x956   :  { %v1449_v7 = vsel %vm451_vm7, %v1444_v5, 0 }
 0x95e   :  { %1216 = vrot.lane.b32.xlu0 %v5358_v58, %s5148_s6 }
 0x966   :  { %1342 = vrot.lane.b32.xlu0 %v5358_v58, %s5137_s23 }
 0x96b   :  { %1344 = vrot.lane.b32.xlu1 %v5354_v26, %s5137_s23  ;;  %v3975_v26 = vor.u32 %v4592_v56, %v3974_v55 }
 0x96d   :  { %1334 = vmatpush.bf16.msra.mxu0 %v3975_v26 }
 0x973   :  { %1441 = vrot.lane.b32.xlu1 %v5358_v58, %s5149_s20  ;;  %v4591_v58 = vld [vmem:[#allocation10 + $0x40] sm:$0xf0] }
 0x974   :  { %v3971_v60 = vor.u32 %v4591_v58, %v3970_v57 }
 0x976   :  { %1335 = vmatpush.bf16.msra.mxu0 %v3971_v60 }
 0x9bd   :  { %v1183_v40 = vpop.xlane.xlu0 %1182 }
 0x9be   :  { %4814 = vrcp.f32 %v1183_v40 }
 0x9c4   :  { %v4815_v11 = vpop.eup %4814 }
 0x9c5   :  { %v1186_v61 = vpop.xlane.xlu1 %1185  ;;  %v1189_v3 = vmul.f32 %v4815_v11, %v4811_v39 }
 0x9c6   :  { %4816 = vrcp.f32 %v1186_v61 }
 0x9cc   :  { %v4817_v63 = vpop.eup %4816 }
 0x9cd   :  { %v1190_v4 = vmul.f32 %v4817_v63, %v4813_v44 }
 0x9cf   :  { %v1191_v15 = vpack.c.bf16 %v1190_v4, %v1189_v3 }
 0x9d0   :  { %v1217_v6 = vpop.permute.xlu0 %1216 }
 0x9d1   :  { %3956 = vmatmul.msk.bf16.vlgmr.msrb.gmra.mxu0 %vm472_vm8, %v1191_v15  ;;  %3957 = vmatmul.msk.bf16.vlgmr.msra.gmra.mxu1 %vm451_vm7, %v1217_v6 }
 0x9d2   :  { %1458 = vmatpush.bf16.xpose.msrb.mxu0 %v1449_v7 }
 0x9d8   :  { %v1343_v12 = vpop.permute.xlu0 %1342 }
 0x9dd   :  { %v1345_v9 = vpop.permute.xlu1 %1344 }
 0x9de   :  { %v1350_v10 = vsel %vm451_vm7, %v1345_v9, 0 }
 0x9df   :  { %1359 = vmatpush.bf16.xpose.msrb.mxu1 %v1350_v10 }
 0x9e5   :  { %v1442_v28 = vpop.permute.xlu1 %1441 }
 0x9e6   :  { %3977 = vmatmul.msk.bf16.vlgmr.msrb.gmra.mxu1 %vm451_vm7, %v1343_v12 }
 0xa4e   :  { %v1210_v25 = vpop.f32.mrf.mxu0  ;;  %v1235_v0 = vpop.f32.mrf.mxu1 }
 0xa4f   :  { %v1236_v13 = vadd.f32 %v1235_v0, %v5362_v59 }
 0xa51   :  { %v1240_v14 = vsel %vm472_vm8, %v1236_v13, -inf }
 0xa52   :  { %1241 = vmax.xlane.f32.xlu0 %v1240_v14 }
 0xa56   :  { %v1212_v16 = vpop.f32.mrf.mxu0  ;;  %v1237_v17 = vpop.f32.mrf.mxu1 }
 0xa57   :  { %v1215_v18 = vpack.c.bf16 %v1212_v16, %v1210_v25  ;;  %v1238_v19 = vadd.f32 %v1237_v17, %v5366_v62 }
 0xa59   :  { %3976 = vmatmul.msk.bf16.vlgmr.msra.gmra.mxu0 %vm451_vm7, %v1215_v18  ;;  %v1243_v1 = vsel %vm472_vm8, %v1238_v19, -inf  ;;  %v3965_v18 = vld [vmem:[#allocation10 + $0x10c] sm:$0xf] }
 0xa5a   :  { %1244 = vmax.xlane.f32.xlu2 %v1243_v1 }
 0xa63   :  { %v1361_v20 = vpop.f32.mrf.mxu1 }
 0xa64   :  { %v1362_v23 = vadd.f32 %v1361_v20, %v5362_v59 }
 0xa66   :  { %v1366_v24 = vsel %vm472_vm8, %v1362_v23, -inf }
 0xa67   :  { %1367 = vmax.xlane.f32.xlu1 %v1366_v24  ;;  %v3961_v24 = vld [vmem:[#allocation10 + $0xbc] sm:$0xf] }
 0xa69   :  { %3988 = vmatmul.msk.bf16.vlgmr.msrb.gmra.mxu0 %vm451_vm7, %v1442_v28  ;;  %v4593_v28 = vld [vmem:[#allocation10 + $0xe0] sm:$0xf0] }
 0xa6b   :  { %v1363_v27 = vpop.f32.mrf.mxu1 }
 0xa6c   :  { %v1364_v29 = vadd.f32 %v1363_v27, %v5366_v62 }
 0xa6e   :  { %v1369_v31 = vsel %vm472_vm8, %v1364_v29, -inf }
 0xa6f   :  { %1370 = vmax.xlane.f32.xlu0 %v1369_v31 }
 0xac5   :  { %v1242_v32 = vpop.xlane.xlu0 %1241 }
 0xac6   :  { %v1246_v33 = vsub.f32 %v1236_v13, %v1242_v32 }
 0xac8   :  { %v1248_v35 = vmul.f32 1.442695, %v1246_v33 }
 0xaca   :  { %4818 = vpow2.f32 %v1248_v35 }
 0xacd   :  { %v1245_v42 = vpop.xlane.xlu2 %1244 }
 0xace   :  { %v1247_v44 = vsub.f32 %v1238_v19, %v1245_v42  ;;  %v4594_v19 = vld [vmem:[#allocation10 + $0x130] sm:$0xf0] }
 0xacf   :  { %v3966_v20 = vor.u32 %v4594_v19, %v3965_v18 }
 0xad0   :  { %v4819_v36 = vpop.eup %4818  ;;  %v1250_v30 = vmul.f32 1.442695, %v1247_v44 }
 0xad1   :  { %v1252_v37 = vsel %vm472_vm8, %v4819_v36, 0.0  ;;  %1305 = vmatpush.bf16.msra.mxu3 %v3966_v20  ;;  %v4057_v20 = vld [vmem:[#allocation10 + $0x250] sm:$0xf] }
 0xad2   :  { %1253 = vadd.xlane.f32.xlu0 %v1252_v37 }
 0xad6   :  { %v5406_v38 = vpop.f32.mrf.mxu0 }
 0xada   :  { %v1368_v39 = vpop.xlane.xlu1 %1367 }
 0xadb   :  { %v1372_v41 = vsub.f32 %v1362_v23, %v1368_v39 }
 0xadd   :  { %v1374_v22 = vmul.f32 1.442695, %v1372_v41 }
 0xade   :  { %v5408_v43 = vpop.f32.mrf.mxu0 }
 0xadf   :  { %4820 = vpow2.f32 %v1374_v22 }
 0xae0   :  { %4822 = vpow2.f32 %v1250_v30 }
 0xae2   :  { %v1371_v46 = vpop.xlane.xlu0 %1370 }
 0xae3   :  { %v1373_v49 = vsub.f32 %v1364_v29, %v1371_v46  ;;  %v3962_v29 = vor.u32 %v4593_v28, %v3961_v24  ;;  %v3996_v46 = vld [vmem:[#allocation10 + $0x24c] sm:$0xf]  ;;  %v4613_v24 = vld [vmem:[#allocation10 + $0x254] sm:$0xf] }
 0xae5   :  { %v5410_v45 = vpop.eup %4820  ;;  %v1376_v51 = vmul.f32 1.442695, %v1373_v49  ;;  %1306 = vmatpush.bf16.msra.mxu3 %v3962_v29  ;;  %v4597_v49 = vld [vmem:[#allocation10 + $0x220] sm:$0xf0] }
 0xae6   :  { %v1460_v47 = vpop.f32.mrf.mxu0  ;;  %v1378_v48 = vsel %vm472_vm8, %v5410_v45, 0.0  ;;  %v4823_v53 = vpop.eup %4822 }
 0xae7   :  { %v1461_v34 = vadd.f32 %v1460_v47, %v5362_v59  ;;  %1379 = vadd.xlane.f32.xlu0 %v1378_v48  ;;  %4824 = vpow2.f32 %v1376_v51  ;;  %v1255_v57 = vsel %vm472_vm8, %v4823_v53, 0.0  ;;  %v4598_v47 = vld [vmem:[#allocation10 + $0x270] sm:$0xf0] }
 0xae8   :  { %v3997_v48 = vor.u32 %v4598_v47, %v3996_v46  ;;  %v4596_v51 = vld [vmem:[#allocation10 + $0x1d0] sm:$0xf0]  ;;  %v4608_v46 = vld [vmem:[#allocation10 + $0x184] sm:$0xf0]  ;;  %v4607_v47 = vld [vmem:[#allocation10 + $0x164] sm:$0xf] }
 0xae9   :  { %v1465_v50 = vsel %vm472_vm8, %v1461_v34, -inf }
 0xaea   :  { %1466 = vmax.xlane.f32.xlu2 %v1465_v50 }
 0xaed   :  { %v4825_v58 = vpop.eup %4824 }
 0xaee   :  { %v1462_v55 = vpop.f32.mrf.mxu0  ;;  %v1381_v59 = vsel %vm472_vm8, %v4825_v58, 0.0 }
 0xaef   :  { %v1463_v56 = vadd.f32 %v1462_v55, %v5366_v62  ;;  %v3981_v55 = vld [vmem:[#allocation10 + $0x15c] sm:$0xf] }
 0xaf1   :  { %v1468_v26 = vsel %vm472_vm8, %v1463_v56, -inf }
 0xaf2   :  { %1469 = vmax.xlane.f32.xlu1 %v1468_v26  ;;  %1256 = vadd.xlane.f32.xlu2 %v1255_v57 }
 0xafa   :  { %1382 = vadd.xlane.f32.xlu2 %v1381_v59 }
 0xb0b   :  { %1263 = vrot.lane.b32.xlu1 %v5387_v54, %s5148_s6 }
 0xb45   :  { %v1254_v6 = vpop.xlane.xlu0 %1253 }
 0xb5a   :  { %v1380_v14 = vpop.xlane.xlu0 %1379 }
 0xb5d   :  { %v1467_v60 = vpop.xlane.xlu2 %1466 }
 0xb5e   :  { %v1471_v40 = vsub.f32 %v1461_v34, %v1467_v60  ;;  %v3992_v34 = vld [vmem:[#allocation10 + $0x1fc] sm:$0xf] }
 0xb5f   :  { %v3993_v50 = vor.u32 %v4597_v49, %v3992_v34  ;;  %v4035_v34 = vld [vmem:[#allocation10 + $0x188] sm:$0xf0] }
 0xb60   :  { %v1473_v61 = vmul.f32 1.442695, %v1471_v40  ;;  %v4038_v49 = vor.u32 %v4607_v47, %v4035_v34 }
 0xb62   :  { %4826 = vpow2.f32 %v1473_v61 }
 0xb65   :  { %v1470_v11 = vpop.xlane.xlu1 %1469  ;;  %v1257_v5 = vpop.xlane.xlu2 %1256 }
 0xb66   :  { %v1472_v62 = vsub.f32 %v1463_v56, %v1470_v11  ;;  %v4595_v56 = vld [vmem:[#allocation10 + $0x180] sm:$0xf0] }
 0xb67   :  { %v3982_v26 = vor.u32 %v4595_v56, %v3981_v55  ;;  %v4027_v55 = vld [vmem:[#allocation10 + $0x138] sm:$0xf0] }
 0xb68   :  { %v4827_v63 = vpop.eup %4826  ;;  %v1475_v3 = vmul.f32 1.442695, %v1472_v62 }
 0xb69   :  { %v1477_v4 = vsel %vm472_vm8, %v4827_v63, 0.0 }
 0xb6a   :  { %4828 = vpow2.f32 %v1475_v3  ;;  %1478 = vadd.xlane.f32.xlu0 %v1477_v4 }
 0xb6b   :  { %4830 = vrcp.f32 %v1257_v5 }
 0xb6c   :  { %4832 = vrcp.f32 %v1254_v6 }
 0xb6d   :  { %v1383_v16 = vpop.xlane.xlu2 %1382 }
 0xb70   :  { %v4829_v15 = vpop.eup %4828 }
 0xb71   :  { %v1480_v7 = vsel %vm472_vm8, %v4829_v15, 0.0  ;;  %v4831_v9 = vpop.eup %4830 }
 0xb72   :  { %1481 = vadd.xlane.f32.xlu2 %v1480_v7  ;;  %v4833_v10 = vpop.eup %4832  ;;  %v1261_v12 = vmul.f32 %v4831_v9, %v4823_v53 }
 0xb73   :  { %v1260_v25 = vmul.f32 %v4833_v10, %v4819_v36 }
 0xb75   :  { %v1262_v13 = vpack.c.bf16 %v1261_v12, %v1260_v25 }
 0xb7d   :  { %v1264_v0 = vpop.permute.xlu1 %1263 }
 0xb7e   :  { %1276 = vmatpush.bf16.msra.mxu2 %v1264_v0  ;;  %1389 = vrot.lane.b32.xlu0 %v5387_v54, %s5137_s23 }
 0xb81   :  { %3958 = vmatmul.msk.bf16.vlgmr.msra.gmra.mxu2 %vm472_vm8, %v1262_v13 }
 0xb8a   :  { %1488 = vrot.lane.b32.xlu2 %v5387_v54, %s5149_s20 }
 0xbdd   :  { %v1479_v17 = vpop.xlane.xlu0 %1478 }
 0xbde   :  { %4834 = vrcp.f32 %v1479_v17 }
 0xbdf   :  { %4836 = vrcp.f32 %v1383_v16 }
 0xbe4   :  { %v4835_v23 = vpop.eup %4834 }
 0xbe5   :  { %v1482_v1 = vpop.xlane.xlu2 %1481  ;;  %v4837_v27 = vpop.eup %4836  ;;  %v1485_v54 = vmul.f32 %v4835_v23, %v4827_v63  ;;  %v4614_v23 = vld [vmem:[#allocation10 + $0x274] sm:$0xf0] }
 0xbe6   :  { %4838 = vrcp.f32 %v1482_v1  ;;  %v1387_v36 = vmul.f32 %v4837_v27, %v4825_v58  ;;  %v4058_v28 = vor.u32 %v4614_v23, %v4057_v20  ;;  %v4059_v27 = vld [vmem:[#allocation10 + $0x278] sm:$0xf0] }
 0xbe7   :  { %4840 = vrcp.f32 %v1380_v14  ;;  %v4062_v29 = vor.u32 %v4613_v24, %v4059_v27  ;;  %v4628_v24 = vld [vmem:[#allocation11 + $0x68] sm:$0xff] }
 0xbe9   :  { %1717 = vmatpush.bf16.msra.mxu0 %v4062_v29 }
 0xbec   :  { %v4839_v31 = vpop.eup %4838 }
 0xbed   :  { %v4841_v32 = vpop.eup %4840  ;;  %v1486_v33 = vmul.f32 %v4839_v31, %v4829_v15  ;;  %v1489_v35 = vpop.permute.xlu2 %1488  ;;  %v4752_v15 = vld [vmem:[#allocation13 + $0xb] ss:$0 sm:$0xff]  ;;  %v4049_v31 = vld [vmem:[#allocation10 + $0x200] sm:$0xf] }
 0xbee   :  { %1501 = vmatpush.bf16.msra.mxu1 %v1489_v35  ;;  %v1386_v39 = vmul.f32 %v4841_v32, %v5410_v45  ;;  %v3985_v45 = vld [vmem:[#allocation10 + $0x1ac] sm:$0xf]  ;;  %v4612_v32 = vld [vmem:[#allocation10 + $0x224] sm:$0xf0] }
 0xbef   :  { %v1487_v37 = vpack.c.bf16 %v1486_v33, %v1485_v54  ;;  %v3986_v53 = vor.u32 %v4596_v51, %v3985_v45  ;;  %v4611_v54 = vld [vmem:[#allocation10 + $0x204] sm:$0xf]  ;;  %v4050_v33 = vor.u32 %v4612_v32, %v4049_v31  ;;  %v4051_v35 = vld [vmem:[#allocation10 + $0x228] sm:$0xf0]  ;;  %v4606_v45 = vld [vmem:[#allocation10 + $0x134] sm:$0xf0] }
 0xbf0   :  { %v1390_v41 = vpop.permute.xlu0 %1389  ;;  %v1388_v42 = vpack.c.bf16 %v1387_v36, %v1386_v39  ;;  %v4054_v36 = vor.u32 %v4611_v54, %v4051_v35  ;;  %v4610_v39 = vld [vmem:[#allocation10 + $0x1d4] sm:$0xf0]  ;;  %v4605_v51 = vld [vmem:[#allocation10 + $0x114] sm:$0xf]  ;;  %v4627_v31 = vld [vmem:[#allocation11 + $0x60] sm:$0xff] }
 0xbf1   :  { %1402 = vmatpush.bf16.msrb.mxu2 %v1390_v41  ;;  %3989 = vmatmul.msk.bf16.vlgmr.msra.gmra.mxu1 %vm472_vm8, %v1487_v37  ;;  %v4041_v37 = vld [vmem:[#allocation10 + $0x1b0] sm:$0xf]  ;;  %v4609_v41 = vld [vmem:[#allocation10 + $0x1b4] sm:$0xf]  ;;  %v4030_v56 = vor.u32 %v4605_v51, %v4027_v55  ;;  %v4626_v51 = vld [vmem:[#allocation11 + $0x58] sm:$0xff] }
 0xbf2   :  { %1431 = vmatpush.bf16.msrb.mxu3 %v3986_v53  ;;  %1718 = vmatpush.bf16.msra.mxu0 %v4054_v36  ;;  %v4618_v55 = vld [vmem:[#allocation11 + $0x18] sm:$0xff] }
 0xbf4   :  { %3978 = vmatmul.msk.bf16.vlgmr.msrb.gmra.mxu2 %vm472_vm8, %v1388_v42  ;;  %v4042_v42 = vor.u32 %v4610_v39, %v4041_v37 }
 0xbf5   :  { %1530 = vmatpush.bf16.msra.mxu2 %v3997_v48 }
 0xbf6   :  { %1432 = vmatpush.bf16.msrb.mxu3 %v3982_v26  ;;  %v4017_v26 = vld [vmem:[#allocation10 + $0xc0] sm:$0xf] }
 0xbf9   :  { %1531 = vmatpush.bf16.msra.mxu2 %v3993_v50  ;;  %v4025_v50 = vld [vmem:[#allocation10 + $0x110] sm:$0xf] }
 0xbfa   :  { %v4026_v53 = vor.u32 %v4606_v45, %v4025_v50 }
 0xc04   :  { %v1278_v22 = vpop.f32.mrf.mxu2 }
 0xc0c   :  { %v1280_v44 = vpop.f32.mrf.mxu2 }
 0xc0d   :  { %v1283_v30 = vpack.c.bf16 %v1280_v44, %v1278_v22  ;;  %v4043_v22 = vld [vmem:[#allocation10 + $0x1d8] sm:$0xf0] }
 0xc0e   :  { %v4046_v44 = vor.u32 %v4609_v41, %v4043_v22  ;;  %v4753_v22 = vld [vmem:[#allocation13 + $0xc] ss:$0 sm:$0xff] }
 0xc0f   :  { %3967 = vmatmul.msk.bf16.vlgmr.msra.gmra.mxu3 %vm451_vm7, %v1283_v30  ;;  %v4033_v30 = vld [vmem:[#allocation10 + $0x160] sm:$0xf] }
 0xc10   :  { %1703 = vmatpush.bf16.msra.mxu3 %v4058_v28  ;;  %1719 = vmatpush.bf16.msra.mxu0 %v4046_v44  ;;  %v4034_v48 = vor.u32 %v4608_v46, %v4033_v30  ;;  %v4620_v28 = vld [vmem:[#allocation11 + $0x28] sm:$0xff] }
 0xc14   :  { %1704 = vmatpush.bf16.msra.mxu3 %v4050_v33  ;;  %1720 = vmatpush.bf16.msra.mxu0 %v4038_v49 }
 0xc18   :  { %1705 = vmatpush.bf16.msra.mxu3 %v4042_v42  ;;  %1721 = vmatpush.bf16.msra.mxu0 %v4030_v56  ;;  %v4624_v56 = vld [vmem:[#allocation11 + $0x48] sm:$0xff] }
 0xc1c   :  { %1706 = vmatpush.bf16.msra.mxu3 %v4034_v48  ;;  %v4754_v48 = vld [vmem:[#allocation13 + $0xd] ss:$0 sm:$0xff] }
 0xc20   :  { %1707 = vmatpush.bf16.msra.mxu3 %v4026_v53  ;;  %v4619_v53 = vld [vmem:[#allocation11 + $0x20] sm:$0xff] }
 0xc6e   :  { %v1503_v57 = vpop.f32.mrf.mxu1 }
 0xc76   :  { %v1505_v58 = vpop.f32.mrf.mxu1 }
 0xc77   :  { %v1508_v59 = vpack.c.bf16 %v1505_v58, %v1503_v57  ;;  %v1404_v60 = vpop.f32.mrf.mxu2  ;;  %v4604_v57 = vld [vmem:[#allocation10 + $0xe4] sm:$0xf0]  ;;  %v4603_v58 = vld [vmem:[#allocation10 + $0xc4] sm:$0xf] }
 0xc79   :  { %3998 = vmatmul.msk.bf16.vlgmr.msra.gmra.mxu2 %vm451_vm7, %v1508_v59  ;;  %v4018_v59 = vor.u32 %v4604_v57, %v4017_v26  ;;  %v4617_v26 = vld [vmem:[#allocation11 + $0x10] sm:$0xff]  ;;  %v4616_v57 = vld [vmem:[#allocation11 + $0x8] sm:$0xff] }
 0xc7b   :  { %1708 = vmatpush.bf16.msra.mxu3 %v4018_v59  ;;  %v1617_v59 = vld [vmem:[#allocation13 + $0xe] sm:$0x3] }
 0xc7f   :  { %v1406_v40 = vpop.f32.mrf.mxu2 }
 0xc80   :  { %v1409_v61 = vpack.c.bf16 %v1406_v40, %v1404_v60  ;;  %v4019_v60 = vld [vmem:[#allocation10 + $0xe8] sm:$0xf0] }
 0xc81   :  { %v4022_v40 = vor.u32 %v4603_v58, %v4019_v60  ;;  %v4615_v58 = vld [vmem:[#allocation11] sm:$0xff] }
 0xc82   :  { %3987 = vmatmul.msk.bf16.vlgmr.msrb.gmra.mxu3 %vm451_vm7, %v1409_v61  ;;  %v4009_v61 = vld [vmem:[#allocation10 + $0x70] sm:$0xf] }
 0xc83   :  { %1722 = vmatpush.bf16.msra.mxu0 %v4022_v40  ;;  %v1620_v40 = vperm.slane %v1617_v59, 1 }
 0xc92   :  { %v1308_v11 = vpop.f32.mrf.mxu3 }
 0xc93   :  { %v1338_v63 = vadd.f32 %v5406_v38, %v1308_v11  ;;  %v4602_v11 = vld [vmem:[#allocation10 + $0x94] sm:$0xf0] }
 0xc9a   :  { %v1310_v62 = vpop.f32.mrf.mxu3 }
 0xc9b   :  { %v1340_v9 = vadd.f32 %v5408_v43, %v1310_v62  ;;  %v4601_v62 = vld [vmem:[#allocation10 + $0x74] sm:$0xf] }
 0xcfc   :  { %v1533_v3 = vpop.f32.mrf.mxu2 }
 0xd04   :  { %v1535_v0 = vpop.f32.mrf.mxu2 }
 0xd05   :  { %v1434_v4 = vpop.f32.mrf.mxu3 }
 0xd06   :  { %v1439_v5 = vadd.f32 %v1434_v4, %v1338_v63  ;;  %v4010_v63 = vor.u32 %v4602_v11, %v4009_v61  ;;  %v4001_v4 = vld [vmem:[#allocation10 + $0x20] sm:$0xf] }
 0xd08   :  { %v1538_v6 = vadd.f32 %v1533_v3, %v1439_v5  ;;  %v4011_v3 = vld [vmem:[#allocation10 + $0x98] sm:$0xf0]  ;;  %v4600_v5 = vld [vmem:[#allocation10 + $0x44] sm:$0xf0]  ;;  %1709 = vmatpush.bf16.msra.mxu3 %v4010_v63  ;;  %v1619_v63 = vperm.slane %v1617_v59, 0 }
 0xd0a   :  { %v1544_v7 = vadd.f32 %v4752_v15, %v1538_v6  ;;  %v4014_v6 = vor.u32 %v4601_v62, %v4011_v3 }
 0xd0c   :  { %v5438_v10 = vadd.f32 %v1544_v7, %v5325_v2  ;;  %v4599_v7 = vld [vmem:[#allocation10 + $0x24] sm:$0xf]  ;;  %1723 = vmatpush.bf16.msra.mxu0 %v4014_v6 }
 0xd0d   :  { %v1436_v12 = vpop.f32.mrf.mxu3 }
 0xd0e   :  { %v1440_v25 = vadd.f32 %v1436_v12, %v1340_v9  ;;  %1550 = vadd.xlane.f32.xlu1 %v5438_v10  ;;  %v4003_v9 = vld [vmem:[#allocation10 + $0x48] sm:$0xf0] }
 0xd10   :  { %v1539_v13 = vadd.f32 %v1535_v0, %v1440_v25  ;;  %v4002_v25 = vor.u32 %v4600_v5, %v4001_v4  ;;  %v4006_v0 = vor.u32 %v4599_v7, %v4003_v9 }
 0xd12   :  { %v1545_v14 = vadd.f32 %v4752_v15, %v1539_v13  ;;  %1710 = vmatpush.bf16.msra.mxu3 %v4002_v25  ;;  %1724 = vmatpush.bf16.msra.mxu0 %v4006_v0 }
 0xd14   :  { %v5442_v38 = vadd.f32 %v1545_v14, %v5329_v21  ;;  %v4630_v14 = vld [vmem:[#allocation11 + $0x78] sm:$0xff] }
 0xd15   :  { %1883 = vmatpush.bf16.msrb.mxu2 %v4630_v14 }
 0xd16   :  { %1552 = vadd.xlane.f32.xlu0 %v5442_v38 }
 0xd81   :  { %v1551_v16 = vpop.xlane.xlu1 %1550 }
 0xd82   :  { %v1554_v17 = vmul.f32 %v1551_v16, %v5237_v8  ;;  %v4622_v16 = vld [vmem:[#allocation11 + $0x38] sm:$0xff] }
 0xd83   :  { %1869 = vmatpush.bf16.msrb.mxu1 %v4622_v16 }
 0xd84   :  { %v5447_v43 = vsub.f32 %v5438_v10, %v1554_v17 }
 0xd86   :  { %v1558_v2 = vmul.f32 %v5447_v43, %v5447_v43 }
 0xd88   :  { %1560 = vadd.xlane.f32.xlu2 %v1558_v2 }
 0xd89   :  { %v1553_v18 = vpop.xlane.xlu0 %1552 }
 0xd8a   :  { %v1555_v19 = vmul.f32 %v1553_v18, %v5237_v8  ;;  %v4629_v18 = vld [vmem:[#allocation11 + $0x70] sm:$0xff] }
 0xd8b   :  { %1884 = vmatpush.bf16.msrb.mxu2 %v4629_v18 }
 0xd8c   :  { %v5453_v1 = vsub.f32 %v5442_v38, %v1555_v19  ;;  %v4621_v19 = vld [vmem:[#allocation11 + $0x30] sm:$0xff] }
 0xd8d   :  { %1870 = vmatpush.bf16.msrb.mxu1 %v4621_v19 }
 0xd8e   :  { %v1559_v21 = vmul.f32 %v5453_v1, %v5453_v1 }
 0xd8f   :  { %1885 = vmatpush.bf16.msrb.mxu2 %v4628_v24 }
 0xd90   :  { %1562 = vadd.xlane.f32.xlu1 %v1559_v21 }
 0xd91   :  { %1871 = vmatpush.bf16.msrb.mxu1 %v4620_v28 }
 0xd93   :  { %1886 = vmatpush.bf16.msrb.mxu2 %v4627_v31 }
 0xd95   :  { %1872 = vmatpush.bf16.msrb.mxu1 %v4619_v53  ;;  %v4189_v53 = vld [vmem:[#allocation10 + $0x410] sm:$0xf] }
 0xd97   :  { %1887 = vmatpush.bf16.msrb.mxu2 %v4626_v51 }
 0xd99   :  { %1873 = vmatpush.bf16.msrb.mxu1 %v4618_v55  ;;  %v4646_v55 = vld [vmem:[#allocation10 + $0x414] sm:$0xf] }
 0xd9d   :  { %1874 = vmatpush.bf16.msrb.mxu1 %v4617_v26  ;;  %v4191_v26 = vld [vmem:[#allocation10 + $0x438] sm:$0xf0] }
 0xda1   :  { %1875 = vmatpush.bf16.msrb.mxu1 %v4616_v57  ;;  %v4648_v57 = vld [vmem:[#allocation10 + $0x43c] sm:$0xf0] }
 0xda5   :  { %1876 = vmatpush.bf16.msrb.mxu1 %v4615_v58  ;;  %v4194_v58 = vor.u32 %v4646_v55, %v4191_v26 }
 0xdfb   :  { %v1561_v15 = vpop.xlane.xlu2 %1560 }
 0xdfc   :  { %v1564_v12 = vmul.f32 %v1561_v15, %v5237_v8 }
 0xdfe   :  { %v1566_v13 = vadd.f32 1e-06, %v1564_v12 }
 0xe00   :  { %4842 = vrsqrt.f32 %v1566_v13  ;;  %vm1574_vm0 = vweird.f32 %v1566_v13 }
 0xe03   :  { %v1563_v17 = vpop.xlane.xlu1 %1562 }
 0xe04   :  { %v1565_v2 = vmul.f32 %v1563_v17, %v5237_v8 }
 0xe06   :  { %v4843_v21 = vpop.eup %4842  ;;  %v1567_v20 = vadd.f32 1e-06, %v1565_v2 }
 0xe07   :  { %v1569_v23 = vmul.f32 %v4843_v21, %v1566_v13  ;;  %vm1575_vm15 = vweird.f32 %v4843_v21  ;;  %v4755_v13 = vld [vmem:[#allocation13 + $0x10] ss:$0 sm:$0xff] }
 0xe08   :  { %4844 = vrsqrt.f32 %v1567_v20  ;;  %vm1576_vm1 = vmor %vm1574_vm0, %vm1575_vm15  ;;  %vm1584_vm3 = vweird.f32 %v1567_v20 }
 0xe09   :  { %v1570_v27 = vmul.f32 %v4843_v21, %v1569_v23 }
 0xe0b   :  { %v1571_v29 = vmul.f32 0.5, %v1570_v27 }
 0xe0d   :  { %v1572_v32 = vsub.f32 1.5, %v1571_v29 }
 0xe0e   :  { %v4845_v54 = vpop.eup %4844 }
 0xe0f   :  { %v1573_v33 = vmul.f32 %v4843_v21, %v1572_v32  ;;  %v1579_v35 = vmul.f32 %v4845_v54, %v1567_v20  ;;  %vm1585_vm2 = vweird.f32 %v4845_v54 }
 0xe10   :  { %vm1586_vm4 = vmor %vm1584_vm3, %vm1585_vm2 }
 0xe11   :  { %v1580_v36 = vmul.f32 %v4845_v54, %v1579_v35  ;;  %v1577_v37 = vsel %vm1576_vm1, %v4843_v21, %v1573_v33  ;;  %v4213_v33 = vld [vmem:[#allocation10 + $0x4b0] sm:$0xf]  ;;  %v4653_v35 = vld [vmem:[#allocation10 + $0x4d4] sm:$0xf0] }
 0xe12   :  { %v1588_v42 = vmul.f32 %v1577_v37, %v5447_v43  ;;  %v4625_v43 = vld [vmem:[#allocation11 + $0x50] sm:$0xff]  ;;  %v4214_v37 = vor.u32 %v4653_v35, %v4213_v33  ;;  %v4143_v33 = vld [vmem:[#allocation10 + $0x2f8] sm:$0xf0]  ;;  %v4149_v35 = vld [vmem:[#allocation10 + $0x2d8] sm:$0xf] }
 0xe13   :  { %v1581_v39 = vmul.f32 0.5, %v1580_v36  ;;  %1888 = vmatpush.bf16.msrb.mxu2 %v4625_v43  ;;  %v4652_v36 = vld [vmem:[#allocation10 + $0x4b4] sm:$0xf]  ;;  %v4647_v43 = vld [vmem:[#allocation10 + $0x434] sm:$0xf0] }
 0xe14   :  { %v1593_v47 = vmul.f32 %v4753_v22, %v1588_v42  ;;  %v4654_v42 = vld [vmem:[#allocation10 + $0x4dc] sm:$0xf0]  ;;  %2122 = vmatpush.bf16.msrb.mxu3 %v4214_v37 }
 0xe15   :  { %v1582_v41 = vsub.f32 1.5, %v1581_v39  ;;  %v4215_v39 = vld [vmem:[#allocation10 + $0x4d8] sm:$0xf0] }
 0xe16   :  { %v1598_v49 = vadd.f32 %v4754_v48, %v1593_v47  ;;  %v4649_v47 = vld [vmem:[#allocation10 + $0x464] sm:$0xf] }
 0xe17   :  { %v1583_v44 = vmul.f32 %v4845_v54, %v1582_v41  ;;  %1889 = vmatpush.bf16.msrb.mxu2 %v4624_v56  ;;  %v4221_v41 = vld [vmem:[#allocation10 + $0x4b8] sm:$0xf]  ;;  %v4190_v56 = vor.u32 %v4647_v43, %v4189_v53 }
 0xe19   :  { %v1587_v30 = vsel %vm1586_vm4, %v4845_v54, %v1583_v44  ;;  %v4222_v44 = vor.u32 %v4654_v42, %v4221_v41  ;;  %v4129_v42 = vld [vmem:[#allocation10 + $0x280] sm:$0xf] }
 0xe1a   :  { %v1589_v46 = vmul.f32 %v1587_v30, %v5453_v1  ;;  %v4623_v1 = vld [vmem:[#allocation11 + $0x40] sm:$0xff] }
 0xe1b   :  { %1890 = vmatpush.bf16.msrb.mxu2 %v4623_v1  ;;  %2150 = vmatpush.bf16.msra.mxu1 %v4222_v44  ;;  %v4201_v30 = vld [vmem:[#allocation10 + $0x460] sm:$0xf]  ;;  %v4197_v1 = vld [vmem:[#allocation10 + $0x418] sm:$0xf]  ;;  %v4631_v44 = vld [vmem:[#allocation10 + $0x284] sm:$0xf] }
 0xe1c   :  { %v1594_v34 = vmul.f32 %v4753_v22, %v1589_v46  ;;  %v4218_v22 = vor.u32 %v4652_v36, %v4215_v39  ;;  %v4650_v46 = vld [vmem:[#allocation10 + $0x484] sm:$0xf0]  ;;  %v4198_v59 = vor.u32 %v4648_v57, %v4197_v1  ;;  %v4636_v36 = vld [vmem:[#allocation10 + $0x2fc] sm:$0xf0] }
 0xe1d   :  { %v4150_v41 = vor.u32 %v4636_v36, %v4149_v35 }
 0xe1e   :  { %v1599_v50 = vadd.f32 %v4754_v48, %v1594_v34  ;;  %2136 = vmatpush.bf16.msrb.mxu0 %v4218_v22  ;;  %v4202_v48 = vor.u32 %v4650_v46, %v4201_v30  ;;  %v4203_v34 = vld [vmem:[#allocation10 + $0x488] sm:$0xf0]  ;;  %v4632_v22 = vld [vmem:[#allocation10 + $0x2a4] sm:$0xf0] }
 0xe1f   :  { %v4130_v46 = vor.u32 %v4632_v22, %v4129_v42 }
 0xe20   :  { %v1600_v45 = vpack.c.bf16 %v1599_v50, %v1598_v49  ;;  %v4209_v49 = vld [vmem:[#allocation10 + $0x468] sm:$0xf]  ;;  %v4651_v50 = vld [vmem:[#allocation10 + $0x48c] sm:$0xf0]  ;;  %2123 = vmatpush.bf16.msrb.mxu3 %v4202_v48 }
 0xe21   :  { %v4210_v51 = vor.u32 %v4651_v50, %v4209_v49  ;;  %v4137_v48 = vld [vmem:[#allocation10 + $0x288] sm:$0xf] }
 0xe22   :  { %1711 = vmatmul.bf16.vlgmr.msra.gmra.mxu3 %v1600_v45  ;;  %1725 = vmatmul.bf16.vlgmr.msra.gmra.mxu0 %v1600_v45  ;;  %v4206_v45 = vor.u32 %v4649_v47, %v4203_v34  ;;  %v4131_v47 = vld [vmem:[#allocation10 + $0x2a8] sm:$0xf0]  ;;  %v4633_v34 = vld [vmem:[#allocation10 + $0x2ac] sm:$0xf0] }
 0xe23   :  { %2151 = vmatpush.bf16.msra.mxu1 %v4210_v51  ;;  %v4134_v49 = vor.u32 %v4631_v44, %v4131_v47  ;;  %v4138_v50 = vor.u32 %v4633_v34, %v4137_v48 }
 0xe24   :  { %2137 = vmatpush.bf16.msrb.mxu0 %v4206_v45  ;;  %2124 = vmatpush.bf16.msrb.mxu3 %v4190_v56 }
 0xe27   :  { %2152 = vmatpush.bf16.msra.mxu1 %v4198_v59 }
 0xe28   :  { %2138 = vmatpush.bf16.msrb.mxu0 %v4194_v58 }
 0xe9f   :  { %v1726_v60 = vpop.f32.mrf.mxu0 }
 0xea0   :  { %v1727_v11 = vadd.f32 %v1726_v60, %v1620_v40  ;;  %v4177_v60 = vld [vmem:[#allocation10 + $0x3c0] sm:$0xf] }
 0xea2   :  { %v1732_v4 = vmax.f32 %v1727_v11, 0.0 }
 0xea5   :  { %v1712_v61 = vpop.f32.mrf.mxu3 }
 0xea6   :  { %v1713_v15 = vadd.f32 %v1712_v61, %v1619_v63  ;;  %v4643_v61 = vld [vmem:[#allocation10 + $0x3c4] sm:$0xf] }
 0xea7   :  { %v1728_v62 = vpop.f32.mrf.mxu0 }
 0xea8   :  { %v1729_v3 = vadd.f32 %v1728_v62, %v1620_v40  ;;  %v1731_v12 = vmax.f32 %v1713_v15, 0.0  ;;  %v4644_v40 = vld [vmem:[#allocation10 + $0x3e4] sm:$0xf0]  ;;  %v4179_v62 = vld [vmem:[#allocation10 + $0x3e8] sm:$0xf0] }
 0xea9   :  { %v4178_v11 = vor.u32 %v4644_v40, %v4177_v60  ;;  %v4165_v15 = vld [vmem:[#allocation10 + $0x370] sm:$0xf] }
 0xeaa   :  { %v1734_v5 = vmax.f32 %v1729_v3, 0.0  ;;  %v4645_v3 = vld [vmem:[#allocation10 + $0x3ec] sm:$0xf0] }
 0xeab   :  { %2125 = vmatpush.bf16.msrb.mxu3 %v4178_v11 }
 0xeac   :  { %v1736_v6 = vpack.c.bf16 %v1734_v5, %v1732_v4  ;;  %v4182_v4 = vor.u32 %v4643_v61, %v4179_v62 }
 0xead   :  { %v1714_v7 = vpop.f32.mrf.mxu3 }
 0xeae   :  { %v1715_v9 = vadd.f32 %v1714_v7, %v1619_v63  ;;  %1891 = vmatmul.bf16.vlgmr.msrb.gmra.mxu2 %v1736_v6  ;;  %v4185_v63 = vld [vmem:[#allocation10 + $0x3c8] sm:$0xf]  ;;  %2139 = vmatpush.bf16.msrb.mxu0 %v4182_v4  ;;  %v4641_v6 = vld [vmem:[#allocation10 + $0x394] sm:$0xf0]  ;;  %v4640_v7 = vld [vmem:[#allocation10 + $0x374] sm:$0xf] }
 0xeaf   :  { %v4186_v5 = vor.u32 %v4645_v3, %v4185_v63  ;;  %v4756_v3 = vld [vmem:[#allocation13 + $0x11] ss:$0 sm:$0xff] }
 0xeb0   :  { %v1733_v25 = vmax.f32 %v1715_v9, 0.0  ;;  %v4166_v9 = vor.u32 %v4641_v6, %v4165_v15 }
 0xeb1   :  { %2153 = vmatpush.bf16.msra.mxu1 %v4186_v5 }
 0xeb2   :  { %v1735_v0 = vpack.c.bf16 %v1733_v25, %v1731_v12  ;;  %v4167_v12 = vld [vmem:[#allocation10 + $0x398] sm:$0xf0]  ;;  %v4173_v25 = vld [vmem:[#allocation10 + $0x378] sm:$0xf]  ;;  %2126 = vmatpush.bf16.msrb.mxu3 %v4166_v9 }
 0xeb4   :  { %1877 = vmatmul.bf16.vlgmr.msrb.gmra.mxu1 %v1735_v0  ;;  %v4642_v0 = vld [vmem:[#allocation10 + $0x39c] sm:$0xf0] }
 0xf31   :  { %v1878_v14 = vpop.f32.mrf.mxu1  ;;  %v1892_v16 = vpop.f32.mrf.mxu2 }
 0xf32   :  { %v1879_v17 = vadd.f32 %v4755_v13, %v1878_v14  ;;  %v4174_v14 = vor.u32 %v4642_v0, %v4173_v25 }
 0xf34   :  { %v1893_v2 = vadd.f32 %v1892_v16, %v1879_v17  ;;  %2154 = vmatpush.bf16.msra.mxu1 %v4174_v14  ;;  %v4153_v16 = vld [vmem:[#allocation10 + $0x320] sm:$0xf]  ;;  %v4638_v17 = vld [vmem:[#allocation10 + $0x344] sm:$0xf0] }
 0xf36   :  { %v5462_v18 = vadd.f32 %v1893_v2, %v5438_v10  ;;  %v4637_v2 = vld [vmem:[#allocation10 + $0x324] sm:$0xf] }
 0xf38   :  { %1902 = vadd.xlane.f32.xlu1 %v5462_v18 }
 0xf39   :  { %v1880_v19 = vpop.f32.mrf.mxu1  ;;  %v1894_v20 = vpop.f32.mrf.mxu2 }
 0xf3a   :  { %v1881_v21 = vadd.f32 %v4755_v13, %v1880_v19  ;;  %v4170_v13 = vor.u32 %v4640_v7, %v4167_v12  ;;  %v4154_v19 = vor.u32 %v4638_v17, %v4153_v16  ;;  %v4757_v7 = vld [vmem:[#allocation13 + $0x12] ss:$0 sm:$0xff] }
 0xf3c   :  { %v1895_v23 = vadd.f32 %v1894_v20, %v1881_v21  ;;  %2140 = vmatpush.bf16.msrb.mxu0 %v4170_v13  ;;  %v4155_v21 = vld [vmem:[#allocation10 + $0x348] sm:$0xf0]  ;;  %v4161_v20 = vld [vmem:[#allocation10 + $0x328] sm:$0xf]  ;;  %2127 = vmatpush.bf16.msrb.mxu3 %v4154_v19  ;;  %v1986_v13 = vld [vmem:[#allocation13 + $0x13] sm:$0x7] }
 0xf3d   :  { %v1989_v16 = vperm.slane %v1986_v13, 1  ;;  %v1990_v17 = vperm.slane %v1986_v13, 2 }
 0xf3e   :  { %v5466_v24 = vadd.f32 %v1895_v23, %v5442_v38  ;;  %v4639_v23 = vld [vmem:[#allocation10 + $0x34c] sm:$0xf0] }
 0xf40   :  { %1904 = vadd.xlane.f32.xlu0 %v5466_v24 }
 0xfab   :  { %v1903_v28 = vpop.xlane.xlu1 %1902 }
 0xfac   :  { %v1906_v27 = vmul.f32 %v1903_v28, %v5237_v8  ;;  %v4158_v28 = vor.u32 %v4637_v2, %v4155_v21 }
 0xfae   :  { %v5471_v29 = vsub.f32 %v5462_v18, %v1906_v27  ;;  %v4162_v27 = vor.u32 %v4639_v23, %v4161_v20  ;;  %2141 = vmatpush.bf16.msrb.mxu0 %v4158_v28 }
 0xfb0   :  { %v1910_v10 = vmul.f32 %v5471_v29, %v5471_v29  ;;  %2155 = vmatpush.bf16.msra.mxu1 %v4162_v27 }
 0xfb2   :  { %1912 = vadd.xlane.f32.xlu1 %v1910_v10  ;;  %v4141_v10 = vld [vmem:[#allocation10 + $0x2d0] sm:$0xf] }
 0xfb3   :  { %v1905_v31 = vpop.xlane.xlu0 %1904 }
 0xfb4   :  { %v1907_v32 = vmul.f32 %v1905_v31, %v5237_v8  ;;  %v4635_v31 = vld [vmem:[#allocation10 + $0x2f4] sm:$0xf0]  ;;  %2156 = vmatpush.bf16.msra.mxu1 %v4150_v41 }
 0xfb6   :  { %v5477_v54 = vsub.f32 %v5466_v24, %v1907_v32  ;;  %v4634_v32 = vld [vmem:[#allocation10 + $0x2d4] sm:$0xf] }
 0xfb7   :  { %v4146_v39 = vor.u32 %v4634_v32, %v4143_v33 }
 0xfb8   :  { %v1911_v38 = vmul.f32 %v5477_v54, %v5477_v54  ;;  %2157 = vmatpush.bf16.msra.mxu1 %v4138_v50 }
 0xfb9   :  { %2142 = vmatpush.bf16.msrb.mxu0 %v4146_v39 }
 0xfba   :  { %1914 = vadd.xlane.f32.xlu2 %v1911_v38  ;;  %v4142_v38 = vor.u32 %v4635_v31, %v4141_v10 }
 0xfbc   :  { %2128 = vmatpush.bf16.msrb.mxu3 %v4142_v38 }
 0xfbd   :  { %2143 = vmatpush.bf16.msrb.mxu0 %v4134_v49 }
 0xfc0   :  { %2129 = vmatpush.bf16.msrb.mxu3 %v4130_v46 }
0x1025   :  { %v1913_v37 = vpop.xlane.xlu1 %1912 }
0x1026   :  { %v1916_v30 = vmul.f32 %v1913_v37, %v5237_v8 }
0x1028   :  { %v1918_v45 = vadd.f32 1e-06, %v1916_v30 }
0x102a   :  { %4846 = vrsqrt.f32 %v1918_v45  ;;  %vm1926_vm6 = vweird.f32 %v1918_v45 }
0x102d   :  { %v1915_v51 = vpop.xlane.xlu2 %1914 }
0x102e   :  { %v1917_v53 = vmul.f32 %v1915_v51, %v5237_v8 }
0x1030   :  { %v4847_v43 = vpop.eup %4846  ;;  %v1919_v55 = vadd.f32 1e-06, %v1917_v53 }
0x1031   :  { %v1921_v56 = vmul.f32 %v4847_v43, %v1918_v45  ;;  %vm1927_vm5 = vweird.f32 %v4847_v43  ;;  %v5490_v45 = vld [vmem:[#allocation7] sm:$0xff] }
0x1032   :  { %4848 = vrsqrt.f32 %v1919_v55  ;;  %vm1928_vm9 = vmor %vm1926_vm6, %vm1927_vm5  ;;  %vm1936_vm11 = vweird.f32 %v1919_v55 }
0x1033   :  { %v1922_v26 = vmul.f32 %v4847_v43, %v1921_v56 }
0x1035   :  { %v1923_v1 = vmul.f32 0.5, %v1922_v26 }
0x1037   :  { %v1924_v57 = vsub.f32 1.5, %v1923_v1 }
0x1038   :  { %v4849_v58 = vpop.eup %4848 }
0x1039   :  { %v1925_v59 = vmul.f32 %v4847_v43, %v1924_v57  ;;  %v1931_v60 = vmul.f32 %v4849_v58, %v1919_v55  ;;  %vm1937_vm10 = vweird.f32 %v4849_v58  ;;  %v5494_v55 = vld [vmem:[#allocation7 + $0x8] sm:$0xff] }
0x103a   :  { %vm1938_vm12 = vmor %vm1936_vm11, %vm1937_vm10 }
0x103b   :  { %v1932_v40 = vmul.f32 %v4849_v58, %v1931_v60  ;;  %v1929_v61 = vsel %vm1928_vm9, %v4847_v43, %v1925_v59 }
0x103c   :  { %v1940_v63 = vmul.f32 %v1929_v61, %v5471_v29 }
0x103d   :  { %v1933_v11 = vmul.f32 0.5, %v1932_v40 }
0x103e   :  { %v1945_v6 = vmul.f32 %v4756_v3, %v1940_v63 }
0x103f   :  { %v1934_v62 = vsub.f32 1.5, %v1933_v11 }
0x1040   :  { %v1950_v12 = vadd.f32 %v4757_v7, %v1945_v6 }
0x1041   :  { %v1935_v4 = vmul.f32 %v4849_v58, %v1934_v62 }
0x1043   :  { %v1939_v5 = vsel %vm1938_vm12, %v4849_v58, %v1935_v4 }
0x1044   :  { %v1941_v15 = vmul.f32 %v1939_v5, %v5477_v54  ;;  %v1988_v54 = vperm.slane %v1986_v13, 0  ;;  %v4242_v5 = vld [vmem:[#allocation10 + $0x2dc] sm:$0xf] }
0x1046   :  { %v1946_v9 = vmul.f32 %v4756_v3, %v1941_v15  ;;  %v4656_v15 = vld [vmem:[#allocation10 + $0x300] sm:$0xf0] }
0x1047   :  { %v4243_v6 = vor.u32 %v4656_v15, %v4242_v5 }
0x1048   :  { %v1951_v25 = vadd.f32 %v4757_v7, %v1946_v9  ;;  %v4238_v7 = vld [vmem:[#allocation10 + $0x28c] sm:$0xf]  ;;  %v4655_v9 = vld [vmem:[#allocation10 + $0x2b0] sm:$0xf0] }
0x104a   :  { %v1952_v0 = vpack.c.bf16 %v1951_v25, %v1950_v12  ;;  %v4239_v12 = vor.u32 %v4655_v9, %v4238_v7 }
0x104c   :  { %2130 = vmatmul.bf16.vlgmr.msrb.gmra.mxu3 %v1952_v0  ;;  %2144 = vmatmul.bf16.vlgmr.msrb.gmra.mxu0 %v1952_v0 }
0x104d   :  { %2158 = vmatmul.bf16.vlgmr.msra.gmra.mxu1 %v1952_v0 }
0x10c9   :  { %v2145_v14 = vpop.f32.mrf.mxu0 }
0x10ca   :  { %v2159_v29 = vpop.f32.mrf.mxu1  ;;  %v2146_v2 = vadd.f32 %v2145_v14, %v1989_v16 }
0x10cb   :  { %v2160_v21 = vadd.f32 %v2159_v29, %v1990_v17 }
0x10cc   :  { %v2182_v23 = vpack.c.bf16 %v2146_v2, %v2146_v2 }
0x10cd   :  { %v2184_v31 = vpack.c.bf16 %v2160_v21, %v2160_v21 }
0x10ce   :  { %v2193_v33 = vunpack.c.l.b16 %v2182_v23 }
0x10cf   :  { %v2131_v19 = vpop.f32.mrf.mxu3  ;;  %v2241_v41 = vunpack.c.l.b16 %v2184_v31 }
0x10d0   :  { %v2132_v35 = vadd.f32 %v2131_v19, %v1988_v54 }
0x10d1   :  { %v2147_v20 = vpop.f32.mrf.mxu0 }
0x10d2   :  { %v2148_v28 = vadd.f32 %v2147_v20, %v1989_v16  ;;  %v2161_v27 = vpop.f32.mrf.mxu1  ;;  %v2180_v44 = vpack.c.bf16 %v2132_v35, %v2132_v35 }
0x10d3   :  { %v2162_v10 = vadd.f32 %v2161_v27, %v1990_v17 }
0x10d4   :  { %v2183_v32 = vpack.c.bf16 %v2148_v28, %v2148_v28  ;;  %v2188_v34 = vunpack.c.l.b16 %v2180_v44 }
0x10d5   :  { %v2185_v38 = vpack.c.bf16 %v2162_v10, %v2162_v10 }
0x10d6   :  { %v2194_v36 = vunpack.c.l.b16 %v2183_v32 }
0x10d7   :  { %v2242_v37 = vunpack.c.l.b16 %v2185_v38  ;;  %v2133_v39 = vpop.f32.mrf.mxu3 }
0x10d8   :  { %v2195_v42 = vpack.c.b16 %v2194_v36, %v2193_v33  ;;  %v2134_v22 = vadd.f32 %v2133_v39, %v1988_v54 }
0x10d9   :  { %v5485_v30 = vpack.c.b16 %v2242_v37, %v2241_v41 }
0x10da   :  { %v2181_v46 = vpack.c.bf16 %v2134_v22, %v2134_v22  ;;  %v2200_v47 = vsel %vm451_vm7, %v2195_v42, 0 }
0x10db   :  { %2209 = vmatpush.bf16.xpose.msra.mxu2 %v2200_v47 }
0x10dc   :  { %v2189_v48 = vunpack.c.l.b16 %v2181_v46 }
0x10de   :  { %v2190_v49 = vpack.c.b16 %v2189_v48, %v2188_v34 }
0x10e2   :  { %4223 = vmatmul.msk.bf16.vlgmr.msra.gmra.mxu2 %vm451_vm7, %v2190_v49 }
0x10e3   :  { %2255 = vmatpush.bf16.msrb.mxu2 %v5485_v30 }
0x10e7   :  { %2381 = vmatpush.bf16.msra.mxu2 %v4243_v6 }
0x10eb   :  { %2382 = vmatpush.bf16.msra.mxu2 %v4239_v12 }
0x1165   :  { %v2211_v50 = vpop.f32.mrf.mxu2 }
0x1166   :  { %v2212_v51 = vadd.f32 %v5490_v45, %v2211_v50 }
0x1168   :  { %v2216_v53 = vsel %vm472_vm8, %v2212_v51, -inf }
0x1169   :  { %2217 = vmax.xlane.f32.xlu0 %v2216_v53 }
0x116d   :  { %v2213_v43 = vpop.f32.mrf.mxu2 }
0x116e   :  { %v2214_v56 = vadd.f32 %v5494_v55, %v2213_v43 }
0x1170   :  { %v2219_v26 = vsel %vm472_vm8, %v2214_v56, -inf }
0x1171   :  { %2220 = vmax.xlane.f32.xlu1 %v2219_v26 }
0x118a   :  { %2265 = vrot.lane.b32.xlu1 %v2195_v42, %s5148_s6 }
0x1192   :  { %2389 = vrot.lane.b32.xlu1 %v2190_v49, %s5137_s23 }
0x11dc   :  { %v2218_v1 = vpop.xlane.xlu0 %2217 }
0x11dd   :  { %v2222_v57 = vsub.f32 %v2212_v51, %v2218_v1 }
0x11df   :  { %v2224_v58 = vmul.f32 1.442695, %v2222_v57 }
0x11e1   :  { %4850 = vpow2.f32 %v2224_v58 }
0x11e4   :  { %v2221_v59 = vpop.xlane.xlu1 %2220 }
0x11e5   :  { %v2223_v60 = vsub.f32 %v2214_v56, %v2221_v59 }
0x11e7   :  { %v4851_v40 = vpop.eup %4850  ;;  %v2226_v61 = vmul.f32 1.442695, %v2223_v60 }
0x11e8   :  { %v2228_v11 = vsel %vm472_vm8, %v4851_v40, 0.0 }
0x11e9   :  { %4852 = vpow2.f32 %v2226_v61  ;;  %2229 = vadd.xlane.f32.xlu2 %v2228_v11 }
0x11ef   :  { %v4853_v62 = vpop.eup %4852 }
0x11f0   :  { %v2231_v63 = vsel %vm472_vm8, %v4853_v62, 0.0 }
0x11f1   :  { %2232 = vadd.xlane.f32.xlu0 %v2231_v63 }
0x11fc   :  { %v2266_v3 = vpop.permute.xlu1 %2265 }
0x11fd   :  { %v2271_v4 = vsel %vm451_vm7, %v2266_v3, 0 }
0x11fe   :  { %2280 = vmatpush.bf16.xpose.msra.mxu3 %v2271_v4 }
0x1201   :  { %2263 = vrot.lane.b32.xlu2 %v2190_v49, %s5148_s6 }
0x1204   :  { %v2390_v54 = vpop.permute.xlu1 %2389 }
0x1205   :  { %2490 = vrot.lane.b32.xlu0 %v2195_v42, %s5149_s20 }
0x1209   :  { %2488 = vrot.lane.b32.xlu2 %v2190_v49, %s5149_s20 }
0x120d   :  { %2391 = vrot.lane.b32.xlu0 %v2195_v42, %s5137_s23 }
0x125c   :  { %v2230_v25 = vpop.xlane.xlu2 %2229 }
0x125d   :  { %4854 = vrcp.f32 %v2230_v25 }
0x1263   :  { %v4855_v14 = vpop.eup %4854 }
0x1264   :  { %v2264_v0 = vpop.permute.xlu2 %2263  ;;  %v2233_v13 = vpop.xlane.xlu0 %2232  ;;  %v2236_v29 = vmul.f32 %v4855_v14, %v4851_v40 }
0x1265   :  { %4856 = vrcp.f32 %v2233_v13  ;;  %4225 = vmatmul.msk.bf16.vlgmr.msra.gmra.mxu3 %vm451_vm7, %v2264_v0 }
0x126b   :  { %v4857_v16 = vpop.eup %4856 }
0x126c   :  { %v2237_v17 = vmul.f32 %v4857_v16, %v4853_v62  ;;  %v2489_v41 = vpop.permute.xlu2 %2488 }
0x126e   :  { %v2238_v2 = vpack.c.bf16 %v2237_v17, %v2236_v29 }
0x1270   :  { %4224 = vmatmul.msk.bf16.vlgmr.msrb.gmra.mxu2 %vm472_vm8, %v2238_v2 }
0x1277   :  { %v2491_v19 = vpop.permute.xlu0 %2490 }
0x1278   :  { %v2496_v21 = vsel %vm451_vm7, %v2491_v19, 0 }
0x1279   :  { %2505 = vmatpush.bf16.xpose.msrb.mxu2 %v2496_v21 }
0x127f   :  { %v2392_v20 = vpop.permute.xlu0 %2391 }
0x1280   :  { %v2397_v23 = vsel %vm451_vm7, %v2392_v20, 0 }
0x1281   :  { %2406 = vmatpush.bf16.xpose.msrb.mxu3 %v2397_v23 }
0x1288   :  { %4245 = vmatmul.msk.bf16.vlgmr.msrb.gmra.mxu3 %vm451_vm7, %v2390_v54 }
0x12e8   :  { %v2282_v28 = vpop.f32.mrf.mxu3 }
0x12e9   :  { %v2283_v27 = vadd.f32 %v5490_v45, %v2282_v28 }
0x12eb   :  { %v2287_v10 = vsel %vm472_vm8, %v2283_v27, -inf }
0x12ec   :  { %2288 = vmax.xlane.f32.xlu0 %v2287_v10 }
0x12f0   :  { %v2284_v31 = vpop.f32.mrf.mxu3 }
0x12f1   :  { %v2285_v32 = vadd.f32 %v5494_v55, %v2284_v31 }
0x12f3   :  { %v2257_v38 = vpop.f32.mrf.mxu2  ;;  %v2290_v33 = vsel %vm472_vm8, %v2285_v32, -inf }
0x12f4   :  { %2291 = vmax.xlane.f32.xlu2 %v2290_v33  ;;  %v4658_v33 = vld [vmem:[#allocation10 + $0x3a0] sm:$0xf0] }
0x12fb   :  { %v2259_v35 = vpop.f32.mrf.mxu2 }
0x12fc   :  { %v2262_v36 = vpack.c.bf16 %v2259_v35, %v2257_v38  ;;  %v4233_v38 = vld [vmem:[#allocation10 + $0x37c] sm:$0xf] }
0x12fd   :  { %v4234_v35 = vor.u32 %v4658_v33, %v4233_v38  ;;  %v4686_v38 = vld [vmem:[#allocation10 + $0x4e8] sm:$0xf0]  ;;  %v4349_v33 = vld [vmem:[#allocation10 + $0x474] sm:$0xf] }
0x12fe   :  { %4244 = vmatmul.msk.bf16.vlgmr.msra.gmra.mxu2 %vm451_vm7, %v2262_v36  ;;  %v4229_v36 = vld [vmem:[#allocation10 + $0x32c] sm:$0xf] }
0x12ff   :  { %2352 = vmatpush.bf16.msrb.mxu1 %v4234_v35 }
0x130b   :  { %v2408_v37 = vpop.f32.mrf.mxu3 }
0x130c   :  { %v2409_v39 = vadd.f32 %v5490_v45, %v2408_v37  ;;  %v4657_v37 = vld [vmem:[#allocation10 + $0x350] sm:$0xf0] }
0x130e   :  { %4256 = vmatmul.msk.bf16.vlgmr.msrb.gmra.mxu2 %vm451_vm7, %v2489_v41  ;;  %v2413_v42 = vsel %vm472_vm8, %v2409_v39, -inf  ;;  %v4230_v41 = vor.u32 %v4657_v37, %v4229_v36  ;;  %v4341_v36 = vld [vmem:[#allocation10 + $0x424] sm:$0xf]  ;;  %v4682_v37 = vld [vmem:[#allocation10 + $0x448] sm:$0xf0] }
0x130f   :  { %2414 = vmax.xlane.f32.xlu0 %v2413_v42 }
0x1310   :  { %2353 = vmatpush.bf16.msrb.mxu1 %v4230_v41  ;;  %v4333_v41 = vld [vmem:[#allocation10 + $0x3d4] sm:$0xf] }
0x1313   :  { %v2410_v26 = vpop.f32.mrf.mxu3 }
0x1314   :  { %v2411_v57 = vadd.f32 %v5494_v55, %v2410_v26 }
0x1316   :  { %v2416_v11 = vsel %vm472_vm8, %v2411_v57, -inf }
0x135f   :  { %v2289_v50 = vpop.xlane.xlu0 %2288 }
0x1360   :  { %v2293_v43 = vsub.f32 %v2283_v27, %v2289_v50 }
0x1362   :  { %v2295_v1 = vmul.f32 1.442695, %v2293_v43 }
0x1367   :  { %v2292_v22 = vpop.xlane.xlu2 %2291 }
0x1368   :  { %v2294_v44 = vsub.f32 %v2285_v32, %v2292_v22 }
0x136a   :  { %v2297_v46 = vmul.f32 1.442695, %v2294_v44 }
0x136c   :  { %4858 = vpow2.f32 %v2297_v46 }
0x136d   :  { %4860 = vpow2.f32 %v2295_v1 }
0x1372   :  { %v4859_v47 = vpop.eup %4858 }
0x1373   :  { %v2302_v48 = vsel %vm472_vm8, %v4859_v47, 0.0  ;;  %v4861_v62 = vpop.eup %4860 }
0x1374   :  { %2303 = vadd.xlane.f32.xlu0 %v2302_v48  ;;  %v2299_v63 = vsel %vm472_vm8, %v4861_v62, 0.0 }
0x1381   :  { %v5521_v34 = vpop.f32.mrf.mxu2 }
0x1382   :  { %v2415_v58 = vpop.xlane.xlu0 %2414 }
0x1383   :  { %v2419_v40 = vsub.f32 %v2409_v39, %v2415_v58 }
0x1389   :  { %v5523_v49 = vpop.f32.mrf.mxu2 }
0x1391   :  { %v2507_v51 = vpop.f32.mrf.mxu2 }
0x1392   :  { %v2508_v53 = vadd.f32 %v5490_v45, %v2507_v51  ;;  %v2421_v45 = vmul.f32 1.442695, %v2419_v40 }
0x1394   :  { %v2512_v56 = vsel %vm472_vm8, %v2508_v53, -inf  ;;  %4862 = vpow2.f32 %v2421_v45 }
0x1395   :  { %2513 = vmax.xlane.f32.xlu1 %v2512_v56 }
0x1399   :  { %v2509_v59 = vpop.f32.mrf.mxu2 }
0x139a   :  { %v2510_v60 = vadd.f32 %v5494_v55, %v2509_v59  ;;  %v5532_v3 = vpop.eup %4862  ;;  %v4264_v59 = vld [vmem:[#allocation10 + $0x4bc] sm:$0xf] }
0x139b   :  { %v2425_v4 = vsel %vm472_vm8, %v5532_v3, 0.0 }
0x139c   :  { %v2515_v61 = vsel %vm472_vm8, %v2510_v60, -inf }
0x139d   :  { %2516 = vmax.xlane.f32.xlu2 %v2515_v61  ;;  %2417 = vmax.xlane.f32.xlu1 %v2416_v11  ;;  %v4260_v61 = vld [vmem:[#allocation10 + $0x46c] sm:$0xf]  ;;  %v4661_v11 = vld [vmem:[#allocation10 + $0x490] sm:$0xf0] }
0x139e   :  { %v4261_v45 = vor.u32 %v4661_v11, %v4260_v61  ;;  %v4674_v61 = vld [vmem:[#allocation10 + $0x308] sm:$0xf0] }
0x13a5   :  { %2300 = vadd.xlane.f32.xlu2 %v2299_v63  ;;  %v4660_v63 = vld [vmem:[#allocation10 + $0x440] sm:$0xf0] }
0x13ad   :  { %2426 = vadd.xlane.f32.xlu2 %v2425_v4 }
0x13b6   :  { %2310 = vrot.lane.b32.xlu1 %v5485_v30, %s5148_s6 }
0x13e7   :  { %v2304_v17 = vpop.xlane.xlu0 %2303 }
0x1408   :  { %v2514_v55 = vpop.xlane.xlu1 %2513 }
0x1409   :  { %v2518_v5 = vsub.f32 %v2508_v53, %v2514_v55  ;;  %v4659_v55 = vld [vmem:[#allocation10 + $0x3f0] sm:$0xf0] }
0x140b   :  { %v2520_v15 = vmul.f32 1.442695, %v2518_v5 }
0x140d   :  { %4864 = vpow2.f32 %v2520_v15 }
0x1410   :  { %v2517_v6 = vpop.xlane.xlu2 %2516  ;;  %v2418_v7 = vpop.xlane.xlu1 %2417 }
0x1411   :  { %v2420_v9 = vsub.f32 %v2411_v57, %v2418_v7  ;;  %v2519_v0 = vsub.f32 %v2510_v60, %v2517_v6  ;;  %v4662_v60 = vld [vmem:[#allocation10 + $0x4e0] sm:$0xf0] }
0x1412   :  { %v4265_v40 = vor.u32 %v4662_v60, %v4264_v59  ;;  %v4670_v59 = vld [vmem:[#allocation10 + $0x4e4] sm:$0xf0] }
0x1413   :  { %v4865_v12 = vpop.eup %4864  ;;  %v2423_v25 = vmul.f32 1.442695, %v2420_v9  ;;  %v2522_v14 = vmul.f32 1.442695, %v2519_v0 }
0x1414   :  { %v2524_v13 = vsel %vm472_vm8, %v4865_v12, 0.0 }
0x1415   :  { %2525 = vadd.xlane.f32.xlu2 %v2524_v13  ;;  %4866 = vpow2.f32 %v2423_v25 }
0x1416   :  { %4868 = vpow2.f32 %v2522_v14 }
0x1418   :  { %v2301_v16 = vpop.xlane.xlu2 %2300 }
0x1419   :  { %4870 = vrcp.f32 %v2301_v16 }
0x141a   :  { %4872 = vrcp.f32 %v2304_v17 }
0x141b   :  { %v4867_v29 = vpop.eup %4866 }
0x141c   :  { %v2428_v2 = vsel %vm472_vm8, %v4867_v29, 0.0  ;;  %v4869_v19 = vpop.eup %4868 }
0x141d   :  { %2429 = vadd.xlane.f32.xlu0 %v2428_v2  ;;  %v2527_v23 = vsel %vm472_vm8, %v4869_v19, 0.0  ;;  %v4758_v2 = vld [vmem:[#allocation13 + $0x16] ss:$0 sm:$0xff] }
0x141f   :  { %v4871_v21 = vpop.eup %4870 }
0x1420   :  { %v4873_v20 = vpop.eup %4872  ;;  %v2307_v54 = vmul.f32 %v4871_v21, %v4861_v62  ;;  %v2427_v31 = vpop.xlane.xlu2 %2426  ;;  %v4253_v62 = vld [vmem:[#allocation10 + $0x41c] sm:$0xf] }
0x1421   :  { %v2308_v28 = vmul.f32 %v4873_v20, %v4859_v47  ;;  %v4254_v4 = vor.u32 %v4660_v63, %v4253_v62  ;;  %v4669_v62 = vld [vmem:[#allocation10 + $0x494] sm:$0xf0] }
0x1423   :  { %v2309_v10 = vpack.c.bf16 %v2308_v28, %v2307_v54  ;;  %2478 = vmatpush.bf16.msra.mxu1 %v4254_v4  ;;  %v4301_v4 = vld [vmem:[#allocation10 + $0x294] sm:$0xf] }
0x1425   :  { %2528 = vadd.xlane.f32.xlu0 %v2527_v23 }
0x1428   :  { %v2311_v27 = vpop.permute.xlu1 %2310 }
0x1429   :  { %2323 = vmatpush.bf16.msra.mxu0 %v2311_v27 }
0x142c   :  { %4226 = vmatmul.msk.bf16.vlgmr.msra.gmra.mxu0 %vm472_vm8, %v2309_v10 }
0x142d   :  { %2535 = vrot.lane.b32.xlu2 %v5485_v30, %s5149_s20 }
0x1439   :  { %2436 = vrot.lane.b32.xlu0 %v5485_v30, %s5137_s23 }
0x1488   :  { %v2526_v32 = vpop.xlane.xlu2 %2525 }
0x1489   :  { %4874 = vrcp.f32 %v2526_v32  ;;  %v4357_v32 = vld [vmem:[#allocation10 + $0x4c4] sm:$0xf] }
0x148a   :  { %v4358_v35 = vor.u32 %v4686_v38, %v4357_v32 }
0x148c   :  { %2832 = vmatpush.bf16.msra.mxu2 %v4358_v35 }
0x148f   :  { %v4875_v44 = vpop.eup %4874 }
0x1490   :  { %v2536_v39 = vpop.permute.xlu2 %2535  ;;  %v2430_v42 = vpop.xlane.xlu0 %2429  ;;  %v2532_v47 = vmul.f32 %v4875_v44, %v4865_v12 }
0x1491   :  { %2548 = vmatpush.bf16.msra.mxu3 %v2536_v39  ;;  %v4342_v39 = vor.u32 %v4682_v37, %v4341_v36 }
0x1498   :  { %v2529_v22 = vpop.xlane.xlu0 %2528 }
0x1499   :  { %4876 = vrcp.f32 %v2529_v22 }
0x149a   :  { %4878 = vrcp.f32 %v2430_v42  ;;  %v4680_v42 = vld [vmem:[#allocation10 + $0x3f8] sm:$0xf0] }
0x149b   :  { %4880 = vrcp.f32 %v2427_v31  ;;  %v4334_v22 = vor.u32 %v4680_v42, %v4333_v41 }
0x149f   :  { %v4877_v46 = vpop.eup %4876 }
0x14a0   :  { %v2533_v30 = vmul.f32 %v4877_v46, %v4869_v19  ;;  %v4879_v50 = vpop.eup %4878 }
0x14a1   :  { %v4881_v51 = vpop.eup %4880  ;;  %v2434_v43 = vmul.f32 %v4879_v50, %v4867_v29 }
0x14a2   :  { %v2534_v48 = vpack.c.bf16 %v2533_v30, %v2532_v47  ;;  %v2433_v56 = vmul.f32 %v4881_v51, %v5532_v3  ;;  %v4249_v3 = vld [vmem:[#allocation10 + $0x3cc] sm:$0xf] }
0x14a3   :  { %v4250_v5 = vor.u32 %v4659_v55, %v4249_v3  ;;  %v4672_v3 = vld [vmem:[#allocation10 + $0x2b8] sm:$0xf0] }
0x14a4   :  { %4257 = vmatmul.msk.bf16.vlgmr.msra.gmra.mxu3 %vm472_vm8, %v2534_v48  ;;  %v2435_v1 = vpack.c.bf16 %v2434_v43, %v2433_v56  ;;  %v4678_v43 = vld [vmem:[#allocation10 + $0x3a8] sm:$0xf0]  ;;  %v4302_v55 = vor.u32 %v4672_v3, %v4301_v4 }
0x14a5   :  { %2479 = vmatpush.bf16.msra.mxu1 %v4250_v5  ;;  %v4289_v5 = vld [vmem:[#allocation10 + $0x420] sm:$0xf] }
0x14a9   :  { %v2325_v53 = vpop.f32.mrf.mxu0 }
0x14ab   :  { %v2437_v26 = vpop.permute.xlu0 %2436 }
0x14ac   :  { %2449 = vmatpush.bf16.msrb.mxu0 %v2437_v26  ;;  %v4317_v26 = vld [vmem:[#allocation10 + $0x334] sm:$0xf] }
0x14af   :  { %4246 = vmatmul.msk.bf16.vlgmr.msrb.gmra.mxu0 %vm472_vm8, %v2435_v1  ;;  %v4676_v1 = vld [vmem:[#allocation10 + $0x358] sm:$0xf0] }
0x14b0   :  { %2577 = vmatpush.bf16.msra.mxu0 %v4265_v40  ;;  %v4309_v40 = vld [vmem:[#allocation10 + $0x2e4] sm:$0xf] }
0x14b1   :  { %v2327_v57 = vpop.f32.mrf.mxu0  ;;  %v4310_v11 = vor.u32 %v4674_v61, %v4309_v40 }
0x14b2   :  { %v2330_v58 = vpack.c.bf16 %v2327_v57, %v2325_v53  ;;  %v4325_v53 = vld [vmem:[#allocation10 + $0x384] sm:$0xf]  ;;  %v4318_v57 = vor.u32 %v4676_v1, %v4317_v26 }
0x14b3   :  { %v4326_v56 = vor.u32 %v4678_v43, %v4325_v53 }
0x14b4   :  { %4235 = vmatmul.msk.bf16.vlgmr.msrb.gmra.mxu1 %vm451_vm7, %v2330_v58  ;;  %2578 = vmatpush.bf16.msra.mxu0 %v4261_v45  ;;  %v4297_v58 = vld [vmem:[#allocation10 + $0x4c0] sm:$0xf]  ;;  %v4293_v45 = vld [vmem:[#allocation10 + $0x470] sm:$0xf] }
0x14b5   :  { %v4298_v60 = vor.u32 %v4670_v59, %v4297_v58  ;;  %v4294_v63 = vor.u32 %v4669_v62, %v4293_v45  ;;  %v5579_v59 = vld [vmem:[#allocation13 + $0x1a] sm:$0x3] }
0x14b7   :  { %2716 = vmatpush.bf16.msrb.mxu1 %v4298_v60  ;;  %v2748_v60 = vperm.slane %v5579_v59, 0 }
0x14bb   :  { %2717 = vmatpush.bf16.msrb.mxu1 %v4294_v63 }
0x1527   :  { %v2550_v15 = vpop.f32.mrf.mxu3 }
0x152c   :  { %v2451_v6 = vpop.f32.mrf.mxu0 }
0x152f   :  { %v2552_v7 = vpop.f32.mrf.mxu3 }
0x1530   :  { %v2555_v9 = vpack.c.bf16 %v2552_v7, %v2550_v15  ;;  %v4668_v15 = vld [vmem:[#allocation10 + $0x444] sm:$0xf0]  ;;  %v4285_v7 = vld [vmem:[#allocation10 + $0x3d0] sm:$0xf] }
0x1531   :  { %v2355_v0 = vpop.f32.mrf.mxu1 }
0x1532   :  { %4266 = vmatmul.msk.bf16.vlgmr.msra.gmra.mxu0 %vm451_vm7, %v2555_v9  ;;  %v2385_v14 = vadd.f32 %v5521_v34, %v2355_v0  ;;  %v4667_v9 = vld [vmem:[#allocation10 + $0x3f4] sm:$0xf0]  ;;  %v4666_v0 = vld [vmem:[#allocation10 + $0x3a4] sm:$0xf0] }
0x1534   :  { %v2453_v12 = vpop.f32.mrf.mxu0 }
0x1535   :  { %v2456_v25 = vpack.c.bf16 %v2453_v12, %v2451_v6  ;;  %v4290_v6 = vor.u32 %v4668_v15, %v4289_v5  ;;  %v4286_v12 = vor.u32 %v4667_v9, %v4285_v7  ;;  %v4761_v5 = vld [vmem:[#allocation13 + $0x19] ss:$0 sm:$0xff] }
0x1537   :  { %4255 = vmatmul.msk.bf16.vlgmr.msra.gmra.mxu1 %vm451_vm7, %v2456_v25  ;;  %v4281_v25 = vld [vmem:[#allocation10 + $0x380] sm:$0xf] }
0x1538   :  { %2718 = vmatpush.bf16.msrb.mxu1 %v4290_v6 }
0x1539   :  { %v2357_v13 = vpop.f32.mrf.mxu1 }
0x153a   :  { %v2387_v20 = vadd.f32 %v5523_v49, %v2357_v13  ;;  %v4684_v49 = vld [vmem:[#allocation10 + $0x498] sm:$0xf0]  ;;  %v4282_v13 = vor.u32 %v4666_v0, %v4281_v25 }
0x153c   :  { %2719 = vmatpush.bf16.msrb.mxu1 %v4286_v12 }
0x1540   :  { %2720 = vmatpush.bf16.msrb.mxu1 %v4282_v13 }
0x15af   :  { %v2580_v16 = vpop.f32.mrf.mxu0 }
0x15b4   :  { %v2481_v29 = vpop.f32.mrf.mxu1 }
0x15b5   :  { %v2486_v17 = vadd.f32 %v2481_v29, %v2385_v14  ;;  %v4277_v14 = vld [vmem:[#allocation10 + $0x330] sm:$0xf] }
0x15b7   :  { %v2585_v19 = vadd.f32 %v2580_v16, %v2486_v17  ;;  %v2582_v27 = vpop.f32.mrf.mxu0  ;;  %v4665_v16 = vld [vmem:[#allocation10 + $0x354] sm:$0xf0]  ;;  %v4273_v17 = vld [vmem:[#allocation10 + $0x2e0] sm:$0xf] }
0x15b8   :  { %v4278_v29 = vor.u32 %v4665_v16, %v4277_v14  ;;  %v5590_v16 = vld [vmem:[#allocation8] sm:$0xff] }
0x15b9   :  { %v2591_v21 = vadd.f32 %v4758_v2, %v2585_v19 }
0x15ba   :  { %2721 = vmatpush.bf16.msrb.mxu1 %v4278_v29 }
0x15bb   :  { %v5555_v23 = vadd.f32 %v2591_v21, %v5462_v18  ;;  %v4350_v18 = vor.u32 %v4684_v49, %v4349_v33  ;;  %v4269_v21 = vld [vmem:[#allocation10 + $0x290] sm:$0xf] }
0x15bc   :  { %v2483_v54 = vpop.f32.mrf.mxu1 }
0x15bd   :  { %v2487_v28 = vadd.f32 %v2483_v54, %v2387_v20  ;;  %2597 = vadd.xlane.f32.xlu1 %v5555_v23  ;;  %2833 = vmatpush.bf16.msra.mxu2 %v4350_v18  ;;  %v4663_v20 = vld [vmem:[#allocation10 + $0x2b4] sm:$0xf0] }
0x15bf   :  { %v2586_v10 = vadd.f32 %v2582_v27, %v2487_v28  ;;  %v4270_v28 = vor.u32 %v4663_v20, %v4269_v21 }
0x15c1   :  { %v2592_v31 = vadd.f32 %v4758_v2, %v2586_v10  ;;  %2834 = vmatpush.bf16.msra.mxu2 %v4342_v39  ;;  %v4664_v2 = vld [vmem:[#allocation10 + $0x304] sm:$0xf0] }
0x15c2   :  { %v4274_v19 = vor.u32 %v4664_v2, %v4273_v17 }
0x15c3   :  { %v5559_v34 = vadd.f32 %v2592_v31, %v5466_v24 }
0x15c4   :  { %2722 = vmatpush.bf16.msrb.mxu1 %v4274_v19  ;;  %v5594_v19 = vld [vmem:[#allocation8 + $0x8] sm:$0xff] }
0x15c5   :  { %2599 = vadd.xlane.f32.xlu0 %v5559_v34  ;;  %2835 = vmatpush.bf16.msra.mxu2 %v4334_v22 }
0x15c8   :  { %2723 = vmatpush.bf16.msrb.mxu1 %v4270_v28  ;;  %v4359_v28 = vld [vmem:[#allocation10 + $0x4ec] sm:$0xf0] }
0x15c9   :  { %2836 = vmatpush.bf16.msra.mxu2 %v4326_v56  ;;  %v4760_v56 = vld [vmem:[#allocation13 + $0x18] ss:$0 sm:$0xff] }
0x15cd   :  { %2837 = vmatpush.bf16.msra.mxu2 %v4318_v57 }
0x15d1   :  { %2838 = vmatpush.bf16.msra.mxu2 %v4310_v11 }
0x15d5   :  { %2839 = vmatpush.bf16.msra.mxu2 %v4302_v55 }
0x15d8   :  { %2840 = vmatmul.bf16.vlgmr.msra.gmra.mxu2 %v5344_v52 }
0x1630   :  { %v2598_v24 = vpop.xlane.xlu1 %2597 }
0x1631   :  { %v2601_v44 = vmul.f32 %v2598_v24, %v5237_v8 }
0x1633   :  { %v5564_v46 = vsub.f32 %v5555_v23, %v2601_v44 }
0x1635   :  { %v2605_v47 = vmul.f32 %v5564_v46, %v5564_v46 }
0x1637   :  { %2607 = vadd.xlane.f32.xlu2 %v2605_v47 }
0x1638   :  { %v2600_v30 = vpop.xlane.xlu0 %2599 }
0x1639   :  { %v2602_v48 = vmul.f32 %v2600_v30, %v5237_v8  ;;  %v4759_v30 = vld [vmem:[#allocation13 + $0x17] ss:$0 sm:$0xff] }
0x163b   :  { %v5570_v50 = vsub.f32 %v5559_v34, %v2602_v48 }
0x163d   :  { %v2606_v51 = vmul.f32 %v5570_v50, %v5570_v50 }
0x163f   :  { %2609 = vadd.xlane.f32.xlu1 %v2606_v51 }
0x165b   :  { %v2841_v40 = vpop.f32.mrf.mxu2 }
0x1663   :  { %v2843_v11 = vpop.f32.mrf.mxu2 }
0x1664   :  { %v2844_v45 = vadd.f32 %v2843_v11, %v2748_v60 }
0x1666   :  { %v2879_v63 = vpack.c.bf16 %v2844_v45, %v2844_v45 }
0x1668   :  { %v2890_v4 = vunpack.c.l.b16 %v2879_v63 }
0x16aa   :  { %v2608_v54 = vpop.xlane.xlu2 %2607 }
0x16ab   :  { %v2611_v27 = vmul.f32 %v2608_v54, %v5237_v8  ;;  %v4685_v54 = vld [vmem:[#allocation10 + $0x4c8] sm:$0xf] }
0x16ad   :  { %v2613_v10 = vadd.f32 1e-06, %v2611_v27  ;;  %v4683_v27 = vld [vmem:[#allocation10 + $0x478] sm:$0xf] }
0x16af   :  { %4882 = vrsqrt.f32 %v2613_v10  ;;  %vm2621_vm14 = vweird.f32 %v2613_v10 }
0x16b2   :  { %v2610_v31 = vpop.xlane.xlu1 %2609 }
0x16b3   :  { %v2612_v32 = vmul.f32 %v2610_v31, %v5237_v8  ;;  %v4351_v31 = vld [vmem:[#allocation10 + $0x49c] sm:$0xf0] }
0x16b5   :  { %v4883_v38 = vpop.eup %4882  ;;  %v2614_v33 = vadd.f32 1e-06, %v2612_v32  ;;  %v4354_v32 = vor.u32 %v4683_v27, %v4351_v31 }
0x16b6   :  { %v2616_v35 = vmul.f32 %v4883_v38, %v2613_v10  ;;  %vm2622_vm13 = vweird.f32 %v4883_v38  ;;  %v4362_v10 = vor.u32 %v4685_v54, %v4359_v28 }
0x16b7   :  { %4884 = vrsqrt.f32 %v2614_v33  ;;  %vm2623_vm15 = vmor %vm2621_vm14, %vm2622_vm13  ;;  %vm2631_vm1 = vweird.f32 %v2614_v33 }
0x16b8   :  { %v2617_v49 = vmul.f32 %v4883_v38, %v2616_v35  ;;  %2846 = vmatpush.bf16.msrb.mxu3 %v4362_v10 }
0x16ba   :  { %v2618_v18 = vmul.f32 0.5, %v2617_v49  ;;  %v4679_v49 = vld [vmem:[#allocation10 + $0x3d8] sm:$0xf] }
0x16bc   :  { %v2619_v36 = vsub.f32 1.5, %v2618_v18  ;;  %2847 = vmatpush.bf16.msrb.mxu3 %v4354_v32  ;;  %v4335_v18 = vld [vmem:[#allocation10 + $0x3fc] sm:$0xf0] }
0x16bd   :  { %v4885_v37 = vpop.eup %4884 }
0x16be   :  { %v2620_v39 = vmul.f32 %v4883_v38, %v2619_v36  ;;  %v2626_v41 = vmul.f32 %v4885_v37, %v2614_v33  ;;  %vm2632_vm0 = vweird.f32 %v4885_v37  ;;  %v4343_v33 = vld [vmem:[#allocation10 + $0x44c] sm:$0xf0]  ;;  %v4338_v36 = vor.u32 %v4679_v49, %v4335_v18 }
0x16bf   :  { %vm2633_vm2 = vmor %vm2631_vm1, %vm2632_vm0 }
0x16c0   :  { %v2627_v42 = vmul.f32 %v4885_v37, %v2626_v41  ;;  %v2624_v22 = vsel %vm2623_vm15, %v4883_v38, %v2620_v39  ;;  %v4681_v38 = vld [vmem:[#allocation10 + $0x428] sm:$0xf]  ;;  %v4327_v39 = vld [vmem:[#allocation10 + $0x3ac] sm:$0xf0] }
0x16c1   :  { %v2635_v47 = vmul.f32 %v2624_v22, %v5564_v46  ;;  %v2842_v46 = vadd.f32 %v2841_v40, %v2748_v60  ;;  %v4346_v35 = vor.u32 %v4681_v38, %v4343_v33  ;;  %v4319_v22 = vld [vmem:[#allocation10 + $0x35c] sm:$0xf0] }
0x16c2   :  { %v2628_v24 = vmul.f32 0.5, %v2627_v42  ;;  %v4675_v42 = vld [vmem:[#allocation10 + $0x338] sm:$0xf] }
0x16c3   :  { %v2640_v43 = vmul.f32 %v4759_v30, %v2635_v47  ;;  %v2878_v61 = vpack.c.bf16 %v2842_v46, %v2842_v46  ;;  %2848 = vmatpush.bf16.msrb.mxu3 %v4346_v35  ;;  %v4311_v47 = vld [vmem:[#allocation10 + $0x30c] sm:$0xf0] }
0x16c4   :  { %v2629_v44 = vsub.f32 1.5, %v2628_v24  ;;  %v4322_v24 = vor.u32 %v4675_v42, %v4319_v22 }
0x16c5   :  { %v2645_v1 = vadd.f32 %v4760_v56, %v2640_v43  ;;  %v2889_v62 = vunpack.c.l.b16 %v2878_v61 }
0x16c6   :  { %v2630_v48 = vmul.f32 %v4885_v37, %v2629_v44  ;;  %v4673_v44 = vld [vmem:[#allocation10 + $0x2e8] sm:$0xf] }
0x16c7   :  { %2849 = vmatpush.bf16.msrb.mxu3 %v4338_v36 }
0x16c8   :  { %v2634_v51 = vsel %vm2633_vm2, %v4885_v37, %v2630_v48  ;;  %v4677_v37 = vld [vmem:[#allocation10 + $0x388] sm:$0xf]  ;;  %v4671_v48 = vld [vmem:[#allocation10 + $0x298] sm:$0xf] }
0x16c9   :  { %v2636_v53 = vmul.f32 %v2634_v51, %v5570_v50  ;;  %v5582_v50 = vpack.c.b16 %v2890_v4, %v2889_v62  ;;  %v4330_v41 = vor.u32 %v4677_v37, %v4327_v39  ;;  %v4303_v51 = vld [vmem:[#allocation10 + $0x2bc] sm:$0xf0] }
0x16cb   :  { %v2641_v26 = vmul.f32 %v4759_v30, %v2636_v53  ;;  %v2896_v3 = vsel %vm451_vm7, %v5582_v50, 0  ;;  %2850 = vmatpush.bf16.msrb.mxu3 %v4330_v41  ;;  %v4314_v30 = vor.u32 %v4673_v44, %v4311_v47  ;;  %v4306_v53 = vor.u32 %v4671_v48, %v4303_v51 }
0x16cc   :  { %2905 = vmatpush.bf16.xpose.msrb.mxu0 %v2896_v3 }
0x16cd   :  { %v2646_v57 = vadd.f32 %v4760_v56, %v2641_v26 }
0x16cf   :  { %v2647_v58 = vpack.c.bf16 %v2646_v57, %v2645_v1  ;;  %2851 = vmatpush.bf16.msrb.mxu3 %v4322_v24 }
0x16d1   :  { %2724 = vmatmul.bf16.vlgmr.msrb.gmra.mxu1 %v2647_v58 }
0x16d3   :  { %2852 = vmatpush.bf16.msrb.mxu3 %v4314_v30 }
0x16d7   :  { %2853 = vmatpush.bf16.msrb.mxu3 %v4306_v53 }
0x16da   :  { %2854 = vmatmul.bf16.vlgmr.msrb.gmra.mxu3 %v5344_v52  ;;  %v2749_v52 = vperm.slane %v5579_v59, 1 }
0x174e   :  { %v2725_v55 = vpop.f32.mrf.mxu1 }
0x174f   :  { %v2726_v15 = vadd.f32 %v4761_v5, %v2725_v55 }
0x1751   :  { %v2876_v7 = vpack.c.bf16 %v2726_v15, %v2726_v15 }
0x1753   :  { %v2884_v25 = vunpack.c.l.b16 %v2876_v7 }
0x1756   :  { %v2727_v6 = vpop.f32.mrf.mxu1 }
0x1757   :  { %v2728_v9 = vadd.f32 %v4761_v5, %v2727_v6 }
0x1759   :  { %v2877_v12 = vpack.c.bf16 %v2728_v9, %v2728_v9  ;;  %v4382_v9 = vld [vmem:[#allocation10 + $0x2ec] sm:$0xf] }
0x175b   :  { %v2885_v0 = vunpack.c.l.b16 %v2877_v12  ;;  %v4688_v12 = vld [vmem:[#allocation10 + $0x310] sm:$0xf0] }
0x175d   :  { %v5586_v13 = vpack.c.b16 %v2885_v0, %v2884_v25  ;;  %v2855_v62 = vpop.f32.mrf.mxu3  ;;  %v4378_v25 = vld [vmem:[#allocation10 + $0x29c] sm:$0xf]  ;;  %v4687_v0 = vld [vmem:[#allocation10 + $0x2c0] sm:$0xf0] }
0x175e   :  { %v2856_v63 = vadd.f32 %v2855_v62, %v2749_v52 }
0x175f   :  { %4363 = vmatmul.msk.bf16.vlgmr.msrb.gmra.mxu0 %vm451_vm7, %v5586_v13 }
0x1760   :  { %v2880_v4 = vpack.c.bf16 %v2856_v63, %v2856_v63 }
0x1762   :  { %v2937_v5 = vunpack.c.l.b16 %v2880_v4 }
0x1765   :  { %v2857_v3 = vpop.f32.mrf.mxu3 }
0x1766   :  { %v2858_v55 = vadd.f32 %v2857_v3, %v2749_v52 }
0x1768   :  { %v2881_v15 = vpack.c.bf16 %v2858_v55, %v2858_v55 }
0x176a   :  { %v2938_v6 = vunpack.c.l.b16 %v2881_v15 }
0x176c   :  { %v5615_v7 = vpack.c.b16 %v2938_v6, %v2937_v5 }
0x176e   :  { %2951 = vmatpush.bf16.msra.mxu0 %v5615_v7 }
0x17dc   :  { %v2907_v14 = vpop.f32.mrf.mxu0 }
0x17dd   :  { %v2908_v29 = vadd.f32 %v5590_v16, %v2907_v14 }
0x17df   :  { %v2912_v17 = vsel %vm472_vm8, %v2908_v29, -inf }
0x17e0   :  { %2913 = vmax.xlane.f32.xlu1 %v2912_v17 }
0x17e4   :  { %v2909_v2 = vpop.f32.mrf.mxu0 }
0x17e5   :  { %v2910_v21 = vadd.f32 %v5594_v19, %v2909_v2 }
0x17e7   :  { %v2915_v20 = vsel %vm472_vm8, %v2910_v21, -inf }
0x17e8   :  { %2916 = vmax.xlane.f32.xlu1 %v2915_v20 }
0x1801   :  { %2961 = vrot.lane.b32.xlu1 %v5582_v50, %s5148_s6 }
0x1809   :  { %3186 = vrot.lane.b32.xlu1 %v5582_v50, %s5149_s20 }
0x1853   :  { %v2914_v43 = vpop.xlane.xlu1 %2913 }
0x1854   :  { %v2918_v56 = vsub.f32 %v2908_v29, %v2914_v43 }
0x1856   :  { %v2920_v26 = vmul.f32 1.442695, %v2918_v56 }
0x1858   :  { %4886 = vpow2.f32 %v2920_v26 }
0x185b   :  { %v2917_v1 = vpop.xlane.xlu1 %2916 }
0x185c   :  { %v2919_v57 = vsub.f32 %v2910_v21, %v2917_v1 }
0x185e   :  { %v4887_v58 = vpop.eup %4886  ;;  %v2922_v60 = vmul.f32 1.442695, %v2919_v57 }
0x185f   :  { %v2924_v40 = vsel %vm472_vm8, %v4887_v58, 0.0 }
0x1860   :  { %4888 = vpow2.f32 %v2922_v60  ;;  %2925 = vadd.xlane.f32.xlu0 %v2924_v40 }
0x1866   :  { %v4889_v46 = vpop.eup %4888 }
0x1867   :  { %v2927_v61 = vsel %vm472_vm8, %v4889_v46, 0.0 }
0x1868   :  { %2928 = vadd.xlane.f32.xlu2 %v2927_v61 }
0x1873   :  { %v2962_v11 = vpop.permute.xlu1 %2961 }
0x1874   :  { %v2967_v45 = vsel %vm451_vm7, %v2962_v11, 0  ;;  %2959 = vrot.lane.b32.xlu0 %v5586_v13, %s5148_s6 }
0x1875   :  { %2976 = vmatpush.bf16.xpose.msra.mxu1 %v2967_v45 }
0x187b   :  { %v3187_v54 = vpop.permute.xlu1 %3186 }
0x187c   :  { %3085 = vrot.lane.b32.xlu0 %v5586_v13, %s5137_s23  ;;  %v3192_v31 = vsel %vm451_vm7, %v3187_v54, 0 }
0x1880   :  { %3087 = vrot.lane.b32.xlu2 %v5582_v50, %s5137_s23  ;;  %v4383_v50 = vor.u32 %v4688_v12, %v4382_v9 }
0x1882   :  { %3077 = vmatpush.bf16.msrb.mxu0 %v4383_v50 }
0x1888   :  { %3184 = vrot.lane.b32.xlu2 %v5586_v13, %s5149_s20  ;;  %v4379_v13 = vor.u32 %v4687_v0, %v4378_v25 }
0x188a   :  { %3078 = vmatpush.bf16.msrb.mxu0 %v4379_v13 }
0x18d3   :  { %v2926_v59 = vpop.xlane.xlu0 %2925 }
0x18d4   :  { %4890 = vrcp.f32 %v2926_v59 }
0x18da   :  { %v4891_v29 = vpop.eup %4890 }
0x18db   :  { %v2929_v14 = vpop.xlane.xlu2 %2928  ;;  %v2932_v2 = vmul.f32 %v4891_v29, %v4887_v58 }
0x18dc   :  { %4892 = vrcp.f32 %v2929_v14 }
0x18e2   :  { %v4893_v17 = vpop.eup %4892 }
0x18e3   :  { %v2933_v21 = vmul.f32 %v4893_v17, %v4889_v46  ;;  %v3088_v20 = vpop.permute.xlu2 %3087 }
0x18e4   :  { %v3093_v28 = vsel %vm451_vm7, %v3088_v20, 0 }
0x18e5   :  { %v2934_v27 = vpack.c.bf16 %v2933_v21, %v2932_v2  ;;  %3102 = vmatpush.bf16.xpose.msrb.mxu1 %v3093_v28 }
0x18e6   :  { %v2960_v10 = vpop.permute.xlu0 %2959 }
0x18e7   :  { %4364 = vmatmul.msk.bf16.vlgmr.msra.gmra.mxu0 %vm472_vm8, %v2934_v27  ;;  %4365 = vmatmul.msk.bf16.vlgmr.msra.gmra.mxu1 %vm451_vm7, %v2960_v10 }
0x18e8   :  { %3201 = vmatpush.bf16.xpose.msra.mxu0 %v3192_v31 }
0x18eb   :  { %v3185_v30 = vpop.permute.xlu2 %3184 }
0x18ee   :  { %v3086_v32 = vpop.permute.xlu0 %3085 }
0x18f7   :  { %4385 = vmatmul.msk.bf16.vlgmr.msrb.gmra.mxu1 %vm451_vm7, %v3086_v32 }
0x1964   :  { %v2953_v38 = vpop.f32.mrf.mxu0  ;;  %v2978_v33 = vpop.f32.mrf.mxu1 }
0x1965   :  { %v2979_v35 = vadd.f32 %v5590_v16, %v2978_v33 }
0x1967   :  { %v2983_v49 = vsel %vm472_vm8, %v2979_v35, -inf }
0x1968   :  { %2984 = vmax.xlane.f32.xlu0 %v2983_v49  ;;  %v4690_v49 = vld [vmem:[#allocation10 + $0x3b0] sm:$0xf0] }
0x196c   :  { %v2955_v18 = vpop.f32.mrf.mxu0  ;;  %v2980_v36 = vpop.f32.mrf.mxu1 }
0x196d   :  { %v2958_v37 = vpack.c.bf16 %v2955_v18, %v2953_v38  ;;  %v2981_v39 = vadd.f32 %v5594_v19, %v2980_v36  ;;  %v4369_v36 = vld [vmem:[#allocation10 + $0x33c] sm:$0xf] }
0x196f   :  { %4384 = vmatmul.msk.bf16.vlgmr.msrb.gmra.mxu0 %vm451_vm7, %v2958_v37  ;;  %v2986_v41 = vsel %vm472_vm8, %v2981_v39, -inf  ;;  %v4689_v37 = vld [vmem:[#allocation10 + $0x360] sm:$0xf0] }
0x1970   :  { %2987 = vmax.xlane.f32.xlu1 %v2986_v41 }
0x1974   :  { %v3104_v42 = vpop.f32.mrf.mxu1 }
0x1975   :  { %v3105_v22 = vadd.f32 %v5590_v16, %v3104_v42 }
0x1977   :  { %v3109_v24 = vsel %vm472_vm8, %v3105_v22, -inf }
0x1978   :  { %3110 = vmax.xlane.f32.xlu2 %v3109_v24 }
0x197c   :  { %v3106_v44 = vpop.f32.mrf.mxu1 }
0x197d   :  { %v3107_v47 = vadd.f32 %v5594_v19, %v3106_v44 }
0x197f   :  { %4396 = vmatmul.msk.bf16.vlgmr.msra.gmra.mxu0 %vm451_vm7, %v3185_v30  ;;  %v3112_v48 = vsel %vm472_vm8, %v3107_v47, -inf }
0x1980   :  { %3113 = vmax.xlane.f32.xlu0 %v3112_v48 }
0x19db   :  { %v2985_v51 = vpop.xlane.xlu0 %2984 }
0x19dc   :  { %v2989_v53 = vsub.f32 %v2979_v35, %v2985_v51  ;;  %v4373_v35 = vld [vmem:[#allocation10 + $0x38c] sm:$0xf] }
0x19dd   :  { %v4374_v18 = vor.u32 %v4690_v49, %v4373_v35 }
0x19de   :  { %v2991_v43 = vmul.f32 1.442695, %v2989_v53 }
0x19df   :  { %3048 = vmatpush.bf16.msra.mxu3 %v4374_v18 }
0x19e0   :  { %4894 = vpow2.f32 %v2991_v43 }
0x19e3   :  { %v2988_v40 = vpop.xlane.xlu1 %2987 }
0x19e4   :  { %v2990_v11 = vsub.f32 %v2981_v39, %v2988_v40  ;;  %v4370_v39 = vor.u32 %v4689_v37, %v4369_v36 }
0x19e6   :  { %v4895_v56 = vpop.eup %4894  ;;  %v2993_v52 = vmul.f32 1.442695, %v2990_v11  ;;  %3049 = vmatpush.bf16.msra.mxu3 %v4370_v39  ;;  %v4465_v39 = vld [vmem:[#allocation10 + $0x4d0] sm:$0xf] }
0x19e7   :  { %v2995_v26 = vsel %vm472_vm8, %v4895_v56, 0.0 }
0x19e8   :  { %2996 = vadd.xlane.f32.xlu0 %v2995_v26 }
0x19eb   :  { %v3111_v1 = vpop.xlane.xlu2 %3110 }
0x19ec   :  { %v3115_v57 = vsub.f32 %v3105_v22, %v3111_v1  ;;  %v5634_v58 = vpop.f32.mrf.mxu0 }
0x19ee   :  { %v3117_v60 = vmul.f32 1.442695, %v3115_v57 }
0x19f0   :  { %4896 = vpow2.f32 %v3117_v60 }
0x19f1   :  { %4898 = vpow2.f32 %v2993_v52 }
0x19f3   :  { %v3114_v62 = vpop.xlane.xlu0 %3113 }
0x19f4   :  { %v5636_v46 = vpop.f32.mrf.mxu0  ;;  %v3116_v3 = vsub.f32 %v3107_v47, %v3114_v62  ;;  %v4389_v62 = vld [vmem:[#allocation10 + $0x3dc] sm:$0xf] }
0x19f6   :  { %v5638_v61 = vpop.eup %4896  ;;  %v3119_v5 = vmul.f32 1.442695, %v3116_v3  ;;  %v4404_v3 = vld [vmem:[#allocation10 + $0x4cc] sm:$0xf] }
0x19f7   :  { %v3121_v45 = vsel %vm472_vm8, %v5638_v61, 0.0  ;;  %v4899_v15 = vpop.eup %4898 }
0x19f8   :  { %3122 = vadd.xlane.f32.xlu0 %v3121_v45  ;;  %4900 = vpow2.f32 %v3119_v5  ;;  %v2998_v50 = vsel %vm472_vm8, %v4899_v15, 0.0  ;;  %v4692_v45 = vld [vmem:[#allocation10 + $0x450] sm:$0xf0] }
0x19fc   :  { %v3203_v63 = vpop.f32.mrf.mxu0 }
0x19fd   :  { %v3204_v4 = vadd.f32 %v5590_v16, %v3203_v63  ;;  %v4691_v63 = vld [vmem:[#allocation10 + $0x400] sm:$0xf0] }
0x19fe   :  { %v4901_v25 = vpop.eup %4900 }
0x19ff   :  { %v3208_v55 = vsel %vm472_vm8, %v3204_v4, -inf  ;;  %v3124_v16 = vsel %vm472_vm8, %v4901_v25, 0.0 }
0x1a00   :  { %3209 = vmax.xlane.f32.xlu1 %v3208_v55  ;;  %v4694_v55 = vld [vmem:[#allocation10 + $0x4f0] sm:$0xf0] }
0x1a01   :  { %v4405_v5 = vor.u32 %v4694_v55, %v4404_v3  ;;  %v4701_v3 = vld [vmem:[#allocation10 + $0x394] sm:$0xf] }
0x1a04   :  { %v3205_v6 = vpop.f32.mrf.mxu0 }
0x1a05   :  { %v3206_v9 = vadd.f32 %v5594_v19, %v3205_v6  ;;  %v4693_v6 = vld [vmem:[#allocation10 + $0x4a0] sm:$0xf0] }
0x1a07   :  { %v3211_v12 = vsel %vm472_vm8, %v3206_v9, -inf }
0x1a08   :  { %3212 = vmax.xlane.f32.xlu2 %v3211_v12  ;;  %2999 = vadd.xlane.f32.xlu1 %v2998_v50 }
0x1a10   :  { %3125 = vadd.xlane.f32.xlu1 %v3124_v16 }
0x1a20   :  { %3006 = vrot.lane.b32.xlu2 %v5615_v7, %s5148_s6 }
0x1a5b   :  { %v2997_v14 = vpop.xlane.xlu0 %2996 }
0x1a6b   :  { %v3123_v41 = vpop.xlane.xlu0 %3122 }
0x1a73   :  { %v3210_v0 = vpop.xlane.xlu1 %3209 }
0x1a74   :  { %v3214_v13 = vsub.f32 %v3204_v4, %v3210_v0  ;;  %v4390_v4 = vor.u32 %v4691_v63, %v4389_v62  ;;  %v4433_v63 = vld [vmem:[#allocation10 + $0x390] sm:$0xf] }
0x1a76   :  { %v3216_v59 = vmul.f32 1.442695, %v3214_v13 }
0x1a78   :  { %4902 = vpow2.f32 %v3216_v59 }
0x1a79   :  { %4904 = vrcp.f32 %v2997_v14 }
0x1a7b   :  { %v3213_v19 = vpop.xlane.xlu2 %3212  ;;  %v3000_v29 = vpop.xlane.xlu1 %2999 }
0x1a7c   :  { %v3215_v17 = vsub.f32 %v3206_v9, %v3213_v19  ;;  %4906 = vrcp.f32 %v3000_v29 }
0x1a7e   :  { %v4903_v2 = vpop.eup %4902  ;;  %v3218_v21 = vmul.f32 1.442695, %v3215_v17 }
0x1a7f   :  { %v3220_v20 = vsel %vm472_vm8, %v4903_v2, 0.0  ;;  %v4905_v54 = vpop.eup %4904 }
0x1a80   :  { %4908 = vpow2.f32 %v3218_v21  ;;  %3221 = vadd.xlane.f32.xlu0 %v3220_v20  ;;  %v3003_v27 = vmul.f32 %v4905_v54, %v4895_v56 }
0x1a82   :  { %v4907_v28 = vpop.eup %4906 }
0x1a83   :  { %v3004_v10 = vmul.f32 %v4907_v28, %v4899_v15  ;;  %v3007_v31 = vpop.permute.xlu2 %3006  ;;  %v3126_v42 = vpop.xlane.xlu1 %3125  ;;  %v4400_v15 = vld [vmem:[#allocation10 + $0x47c] sm:$0xf] }
0x1a84   :  { %3019 = vmatpush.bf16.msrb.mxu2 %v3007_v31  ;;  %4910 = vrcp.f32 %v3126_v42  ;;  %v4401_v9 = vor.u32 %v4693_v6, %v4400_v15  ;;  %v4709_v42 = vld [vmem:[#allocation10 + $0x4d4] sm:$0xf]  ;;  %v4425_v6 = vld [vmem:[#allocation10 + $0x340] sm:$0xf] }
0x1a85   :  { %v3005_v32 = vpack.c.bf16 %v3004_v10, %v3003_v27  ;;  %4912 = vrcp.f32 %v3123_v41  ;;  %v4710_v41 = vld [vmem:[#allocation10 + $0x4f4] sm:$0xf0] }
0x1a86   :  { %v4909_v38 = vpop.eup %4908 }
0x1a87   :  { %4366 = vmatmul.msk.bf16.vlgmr.msrb.gmra.mxu2 %vm472_vm8, %v3005_v32  ;;  %v3223_v33 = vsel %vm472_vm8, %v4909_v38, 0.0 }
0x1a88   :  { %3224 = vadd.xlane.f32.xlu1 %v3223_v33 }
0x1a8a   :  { %v4911_v24 = vpop.eup %4910 }
0x1a8b   :  { %v4913_v44 = vpop.eup %4912  ;;  %v3130_v47 = vmul.f32 %v4911_v24, %v4901_v25  ;;  %v4467_v24 = vld [vmem:[#allocation10 + $0x4f8] sm:$0xf0] }
0x1a8c   :  { %v3129_v48 = vmul.f32 %v4913_v44, %v5638_v61  ;;  %v4393_v61 = vld [vmem:[#allocation10 + $0x42c] sm:$0xf]  ;;  %v4470_v44 = vor.u32 %v4709_v42, %v4467_v24 }
0x1a8d   :  { %v4394_v52 = vor.u32 %v4692_v45, %v4393_v61  ;;  %v4703_v61 = vld [vmem:[#allocation10 + $0x3e4] sm:$0xf]  ;;  %v4716_v42 = vld [vmem:[#allocation11 + $0xa8] sm:$0xff] }
0x1a8e   :  { %v3131_v51 = vpack.c.bf16 %v3130_v47, %v3129_v48  ;;  %3460 = vmatpush.bf16.msrb.mxu0 %v4470_v44  ;;  %v4457_v47 = vld [vmem:[#allocation10 + $0x480] sm:$0xf]  ;;  %v4707_v48 = vld [vmem:[#allocation10 + $0x484] sm:$0xf] }
0x1a8f   :  { %3174 = vmatpush.bf16.msrb.mxu3 %v4394_v52  ;;  %v4443_v52 = vld [vmem:[#allocation10 + $0x408] sm:$0xf0]  ;;  %v4723_v44 = vld [vmem:[#allocation11 + $0xe0] sm:$0xff] }
0x1a90   :  { %v4446_v62 = vor.u32 %v4703_v61, %v4443_v52 }
0x1a93   :  { %3175 = vmatpush.bf16.msrb.mxu3 %v4390_v4  ;;  %v4702_v4 = vld [vmem:[#allocation10 + $0x3b4] sm:$0xf0] }
0x1a94   :  { %3132 = vrot.lane.b32.xlu0 %v5615_v7, %s5137_s23  ;;  %v4434_v55 = vor.u32 %v4702_v4, %v4433_v63  ;;  %v4722_v4 = vld [vmem:[#allocation11 + $0xd8] sm:$0xff] }
0x1aa1   :  { %3231 = vrot.lane.b32.xlu1 %v5615_v7, %s5149_s20 }
0x1af3   :  { %v3222_v22 = vpop.xlane.xlu0 %3221 }
0x1afb   :  { %v3225_v30 = vpop.xlane.xlu1 %3224 }
0x1afc   :  { %4914 = vrcp.f32 %v3225_v30  ;;  %v4708_v30 = vld [vmem:[#allocation10 + $0x4a4] sm:$0xf0] }
0x1afd   :  { %4916 = vrcp.f32 %v3222_v22  ;;  %v4466_v22 = vor.u32 %v4710_v41, %v4465_v39  ;;  %v4724_v41 = vld [vmem:[#allocation11 + $0xe8] sm:$0xff] }
0x1b02   :  { %v4915_v43 = vpop.eup %4914 }
0x1b03   :  { %v4917_v56 = vpop.eup %4916  ;;  %v3229_v26 = vmul.f32 %v4915_v43, %v4909_v38  ;;  %v4449_v43 = vld [vmem:[#allocation10 + $0x430] sm:$0xf] }
0x1b04   :  { %v3228_v57 = vmul.f32 %v4917_v56, %v4903_v2  ;;  %v4762_v2 = vld [vmem:[#allocation13 + $0x1c] ss:$0 sm:$0xff]  ;;  %v4706_v56 = vld [vmem:[#allocation10 + $0x454] sm:$0xf0] }
0x1b06   :  { %v3133_v7 = vpop.permute.xlu0 %3132  ;;  %v3230_v11 = vpack.c.bf16 %v3229_v26, %v3228_v57  ;;  %v4705_v26 = vld [vmem:[#allocation10 + $0x434] sm:$0xf]  ;;  %v4451_v57 = vld [vmem:[#allocation10 + $0x458] sm:$0xf0] }
0x1b07   :  { %3145 = vmatpush.bf16.msra.mxu2 %v3133_v7  ;;  %v4458_v7 = vor.u32 %v4708_v30, %v4457_v47 }
0x1b0a   :  { %v3021_v53 = vpop.f32.mrf.mxu2  ;;  %4386 = vmatmul.msk.bf16.vlgmr.msra.gmra.mxu2 %vm472_vm8, %v3131_v51  ;;  %v4459_v51 = vld [vmem:[#allocation10 + $0x4a8] sm:$0xf0] }
0x1b0b   :  { %3273 = vmatpush.bf16.msrb.mxu2 %v4405_v5  ;;  %v4435_v5 = vld [vmem:[#allocation10 + $0x3b8] sm:$0xf0] }
0x1b0c   :  { %v4438_v15 = vor.u32 %v4701_v3, %v4435_v5  ;;  %v4715_v3 = vld [vmem:[#allocation11 + $0xa0] sm:$0xff]  ;;  %v4720_v5 = vld [vmem:[#allocation11 + $0xc8] sm:$0xff] }
0x1b0f   :  { %3274 = vmatpush.bf16.msrb.mxu2 %v4401_v9  ;;  %v4700_v9 = vld [vmem:[#allocation10 + $0x364] sm:$0xf0] }
0x1b12   :  { %v3023_v1 = vpop.f32.mrf.mxu2 }
0x1b13   :  { %v3026_v60 = vpack.c.bf16 %v3023_v1, %v3021_v53  ;;  %v3232_v40 = vpop.permute.xlu1 %3231  ;;  %v4462_v53 = vor.u32 %v4707_v48, %v4459_v51  ;;  %v4450_v1 = vor.u32 %v4706_v56, %v4449_v43 }
0x1b14   :  { %3244 = vmatpush.bf16.msra.mxu1 %v3232_v40  ;;  %v4441_v40 = vld [vmem:[#allocation10 + $0x3e0] sm:$0xf] }
0x1b15   :  { %4375 = vmatmul.msk.bf16.vlgmr.msra.gmra.mxu3 %vm451_vm7, %v3026_v60  ;;  %3461 = vmatpush.bf16.msrb.mxu0 %v4462_v53  ;;  %v4454_v60 = vor.u32 %v4705_v26, %v4451_v57  ;;  %v4763_v26 = vld [vmem:[#allocation13 + $0x1d] ss:$0 sm:$0xff] }
0x1b16   :  { %3446 = vmatpush.bf16.msra.mxu3 %v4466_v22 }
0x1b17   :  { %4397 = vmatmul.msk.bf16.vlgmr.msra.gmra.mxu1 %vm472_vm8, %v3230_v11  ;;  %v4704_v11 = vld [vmem:[#allocation10 + $0x404] sm:$0xf0] }
0x1b18   :  { %v4442_v45 = vor.u32 %v4704_v11, %v4441_v40  ;;  %v4764_v40 = vld [vmem:[#allocation13 + $0x1e] ss:$0 sm:$0xff] }
0x1b19   :  { %3462 = vmatpush.bf16.msrb.mxu0 %v4454_v60 }
0x1b1a   :  { %3447 = vmatpush.bf16.msra.mxu3 %v4458_v7 }
0x1b1d   :  { %3463 = vmatpush.bf16.msrb.mxu0 %v4446_v62 }
0x1b1e   :  { %3448 = vmatpush.bf16.msra.mxu3 %v4450_v1 }
0x1b21   :  { %3464 = vmatpush.bf16.msrb.mxu0 %v4438_v15  ;;  %v4713_v15 = vld [vmem:[#allocation11 + $0x90] sm:$0xff] }
0x1b22   :  { %3449 = vmatpush.bf16.msra.mxu3 %v4442_v45 }
0x1b26   :  { %3450 = vmatpush.bf16.msra.mxu3 %v4434_v55  ;;  %v4721_v55 = vld [vmem:[#allocation11 + $0xd0] sm:$0xff] }
0x1b8d   :  { %v3147_v12 = vpop.f32.mrf.mxu2 }
0x1b94   :  { %v3246_v50 = vpop.f32.mrf.mxu1 }
0x1b95   :  { %v3149_v25 = vpop.f32.mrf.mxu2 }
0x1b96   :  { %v3152_v16 = vpack.c.bf16 %v3149_v25, %v3147_v12  ;;  %v4699_v12 = vld [vmem:[#allocation10 + $0x344] sm:$0xf]  ;;  %v4427_v25 = vld [vmem:[#allocation10 + $0x368] sm:$0xf0] }
0x1b98   :  { %4395 = vmatmul.msk.bf16.vlgmr.msrb.gmra.mxu3 %vm451_vm7, %v3152_v16  ;;  %v3051_v59 = vpop.f32.mrf.mxu3  ;;  %v4430_v16 = vor.u32 %v4699_v12, %v4427_v25  ;;  %v3360_v12 = vld [vmem:[#allocation13 + $0x1f] sm:$0x3] }
0x1b99   :  { %v3081_v29 = vadd.f32 %v5634_v58, %v3051_v59  ;;  %v4697_v59 = vld [vmem:[#allocation10 + $0x2f4] sm:$0xf]  ;;  %v3363_v25 = vperm.slane %v3360_v12, 1 }
0x1b9a   :  { %3465 = vmatpush.bf16.msrb.mxu0 %v4430_v16 }
0x1b9c   :  { %v3248_v0 = vpop.f32.mrf.mxu1 }
0x1b9d   :  { %v3251_v13 = vpack.c.bf16 %v3248_v0, %v3246_v50  ;;  %v4426_v50 = vor.u32 %v4700_v9, %v4425_v6  ;;  %v4417_v0 = vld [vmem:[#allocation10 + $0x2f0] sm:$0xf]  ;;  %v4719_v6 = vld [vmem:[#allocation11 + $0xc0] sm:$0xff] }
0x1b9e   :  { %v4711_v9 = vld [vmem:[#allocation11 + $0x80] sm:$0xff] }
0x1b9f   :  { %4406 = vmatmul.msk.bf16.vlgmr.msrb.gmra.mxu2 %vm451_vm7, %v3251_v13  ;;  %3451 = vmatpush.bf16.msra.mxu3 %v4426_v50  ;;  %v4698_v13 = vld [vmem:[#allocation10 + $0x314] sm:$0xf0] }
0x1ba0   :  { %v3053_v14 = vpop.f32.mrf.mxu3 }
0x1ba1   :  { %v3083_v27 = vadd.f32 %v5636_v46, %v3053_v14  ;;  %v4418_v14 = vor.u32 %v4698_v13, %v4417_v0 }
0x1ba3   :  { %3452 = vmatpush.bf16.msra.mxu3 %v4418_v14 }
0x1c1b   :  { %v3177_v19 = vpop.f32.mrf.mxu3 }
0x1c1c   :  { %v3182_v17 = vadd.f32 %v3177_v19, %v3081_v29  ;;  %v4419_v19 = vld [vmem:[#allocation10 + $0x318] sm:$0xf0] }
0x1c22   :  { %v3276_v21 = vpop.f32.mrf.mxu2 }
0x1c23   :  { %v3281_v20 = vadd.f32 %v3276_v21, %v3182_v17  ;;  %v3179_v28 = vpop.f32.mrf.mxu3  ;;  %v4422_v17 = vor.u32 %v4697_v59, %v4419_v19  ;;  %v4409_v21 = vld [vmem:[#allocation10 + $0x2a0] sm:$0xf]  ;;  %v3362_v59 = vperm.slane %v3360_v12, 0 }
0x1c24   :  { %v3183_v31 = vadd.f32 %v3179_v28, %v3083_v27 }
0x1c25   :  { %v3287_v54 = vadd.f32 %v4762_v2, %v3281_v20  ;;  %3466 = vmatpush.bf16.msrb.mxu0 %v4422_v17  ;;  %v4696_v20 = vld [vmem:[#allocation10 + $0x2c4] sm:$0xf0] }
0x1c26   :  { %v4410_v27 = vor.u32 %v4696_v20, %v4409_v21 }
0x1c27   :  { %v5666_v10 = vadd.f32 %v3287_v54, %v5555_v23  ;;  %v4695_v54 = vld [vmem:[#allocation10 + $0x2a4] sm:$0xf] }
0x1c28   :  { %3453 = vmatpush.bf16.msra.mxu3 %v4410_v27 }
0x1c29   :  { %3293 = vadd.xlane.f32.xlu2 %v5666_v10 }
0x1c2a   :  { %v3278_v32 = vpop.f32.mrf.mxu2 }
0x1c2b   :  { %v3282_v38 = vadd.f32 %v3278_v32, %v3183_v31  ;;  %v4411_v31 = vld [vmem:[#allocation10 + $0x2c8] sm:$0xf0] }
0x1c2c   :  { %v4414_v32 = vor.u32 %v4695_v54, %v4411_v31  ;;  %v4765_v31 = vld [vmem:[#allocation13 + $0x21] ss:$0 sm:$0xff] }
0x1c2d   :  { %v3288_v33 = vadd.f32 %v4762_v2, %v3282_v38  ;;  %v4726_v38 = vld [vmem:[#allocation11 + $0xf8] sm:$0xff] }
0x1c2e   :  { %3467 = vmatpush.bf16.msrb.mxu0 %v4414_v32  ;;  %3627 = vmatpush.bf16.msra.mxu2 %v4726_v38 }
0x1c2f   :  { %v5670_v35 = vadd.f32 %v3288_v33, %v5559_v34  ;;  %v4718_v33 = vld [vmem:[#allocation11 + $0xb8] sm:$0xff] }
0x1c30   :  { %3613 = vmatpush.bf16.msrb.mxu1 %v4718_v33 }
0x1c31   :  { %3295 = vadd.xlane.f32.xlu0 %v5670_v35 }
0x1c9c   :  { %v3294_v58 = vpop.xlane.xlu2 %3293 }
0x1c9d   :  { %v3297_v49 = vmul.f32 %v3294_v58, %v5237_v8 }
0x1c9f   :  { %v5675_v18 = vsub.f32 %v5666_v10, %v3297_v49 }
0x1ca1   :  { %v3301_v23 = vmul.f32 %v5675_v18, %v5675_v18 }
0x1ca3   :  { %3303 = vadd.xlane.f32.xlu1 %v3301_v23  ;;  %v4725_v23 = vld [vmem:[#allocation11 + $0xf0] sm:$0xff] }
0x1ca4   :  { %v3296_v46 = vpop.xlane.xlu0 %3295  ;;  %3628 = vmatpush.bf16.msra.mxu2 %v4725_v23 }
0x1ca5   :  { %v3298_v36 = vmul.f32 %v3296_v46, %v5237_v8  ;;  %v4717_v46 = vld [vmem:[#allocation11 + $0xb0] sm:$0xff] }
0x1ca6   :  { %3614 = vmatpush.bf16.msrb.mxu1 %v4717_v46 }
0x1ca7   :  { %v5681_v37 = vsub.f32 %v5670_v35, %v3298_v36 }
0x1ca8   :  { %3629 = vmatpush.bf16.msra.mxu2 %v4724_v41 }
0x1ca9   :  { %v3302_v34 = vmul.f32 %v5681_v37, %v5681_v37 }
0x1caa   :  { %3615 = vmatpush.bf16.msrb.mxu1 %v4716_v42 }
0x1cab   :  { %3305 = vadd.xlane.f32.xlu2 %v3302_v34 }
0x1cac   :  { %3630 = vmatpush.bf16.msra.mxu2 %v4723_v44 }
0x1cae   :  { %3616 = vmatpush.bf16.msrb.mxu1 %v4715_v3 }
0x1cb0   :  { %3631 = vmatpush.bf16.msra.mxu2 %v4722_v4 }
0x1cb4   :  { %3632 = vmatpush.bf16.msra.mxu2 %v4721_v55 }
0x1cb8   :  { %3633 = vmatpush.bf16.msra.mxu2 %v4720_v5 }
0x1cbc   :  { %3634 = vmatpush.bf16.msra.mxu2 %v4719_v6 }
0x1d16   :  { %v3304_v29 = vpop.xlane.xlu1 %3303 }
0x1d17   :  { %v3307_v2 = vmul.f32 %v3304_v29, %v5237_v8 }
0x1d19   :  { %v3309_v28 = vadd.f32 1e-06, %v3307_v2 }
0x1d1b   :  { %4918 = vrsqrt.f32 %v3309_v28  ;;  %vm3317_vm8 = vweird.f32 %v3309_v28 }
0x1d1e   :  { %v3306_v58 = vpop.xlane.xlu2 %3305 }
0x1d1f   :  { %v3308_v49 = vmul.f32 %v3306_v58, %v5237_v8 }
0x1d21   :  { %v4919_v36 = vpop.eup %4918  ;;  %v3310_v34 = vadd.f32 1e-06, %v3308_v49 }
0x1d22   :  { %v3312_v39 = vmul.f32 %v4919_v36, %v3309_v28  ;;  %vm3318_vm7 = vweird.f32 %v4919_v36 }
0x1d23   :  { %4920 = vrsqrt.f32 %v3310_v34  ;;  %vm3319_vm3 = vmor %vm3317_vm8, %vm3318_vm7  ;;  %vm3327_vm5 = vweird.f32 %v3310_v34 }
0x1d24   :  { %v3313_v22 = vmul.f32 %v4919_v36, %v3312_v39 }
0x1d26   :  { %v3314_v24 = vmul.f32 0.5, %v3313_v22 }
0x1d28   :  { %v3315_v47 = vsub.f32 1.5, %v3314_v24 }
0x1d29   :  { %v4921_v30 = vpop.eup %4920 }
0x1d2a   :  { %v3316_v48 = vmul.f32 %v4919_v36, %v3315_v47  ;;  %v3322_v7 = vmul.f32 %v4921_v30, %v3310_v34  ;;  %vm3328_vm4 = vweird.f32 %v4921_v30 }
0x1d2b   :  { %vm3329_vm6 = vmor %vm3327_vm5, %vm3328_vm4 }
0x1d2c   :  { %v3323_v51 = vmul.f32 %v4921_v30, %v3322_v7  ;;  %v3320_v53 = vsel %vm3319_vm3, %v4919_v36, %v3316_v48 }
0x1d2d   :  { %v3331_v1 = vmul.f32 %v3320_v53, %v5675_v18  ;;  %v4714_v18 = vld [vmem:[#allocation11 + $0x98] sm:$0xff] }
0x1d2e   :  { %v3324_v43 = vmul.f32 0.5, %v3323_v51  ;;  %3617 = vmatpush.bf16.msrb.mxu1 %v4714_v18 }
0x1d2f   :  { %v3336_v11 = vmul.f32 %v4763_v26, %v3331_v1 }
0x1d30   :  { %v3325_v56 = vsub.f32 1.5, %v3324_v43 }
0x1d31   :  { %v3341_v52 = vadd.f32 %v4764_v40, %v3336_v11 }
0x1d32   :  { %v3326_v57 = vmul.f32 %v4921_v30, %v3325_v56  ;;  %3618 = vmatpush.bf16.msrb.mxu1 %v4713_v15 }
0x1d34   :  { %v3330_v60 = vsel %vm3329_vm6, %v4921_v30, %v3326_v57 }
0x1d35   :  { %v3332_v61 = vmul.f32 %v3330_v60, %v5681_v37  ;;  %v4712_v37 = vld [vmem:[#allocation11 + $0x88] sm:$0xff] }
0x1d36   :  { %3619 = vmatpush.bf16.msrb.mxu1 %v4712_v37 }
0x1d37   :  { %v3337_v45 = vmul.f32 %v4763_v26, %v3332_v61 }
0x1d39   :  { %v3342_v62 = vadd.f32 %v4764_v40, %v3337_v45  ;;  %v4766_v45 = vld [vmem:[%s5714_s7] ss:$0 sm:$0xff] }
0x1d3a   :  { %3620 = vmatpush.bf16.msrb.mxu1 %v4711_v9 }
0x1d3b   :  { %v3343_v63 = vpack.c.bf16 %v3342_v62, %v3341_v52 }
0x1d3d   :  { %3454 = vmatmul.bf16.vlgmr.msra.gmra.mxu3 %v3343_v63  ;;  %3468 = vmatmul.bf16.vlgmr.msrb.gmra.mxu0 %v3343_v63  ;;  %v4767_v63 = vld [vmem:[%s5714_s7 + $0x1] ss:$0 sm:$0xff] }
0x1dba   :  { %v3469_v50 = vpop.f32.mrf.mxu0 }
0x1dbb   :  { %v3470_v0 = vadd.f32 %v3469_v50, %v3363_v25 }
0x1dbd   :  { %v3475_v19 = vmax.f32 %v3470_v0, 0.0 }
0x1dc0   :  { %v3455_v16 = vpop.f32.mrf.mxu3 }
0x1dc1   :  { %v3456_v17 = vadd.f32 %v3455_v16, %v3362_v59 }
0x1dc2   :  { %v3471_v13 = vpop.f32.mrf.mxu0 }
0x1dc3   :  { %v3472_v14 = vadd.f32 %v3471_v13, %v3363_v25  ;;  %v3474_v54 = vmax.f32 %v3456_v17, 0.0 }
0x1dc5   :  { %v3477_v29 = vmax.f32 %v3472_v14, 0.0 }
0x1dc7   :  { %v3479_v2 = vpack.c.bf16 %v3477_v29, %v3475_v19 }
0x1dc8   :  { %v3457_v21 = vpop.f32.mrf.mxu3 }
0x1dc9   :  { %v3458_v20 = vadd.f32 %v3457_v21, %v3362_v59  ;;  %3635 = vmatmul.bf16.vlgmr.msra.gmra.mxu2 %v3479_v2 }
0x1dcb   :  { %v3476_v28 = vmax.f32 %v3458_v20, 0.0 }
0x1dcd   :  { %v3478_v27 = vpack.c.bf16 %v3476_v28, %v3474_v54 }
0x1dcf   :  { %3621 = vmatmul.bf16.vlgmr.msrb.gmra.mxu1 %v3478_v27 }
0x1e4c   :  { %v3622_v32 = vpop.f32.mrf.mxu1  ;;  %v3636_v38 = vpop.f32.mrf.mxu2 }
0x1e4d   :  { %v3623_v33 = vadd.f32 %v4765_v31, %v3622_v32 }
0x1e4f   :  { %v3637_v58 = vadd.f32 %v3636_v38, %v3623_v33 }
0x1e51   :  { %v3641_v49 = vadd.f32 %v3637_v58, %v5666_v10 }
0x1e53   :  { %3645 = vadd.xlane.f32.xlu2 %v3641_v49 }
0x1e54   :  { %v3624_v23 = vpop.f32.mrf.mxu1  ;;  %v3638_v36 = vpop.f32.mrf.mxu2 }
0x1e55   :  { %v3625_v46 = vadd.f32 %v4765_v31, %v3624_v23 }
0x1e57   :  { %v3639_v34 = vadd.f32 %v3638_v36, %v3625_v46 }
0x1e59   :  { %v3642_v39 = vadd.f32 %v3639_v34, %v5670_v35 }
0x1e5b   :  { %3647 = vadd.xlane.f32.xlu0 %v3642_v39 }
0x1ec6   :  { %v3646_v41 = vpop.xlane.xlu2 %3645 }
0x1ec7   :  { %v3649_v42 = vmul.f32 %v3646_v41, %v5237_v8 }
0x1ec9   :  { %v3651_v22 = vsub.f32 %v3641_v49, %v3649_v42 }
0x1ecb   :  { %v3653_v24 = vmul.f32 %v3651_v22, %v3651_v22 }
0x1ecd   :  { %3655 = vadd.xlane.f32.xlu2 %v3653_v24 }
0x1ece   :  { %v3648_v44 = vpop.xlane.xlu0 %3647 }
0x1ecf   :  { %v3650_v47 = vmul.f32 %v3648_v44, %v5237_v8 }
0x1ed1   :  { %v3652_v30 = vsub.f32 %v3642_v39, %v3650_v47 }
0x1ed3   :  { %v3654_v48 = vmul.f32 %v3652_v30, %v3652_v30 }
0x1ed5   :  { %3657 = vadd.xlane.f32.xlu0 %v3654_v48 }
0x1f40   :  { %v3656_v10 = vpop.xlane.xlu2 %3655 }
0x1f41   :  { %v3659_v7 = vmul.f32 %v3656_v10, %v5237_v8 }
0x1f43   :  { %v3661_v51 = vadd.f32 1e-06, %v3659_v7 }
0x1f45   :  { %4922 = vrsqrt.f32 %v3661_v51  ;;  %vm3669_vm10 = vweird.f32 %v3661_v51 }
0x1f48   :  { %v3658_v53 = vpop.xlane.xlu0 %3657 }
0x1f49   :  { %v3660_v35 = vmul.f32 %v3658_v53, %v5237_v8 }
0x1f4b   :  { %v4923_v43 = vpop.eup %4922  ;;  %v3662_v56 = vadd.f32 1e-06, %v3660_v35 }
0x1f4c   :  { %v3664_v26 = vmul.f32 %v4923_v43, %v3661_v51  ;;  %vm3670_vm9 = vweird.f32 %v4923_v43 }
0x1f4d   :  { %4924 = vrsqrt.f32 %v3662_v56  ;;  %vm3671_vm11 = vmor %vm3669_vm10, %vm3670_vm9  ;;  %vm3679_vm13 = vweird.f32 %v3662_v56 }
0x1f4e   :  { %v3665_v1 = vmul.f32 %v4923_v43, %v3664_v26 }
0x1f50   :  { %v3666_v57 = vmul.f32 0.5, %v3665_v1 }
0x1f52   :  { %v3667_v60 = vsub.f32 1.5, %v3666_v57 }
0x1f53   :  { %v4925_v40 = vpop.eup %4924 }
0x1f54   :  { %v3668_v11 = vmul.f32 %v4923_v43, %v3667_v60  ;;  %v3674_v61 = vmul.f32 %v4925_v40, %v3662_v56  ;;  %vm3680_vm12 = vweird.f32 %v4925_v40 }
0x1f55   :  { %vm3681_vm14 = vmor %vm3679_vm13, %vm3680_vm12 }
0x1f56   :  { %v3672_v52 = vsel %vm3671_vm11, %v4923_v43, %v3668_v11  ;;  %v3675_v62 = vmul.f32 %v4925_v40, %v3674_v61 }
0x1f57   :  { %v3683_v8 = vmul.f32 %v3672_v52, %v3651_v22 }
0x1f58   :  { %v3676_v4 = vmul.f32 0.5, %v3675_v62 }
0x1f59   :  { %v3688_v3 = vmul.f32 %v4766_v45, %v3683_v8 }
0x1f5a   :  { %v3677_v55 = vsub.f32 1.5, %v3676_v4 }
0x1f5b   :  { %v3693_v18 = vadd.f32 %v4767_v63, %v3688_v3 }
0x1f5c   :  { %v3678_v5 = vmul.f32 %v4925_v40, %v3677_v55 }
0x1f5d   :  { %3695 = vst [vmem:[#allocation14] sm:$0xff] %v3693_v18 }
0x1f5e   :  { %v3682_v15 = vsel %vm3681_vm14, %v4925_v40, %v3678_v5 }
0x1f5f   :  { %v3684_v6 = vmul.f32 %v3682_v15, %v3652_v30 }
0x1f61   :  { %v3689_v37 = vmul.f32 %v4766_v45, %v3684_v6 }
0x1f63   :  { %v3694_v9 = vadd.f32 %v4767_v63, %v3689_v37 }
0x1f65   :  { %3696 = vst [vmem:[#allocation14 + $0x8] sm:$0xff] %v3694_v9 }
0x1f66   :  { %3709 = dma.vmem_to_hbm [thread:$0]  %s3702_s25, 256, %s3704_s28, [#allocation4], %s5133_s13, %s5133_s13, %s5134_s14  }
0x1f67   :  { %5130 = dma.done.wait [#allocation4], 256  }
0x1f68   :  { %5131 = vsyncadd [#allocation4], 4294967040 }
0x1f69   :  { %3714 = vsyncpa [#allocation3], 1 }
0x1f6a   :  { %3715 = vsyncpa [#allocation6], 1 }
0x1f6b   :  { %3716 = vsyncpa [#allocation9], 1 }
0x1f6c   :  { %3717 = vsyncpa [#allocation12], 1 }
0x1f6d   :  { %3718 = vsyncpa [#allocation4], 1 }

</bundles_post_ra>
